<compile_context>
chip_gen: v5e
topology: v5e:2x2
jax: 0.10.0
libtpu: 0.0.40
codegen_flags: <defaults>
</compile_context>

<pallas_src>
import functools

import jax
import jax.numpy as jnp
from jax.experimental import pallas as pl
from jax.experimental.pallas import tpu as pltpu

_VMEM_LIMIT = 48 * 1024 * 1024
_EPS = 1e-5
_SLOPE = 0.2


def _round_up(x, m):
    return (x + m - 1) // m * m


# ------------------------------------------------------------------ kernels --
def _matmul_stats_kernel(x_ref, w_ref, y_ref, stats_ref):
    """BN layers, pass 1: y = x @ w (bf16 in, f32 acc). Accumulate per-channel
    sum and sum-of-squares into a (2, C) accumulator resident across the M grid."""
    i = pl.program_id(0)
    y = jnp.dot(x_ref[...], w_ref[...], preferred_element_type=jnp.float32)
    y_ref[...] = y

    @pl.when(i == 0)
    def _():
        stats_ref[...] = jnp.zeros_like(stats_ref)

    s = jnp.sum(y, axis=0, keepdims=True)
    ss = jnp.sum(y * y, axis=0, keepdims=True)
    stats_ref[...] += jnp.concatenate([s, ss], axis=0)


def _bn_act_kernel(y_ref, stats_ref, gamma_ref, beta_ref, o_ref, *,
                   count, use_relu):
    """BN layers, pass 2: normalize with global batch stats + affine + LeakyReLU."""
    y = y_ref[...]
    inv_n = 1.0 / count                                  # static python float
    mean = stats_ref[0:1, :] * inv_n
    var = jnp.maximum(stats_ref[1:2, :] * inv_n - mean * mean, 0.0)
    scale = jax.lax.rsqrt(var + _EPS) * gamma_ref[...]   # rsqrt -> EUP slot
    y = (y - mean) * scale + beta_ref[...]
    if use_relu:
        y = jnp.where(y >= 0, y, _SLOPE * y)
    o_ref[...] = y.astype(o_ref.dtype)


def _matmul_bias_act_kernel(x_ref, w_ref, b_ref, o_ref, *, use_relu):
    """Non-BN layers (first / last conv): y = x @ w + b (+ LeakyReLU)."""
    y = jnp.dot(x_ref[...], w_ref[...], preferred_element_type=jnp.float32)
    y = y + b_ref[...]
    if use_relu:
        y = jnp.where(y >= 0, y, _SLOPE * y)
    o_ref[...] = y.astype(o_ref.dtype)


# -------------------------------------------------------- per-layer wrapper --
def conv_block(x, w, b, gamma, beta, *, stride, use_bn, use_relu,
               block_m=512, out_dtype=jnp.float32):
    """One 4x4 conv (pad=1) + optional BatchNorm(batch stats) + optional LeakyReLU.
    x: (N, H, W, Cin) NHWC.  w: (Cout, Cin, 4, 4) PyTorch OIHW."""
    N, H, W_, Cin = x.shape
    Cout = w.shape[0]
    kh = kw = 4
    pad = 1
    Hout = (H + 2 * pad - kh) // stride + 1
    Wout = (W_ + 2 * pad - kw) // stride + 1
    if Hout <= 0 or Wout <= 0:
        raise ValueError(
            f"spatial size {H}x{W_} too small for a 4x4/pad1 conv stack")

    # --- im2col patch extraction (plain-JAX glue), bf16 for the MXU ----------
    xp = jnp.pad(x, ((0, 0), (pad, pad), (pad, pad), (0, 0)))
    cols = [xp[:, i:i + stride * Hout:stride, j:j + stride * Wout:stride, :]
            for i in range(kh) for j in range(kw)]
    # (N, Hout, Wout, kh*kw, Cin) -> (M, kh*kw*Cin), flatten order (kh, kw, Cin)
    X = jnp.stack(cols, axis=3).reshape(N * Hout * Wout, kh * kw * Cin)

    M, K = X.shape
    Kp = _round_up(K, 128)                 # lane-dense reduction axis
    Cp = _round_up(Cout, 128)              # lane-dense output axis
    tm = min(block_m, _round_up(M, 8))     # M tile (sublane-aligned)
    Mp = _round_up(M, tm)
    n_tiles = Mp // tm

    Xp = jnp.zeros((Mp, Kp), jnp.bfloat16).at[:M, :K].set(X.astype(jnp.bfloat16))
    # OIHW -> (kh, kw, Cin, Cout) -> (K, Cout) to match the patch flatten order.
    Wm = jnp.transpose(w, (2, 3, 1, 0)).reshape(K, Cout)
    Wp = jnp.zeros((Kp, Cp), jnp.bfloat16).at[:K, :Cout].set(Wm.astype(jnp.bfloat16))

    x_spec = pl.BlockSpec((tm, Kp), lambda i: (i, 0))
    w_spec = pl.BlockSpec((Kp, Cp), lambda i: (0, 0))
    row_spec = pl.BlockSpec((1, Cp), lambda i: (0, 0))
    y_spec = pl.BlockSpec((tm, Cp), lambda i: (i, 0))
    stats_spec = pl.BlockSpec((2, Cp), lambda i: (0, 0))

    if use_bn:
        # -------- pass 1: matmul + streaming channel statistics --------------
        y, stats = pl.pallas_call(
            _matmul_stats_kernel,
            grid=(n_tiles,),
            in_specs=[x_spec, w_spec],
            out_specs=[y_spec, stats_spec],
            out_shape=[jax.ShapeDtypeStruct((Mp, Cp), jnp.float32),
                       jax.ShapeDtypeStruct((2, Cp), jnp.float32)],
            compiler_params=pltpu.CompilerParams(
                dimension_semantics=("arbitrary",),    # stats accumulate over M
                vmem_limit_bytes=_VMEM_LIMIT),
        )(Xp, Wp)

        gp = jnp.ones((1, Cp), jnp.float32).at[0, :Cout].set(gamma)
        bp = jnp.zeros((1, Cp), jnp.float32).at[0, :Cout].set(beta)
        # -------- pass 2: normalize + affine + LeakyReLU, tile by tile --------
        out = pl.pallas_call(
            functools.partial(_bn_act_kernel, count=float(M), use_relu=use_relu),
            grid=(n_tiles,),
            in_specs=[y_spec, stats_spec, row_spec, row_spec],
            out_specs=y_spec,
            out_shape=jax.ShapeDtypeStruct((Mp, Cp), out_dtype),
            compiler_params=pltpu.CompilerParams(
                dimension_semantics=("parallel",),
                vmem_limit_bytes=_VMEM_LIMIT),
        )(y, stats, gp, bp)
    else:
        bp = jnp.zeros((1, Cp), jnp.float32).at[0, :Cout].set(b)
        out = pl.pallas_call(
            functools.partial(_matmul_bias_act_kernel, use_relu=use_relu),
            grid=(n_tiles,),
            in_specs=[x_spec, w_spec, row_spec],
            out_specs=y_spec,
            out_shape=jax.ShapeDtypeStruct((Mp, Cp), out_dtype),
            compiler_params=pltpu.CompilerParams(
                dimension_semantics=("parallel",),
                vmem_limit_bytes=_VMEM_LIMIT),
        )(Xp, Wp, bp)

    return out[:M, :Cout].reshape(N, Hout, Wout, Cout)


# --------------------------------------------------------------- parameters --
def make_layer_specs(input_nc, ndf=64, n_layers=3):
    """(cin, cout, stride, use_bn, use_relu) per conv, matching the PyTorch module."""
    specs = [(input_nc, ndf, 2, False, True)]
    nf_mult = 1
    for n in range(1, n_layers):
        nf_prev, nf_mult = nf_mult, min(2 ** n, 8)
        specs.append((ndf * nf_prev, ndf * nf_mult, 2, True, True))
    nf_prev, nf_mult = nf_mult, min(2 ** n_layers, 8)
    specs.append((ndf * nf_prev, ndf * nf_mult, 1, True, True))
    specs.append((ndf * nf_mult, 1, 1, False, False))
    return tuple(specs)


def init_params(key, specs):
    """Mirror init_weights(init_type='normal', gain=0.02): conv w ~ N(0,0.02),
    conv bias = 0, BN weight ~ N(1,0.02), BN bias = 0 (middle convs: bias=False)."""
    params = []
    for (cin, cout, _stride, use_bn, _use_relu) in specs:
        key, kw_, kg_ = jax.random.split(key, 3)
        w = 0.02 * jax.random.normal(kw_, (cout, cin, 4, 4), jnp.float32)
        b = jnp.zeros((cout,), jnp.float32)
        if use_bn:
            gamma = 1.0 + 0.02 * jax.random.normal(kg_, (cout,), jnp.float32)
        else:
            gamma = jnp.ones((cout,), jnp.float32)
        beta = jnp.zeros((cout,), jnp.float32)
        params.append(dict(w=w, b=b, gamma=gamma, beta=beta))
    return params


# ------------------------------------------------------------------ forward --
def nlayer_discriminator(x_nchw, params, specs, *, block_m=512):
    x = jnp.transpose(x_nchw, (0, 2, 3, 1))                  # NCHW -> NHWC
    last = len(specs) - 1
    for li, (p, (_cin, _cout, stride, use_bn, use_relu)) in enumerate(
            zip(params, specs)):
        x = conv_block(x, p["w"], p["b"], p["gamma"], p["beta"],
                       stride=stride, use_bn=use_bn, use_relu=use_relu,
                       block_m=block_m,
                       out_dtype=jnp.float32 if li == last else jnp.bfloat16)
    return jnp.transpose(x, (0, 3, 1, 2))                    # NHWC -> NCHW


# ------------------------------------------------------- pure-JAX reference --
def reference_forward(x_nchw, params, specs):
    x = x_nchw
    for p, (_cin, _cout, stride, use_bn, use_relu) in zip(params, specs):
        x = jax.lax.conv_general_dilated(
            x, p["w"], (stride, stride), [(1, 1), (1, 1)],
            dimension_numbers=("NCHW", "OIHW", "NCHW"))
        x = x + p["b"][None, :, None, None]
        if use_bn:
            mean = jnp.mean(x, axis=(0, 2, 3), keepdims=True)
            var = jnp.mean((x - mean) ** 2, axis=(0, 2, 3), keepdims=True)
            x = (x - mean) * jax.lax.rsqrt(var + _EPS)
            x = (x * p["gamma"][None, :, None, None]
                 + p["beta"][None, :, None, None])
        if use_relu:
            x = jnp.where(x >= 0, x, _SLOPE * x)
    return x


if __name__ == "__main__":
    # Small shapes: batch=2, input_nc=4, spatial=64, ndf=16, n_layers=3.
    # (spatial must be >= 32 for n_layers=3; 16 collapses the final conv to size 0.)
    N, Cin, H, W = 2, 4, 64, 64
    ndf, n_layers = 16, 3

    x = jax.random.normal(jax.random.PRNGKey(0), (N, Cin, H, W), jnp.float32)
    specs = make_layer_specs(Cin, ndf=ndf, n_layers=n_layers)
    params = init_params(jax.random.PRNGKey(1), specs)

    # block_m=128 so the toy shapes still exercise multi-tile grids (incl. the
    # cross-tile BatchNorm statistics accumulation).
    fwd = jax.jit(lambda xx, pp: nlayer_discriminator(xx, pp, specs, block_m=128))
    out = jax.block_until_ready(fwd(x, params))
    ref = jax.block_until_ready(reference_forward(x, params, specs))

    assert out.shape == ref.shape == (N, 1, 6, 6), (out.shape, ref.shape)
    max_err = float(jnp.max(jnp.abs(out - ref)))
    rel_err = float(jnp.linalg.norm(out - ref) / (jnp.linalg.norm(ref) + 1e-12))
    # bf16 MXU operands with f32 accumulation vs. pure-f32 reference -> loosened tol.
    assert rel_err < 5e-2 and max_err < 1.5e-1, (max_err, rel_err)
    print("KERNEL_OK")
</pallas_src>

<mosaic_0001>
module attributes {stable_mosaic.version = 11 : i64} {
  func.func @_matmul_bias_act_kernel(%arg0: i32, %arg1: memref<128x128xbf16, #tpu.memory_space<vmem>>, %arg2: memref<128x128xbf16, #tpu.memory_space<vmem>>, %arg3: memref<1x128xf32, #tpu.memory_space<vmem>>, %arg4: memref<128x128xbf16, #tpu.memory_space<vmem>>) attributes {dimension_semantics = [#tpu.dimension_semantics<parallel>], iteration_bounds = array<i64: 16>, scalar_prefetch = 0 : i64, scratch_operands = 0 : i64, tpu.core_type = #tpu.core_type<tc>, window_params = [{transform_indices = @transform_0, window_bounds = array<i64: 128, 128>}, {pipeline_mode = #tpu.pipeline_mode<synchronous>, transform_indices = @transform_1, window_bounds = array<i64: 128, 128>}, {pipeline_mode = #tpu.pipeline_mode<synchronous>, transform_indices = @transform_2, window_bounds = array<i64: 1, 128>}, {transform_indices = @transform_3, window_bounds = array<i64: 128, 128>}]} {
    %c0 = arith.constant 0 : index
    %c0_0 = arith.constant 0 : index
    %0 = vector.load %arg1[%c0, %c0_0] : memref<128x128xbf16, #tpu.memory_space<vmem>>, vector<128x128xbf16>
    %c0_1 = arith.constant 0 : index
    %c0_2 = arith.constant 0 : index
    %1 = vector.load %arg2[%c0_1, %c0_2] : memref<128x128xbf16, #tpu.memory_space<vmem>>, vector<128x128xbf16>
    %cst = arith.constant dense<0.000000e+00> : vector<128x128xf32>
    %2 = tpu.matmul %0, %1, %cst {dimension_numbers = #tpu.dot_dimension_numbers<[1], [0], [0], [1], [0, 0, 1, 1], [], []>} : vector<128x128xbf16>, vector<128x128xbf16>, vector<128x128xf32> -> vector<128x128xf32>
    %c0_3 = arith.constant 0 : index
    %c0_4 = arith.constant 0 : index
    %3 = vector.load %arg3[%c0_3, %c0_4] : memref<1x128xf32, #tpu.memory_space<vmem>>, vector<1x128xf32>
    %4 = vector.broadcast %3 : vector<1x128xf32> to vector<128x128xf32>
    %5 = arith.addf %2, %4 : vector<128x128xf32>
    %cst_5 = arith.constant 0.000000e+00 : f32
    %6 = vector.broadcast %cst_5 : f32 to vector<128x128xf32>
    %7 = arith.cmpf oge, %5, %6 : vector<128x128xf32>
    %cst_6 = arith.constant 2.000000e-01 : f32
    %8 = vector.broadcast %cst_6 : f32 to vector<128x128xf32>
    %9 = arith.mulf %8, %5 : vector<128x128xf32>
    %10 = arith.select %7, %5, %9 : vector<128x128xi1>, vector<128x128xf32>
    %11 = arith.truncf %10 : vector<128x128xf32> to vector<128x128xbf16>
    %c0_7 = arith.constant 0 : index
    %c0_8 = arith.constant 0 : index
    %12 = vector.load %arg4[%c0_7, %c0_8] : memref<128x128xbf16, #tpu.memory_space<vmem>>, vector<128x128xbf16>
    tpu.vector_store %arg4[%c0_7, %c0_8], %11 {strides = array<i32>} : memref<128x128xbf16, #tpu.memory_space<vmem>>, vector<128x128xbf16>,
    return
  }
  func.func @transform_0(%arg0: i32) -> (i32, i32) {
    %c0_i32 = arith.constant 0 : i32
    %c0_i32_0 = arith.constant 0 : i32
    return %arg0, %c0_i32 : i32, i32
  }
  func.func @transform_1(%arg0: i32) -> (i32, i32) {
    %c0_i32 = arith.constant 0 : i32
    %c0_i32_0 = arith.constant 0 : i32
    %c0_i32_1 = arith.constant 0 : i32
    return %c0_i32, %c0_i32_0 : i32, i32
  }
  func.func @transform_2(%arg0: i32) -> (i32, i32) {
    %c0_i32 = arith.constant 0 : i32
    %c0_i32_0 = arith.constant 0 : i32
    %c0_i32_1 = arith.constant 0 : i32
    return %c0_i32, %c0_i32_0 : i32, i32
  }
  func.func @transform_3(%arg0: i32) -> (i32, i32) {
    %c0_i32 = arith.constant 0 : i32
    %c0_i32_0 = arith.constant 0 : i32
    return %arg0, %c0_i32 : i32, i32
  }
}

module attributes {stable_mosaic.version = 11 : i64} {
  func.func @_matmul_stats_kernel(%arg0: i32, %arg1: memref<128x256xbf16, #tpu.memory_space<vmem>>, %arg2: memref<256x128xbf16, #tpu.memory_space<vmem>>, %arg3: memref<128x128xf32, #tpu.memory_space<vmem>>, %arg4: memref<2x128xf32, #tpu.memory_space<vmem>>) attributes {dimension_semantics = [#tpu.dimension_semantics<arbitrary>], iteration_bounds = array<i64: 4>, scalar_prefetch = 0 : i64, scratch_operands = 0 : i64, tpu.core_type = #tpu.core_type<tc>, window_params = [{transform_indices = @transform_0, window_bounds = array<i64: 128, 256>}, {pipeline_mode = #tpu.pipeline_mode<synchronous>, transform_indices = @transform_1, window_bounds = array<i64: 256, 128>}, {transform_indices = @transform_2, window_bounds = array<i64: 128, 128>}, {pipeline_mode = #tpu.pipeline_mode<synchronous>, transform_indices = @transform_3, window_bounds = array<i64: 2, 128>}]} {
    %c0 = arith.constant 0 : index
    %c0_0 = arith.constant 0 : index
    %0 = vector.load %arg1[%c0, %c0_0] : memref<128x256xbf16, #tpu.memory_space<vmem>>, vector<128x256xbf16>
    %c0_1 = arith.constant 0 : index
    %c0_2 = arith.constant 0 : index
    %1 = vector.load %arg2[%c0_1, %c0_2] : memref<256x128xbf16, #tpu.memory_space<vmem>>, vector<256x128xbf16>
    %cst = arith.constant dense<0.000000e+00> : vector<128x128xf32>
    %2 = tpu.matmul %0, %1, %cst {dimension_numbers = #tpu.dot_dimension_numbers<[1], [0], [0], [1], [0, 0, 1, 1], [], []>} : vector<128x256xbf16>, vector<256x128xbf16>, vector<128x128xf32> -> vector<128x128xf32>
    %c0_3 = arith.constant 0 : index
    %c0_4 = arith.constant 0 : index
    %3 = vector.load %arg3[%c0_3, %c0_4] : memref<128x128xf32, #tpu.memory_space<vmem>>, vector<128x128xf32>
    tpu.vector_store %arg3[%c0_3, %c0_4], %2 {strides = array<i32>} : memref<128x128xf32, #tpu.memory_space<vmem>>, vector<128x128xf32>,
    %c0_i32 = arith.constant 0 : i32
    %4 = arith.cmpi eq, %arg0, %c0_i32 : i32
    %5 = arith.extui %4 : i1 to i32
    %c0_i32_5 = arith.constant 0 : i32
    %6 = arith.cmpi ne, %5, %c0_i32_5 : i32
    scf.if %6 {
      %cst_12 = arith.constant 0.000000e+00 : f32
      %16 = vector.broadcast %cst_12 : f32 to vector<2x128xf32>
      %c0_13 = arith.constant 0 : index
      %c0_14 = arith.constant 0 : index
      %17 = vector.load %arg4[%c0_13, %c0_14] : memref<2x128xf32, #tpu.memory_space<vmem>>, vector<2x128xf32>
      tpu.vector_store %arg4[%c0_13, %c0_14], %16 {strides = array<i32>} : memref<2x128xf32, #tpu.memory_space<vmem>>, vector<2x128xf32>,
    } else {
    }
    %cst_6 = arith.constant dense<0.000000e+00> : vector<128xf32>
    %7 = vector.multi_reduction <add>, %2, %cst_6 [0] : vector<128x128xf32> to vector<128xf32>
    %8 = vector.shape_cast %7 : vector<128xf32> to vector<1x128xf32>
    %9 = arith.mulf %2, %2 : vector<128x128xf32>
    %cst_7 = arith.constant dense<0.000000e+00> : vector<128xf32>
    %10 = vector.multi_reduction <add>, %9, %cst_7 [0] : vector<128x128xf32> to vector<128xf32>
    %11 = vector.shape_cast %10 : vector<128xf32> to vector<1x128xf32>
    %c0_8 = arith.constant 0 : index
    %c0_9 = arith.constant 0 : index
    %12 = vector.load %arg4[%c0_8, %c0_9] : memref<2x128xf32, #tpu.memory_space<vmem>>, vector<2x128xf32>
    %13 = tpu.concatenate %8, %11 in 0 : vector<1x128xf32>, vector<1x128xf32> -> vector<2x128xf32>
    %14 = arith.addf %12, %13 : vector<2x128xf32>
    %c0_10 = arith.constant 0 : index
    %c0_11 = arith.constant 0 : index
    %15 = vector.load %arg4[%c0_10, %c0_11] : memref<2x128xf32, #tpu.memory_space<vmem>>, vector<2x128xf32>
    tpu.vector_store %arg4[%c0_10, %c0_11], %14 {strides = array<i32>} : memref<2x128xf32, #tpu.memory_space<vmem>>, vector<2x128xf32>,
    return
  }
  func.func @transform_0(%arg0: i32) -> (i32, i32) {
    %c0_i32 = arith.constant 0 : i32
    %c0_i32_0 = arith.constant 0 : i32
    return %arg0, %c0_i32 : i32, i32
  }
  func.func @transform_1(%arg0: i32) -> (i32, i32) {
    %c0_i32 = arith.constant 0 : i32
    %c0_i32_0 = arith.constant 0 : i32
    %c0_i32_1 = arith.constant 0 : i32
    return %c0_i32, %c0_i32_0 : i32, i32
  }
  func.func @transform_2(%arg0: i32) -> (i32, i32) {
    %c0_i32 = arith.constant 0 : i32
    %c0_i32_0 = arith.constant 0 : i32
    return %arg0, %c0_i32 : i32, i32
  }
  func.func @transform_3(%arg0: i32) -> (i32, i32) {
    %c0_i32 = arith.constant 0 : i32
    %c0_i32_0 = arith.constant 0 : i32
    %c0_i32_1 = arith.constant 0 : i32
    return %c0_i32, %c0_i32_0 : i32, i32
  }
}

module attributes {stable_mosaic.version = 11 : i64} {
  func.func @_bn_act_kernel(%arg0: i32, %arg1: memref<128x128xf32, #tpu.memory_space<vmem>>, %arg2: memref<2x128xf32, #tpu.memory_space<vmem>>, %arg3: memref<1x128xf32, #tpu.memory_space<vmem>>, %arg4: memref<1x128xf32, #tpu.memory_space<vmem>>, %arg5: memref<128x128xbf16, #tpu.memory_space<vmem>>) attributes {dimension_semantics = [#tpu.dimension_semantics<parallel>], iteration_bounds = array<i64: 4>, scalar_prefetch = 0 : i64, scratch_operands = 0 : i64, tpu.core_type = #tpu.core_type<tc>, window_params = [{transform_indices = @transform_0, window_bounds = array<i64: 128, 128>}, {pipeline_mode = #tpu.pipeline_mode<synchronous>, transform_indices = @transform_1, window_bounds = array<i64: 2, 128>}, {pipeline_mode = #tpu.pipeline_mode<synchronous>, transform_indices = @transform_2, window_bounds = array<i64: 1, 128>}, {pipeline_mode = #tpu.pipeline_mode<synchronous>, transform_indices = @transform_3, window_bounds = array<i64: 1, 128>}, {transform_indices = @transform_4, window_bounds = array<i64: 128, 128>}]} {
    %c0 = arith.constant 0 : index
    %c0_0 = arith.constant 0 : index
    %0 = vector.load %arg1[%c0, %c0_0] : memref<128x128xf32, #tpu.memory_space<vmem>>, vector<128x128xf32>
    %c0_1 = arith.constant 0 : index
    %c0_2 = arith.constant 0 : index
    %1 = vector.load %arg2[%c0_1, %c0_2] : memref<2x128xf32, #tpu.memory_space<vmem>>, vector<1x128xf32>
    %cst = arith.constant 0.001953125 : f32
    %2 = vector.broadcast %cst : f32 to vector<1x128xf32>
    %3 = arith.mulf %1, %2 : vector<1x128xf32>
    %c1 = arith.constant 1 : index
    %c0_3 = arith.constant 0 : index
    %4 = vector.load %arg2[%c1, %c0_3] : memref<2x128xf32, #tpu.memory_space<vmem>>, vector<1x128xf32>
    %cst_4 = arith.constant 0.001953125 : f32
    %5 = vector.broadcast %cst_4 : f32 to vector<1x128xf32>
    %6 = arith.mulf %4, %5 : vector<1x128xf32>
    %7 = arith.mulf %3, %3 : vector<1x128xf32>
    %8 = arith.subf %6, %7 : vector<1x128xf32>
    %cst_5 = arith.constant 0.000000e+00 : f32
    %9 = vector.broadcast %cst_5 : f32 to vector<1x128xf32>
    %10 = arith.maximumf %8, %9 : vector<1x128xf32>
    %cst_6 = arith.constant 9.99999974E-6 : f32
    %11 = vector.broadcast %cst_6 : f32 to vector<1x128xf32>
    %12 = arith.addf %10, %11 : vector<1x128xf32>
    %13 = math.rsqrt %12 : vector<1x128xf32>
    %c0_7 = arith.constant 0 : index
    %c0_8 = arith.constant 0 : index
    %14 = vector.load %arg3[%c0_7, %c0_8] : memref<1x128xf32, #tpu.memory_space<vmem>>, vector<1x128xf32>
    %15 = arith.mulf %13, %14 : vector<1x128xf32>
    %16 = vector.broadcast %3 : vector<1x128xf32> to vector<128x128xf32>
    %17 = arith.subf %0, %16 : vector<128x128xf32>
    %18 = vector.broadcast %15 : vector<1x128xf32> to vector<128x128xf32>
    %19 = arith.mulf %17, %18 : vector<128x128xf32>
    %c0_9 = arith.constant 0 : index
    %c0_10 = arith.constant 0 : index
    %20 = vector.load %arg4[%c0_9, %c0_10] : memref<1x128xf32, #tpu.memory_space<vmem>>, vector<1x128xf32>
    %21 = vector.broadcast %20 : vector<1x128xf32> to vector<128x128xf32>
    %22 = arith.addf %19, %21 : vector<128x128xf32>
    %cst_11 = arith.constant 0.000000e+00 : f32
    %23 = vector.broadcast %cst_11 : f32 to vector<128x128xf32>
    %24 = arith.cmpf oge, %22, %23 : vector<128x128xf32>
    %cst_12 = arith.constant 2.000000e-01 : f32
    %25 = vector.broadcast %cst_12 : f32 to vector<128x128xf32>
    %26 = arith.mulf %25, %22 : vector<128x128xf32>
    %27 = arith.select %24, %22, %26 : vector<128x128xi1>, vector<128x128xf32>
    %28 = arith.truncf %27 : vector<128x128xf32> to vector<128x128xbf16>
    %c0_13 = arith.constant 0 : index
    %c0_14 = arith.constant 0 : index
    %29 = vector.load %arg5[%c0_13, %c0_14] : memref<128x128xbf16, #tpu.memory_space<vmem>>, vector<128x128xbf16>
    tpu.vector_store %arg5[%c0_13, %c0_14], %28 {strides = array<i32>} : memref<128x128xbf16, #tpu.memory_space<vmem>>, vector<128x128xbf16>,
    return
  }
  func.func @transform_0(%arg0: i32) -> (i32, i32) {
    %c0_i32 = arith.constant 0 : i32
    %c0_i32_0 = arith.constant 0 : i32
    return %arg0, %c0_i32 : i32, i32
  }
  func.func @transform_1(%arg0: i32) -> (i32, i32) {
    %c0_i32 = arith.constant 0 : i32
    %c0_i32_0 = arith.constant 0 : i32
    %c0_i32_1 = arith.constant 0 : i32
    return %c0_i32, %c0_i32_0 : i32, i32
  }
  func.func @transform_2(%arg0: i32) -> (i32, i32) {
    %c0_i32 = arith.constant 0 : i32
    %c0_i32_0 = arith.constant 0 : i32
    %c0_i32_1 = arith.constant 0 : i32
    return %c0_i32, %c0_i32_0 : i32, i32
  }
  func.func @transform_3(%arg0: i32) -> (i32, i32) {
    %c0_i32 = arith.constant 0 : i32
    %c0_i32_0 = arith.constant 0 : i32
    %c0_i32_1 = arith.constant 0 : i32
    return %c0_i32, %c0_i32_0 : i32, i32
  }
  func.func @transform_4(%arg0: i32) -> (i32, i32) {
    %c0_i32 = arith.constant 0 : i32
    %c0_i32_0 = arith.constant 0 : i32
    return %arg0, %c0_i32 : i32, i32
  }
}

module attributes {stable_mosaic.version = 11 : i64} {
  func.func @_matmul_stats_kernel(%arg0: i32, %arg1: memref<128x512xbf16, #tpu.memory_space<vmem>>, %arg2: memref<512x128xbf16, #tpu.memory_space<vmem>>, %arg3: memref<128x128xf32, #tpu.memory_space<vmem>>, %arg4: memref<2x128xf32, #tpu.memory_space<vmem>>) attributes {dimension_semantics = [#tpu.dimension_semantics<arbitrary>], iteration_bounds = array<i64: 1>, scalar_prefetch = 0 : i64, scratch_operands = 0 : i64, tpu.core_type = #tpu.core_type<tc>, window_params = [{transform_indices = @transform_0, window_bounds = array<i64: 128, 512>}, {pipeline_mode = #tpu.pipeline_mode<synchronous>, transform_indices = @transform_1, window_bounds = array<i64: 512, 128>}, {transform_indices = @transform_2, window_bounds = array<i64: 128, 128>}, {pipeline_mode = #tpu.pipeline_mode<synchronous>, transform_indices = @transform_3, window_bounds = array<i64: 2, 128>}]} {
    %c0 = arith.constant 0 : index
    %c0_0 = arith.constant 0 : index
    %0 = vector.load %arg1[%c0, %c0_0] : memref<128x512xbf16, #tpu.memory_space<vmem>>, vector<128x512xbf16>
    %c0_1 = arith.constant 0 : index
    %c0_2 = arith.constant 0 : index
    %1 = vector.load %arg2[%c0_1, %c0_2] : memref<512x128xbf16, #tpu.memory_space<vmem>>, vector<512x128xbf16>
    %cst = arith.constant dense<0.000000e+00> : vector<128x128xf32>
    %2 = tpu.matmul %0, %1, %cst {dimension_numbers = #tpu.dot_dimension_numbers<[1], [0], [0], [1], [0, 0, 1, 1], [], []>} : vector<128x512xbf16>, vector<512x128xbf16>, vector<128x128xf32> -> vector<128x128xf32>
    %c0_3 = arith.constant 0 : index
    %c0_4 = arith.constant 0 : index
    %3 = vector.load %arg3[%c0_3, %c0_4] : memref<128x128xf32, #tpu.memory_space<vmem>>, vector<128x128xf32>
    tpu.vector_store %arg3[%c0_3, %c0_4], %2 {strides = array<i32>} : memref<128x128xf32, #tpu.memory_space<vmem>>, vector<128x128xf32>,
    %c0_i32 = arith.constant 0 : i32
    %4 = arith.cmpi eq, %arg0, %c0_i32 : i32
    %5 = arith.extui %4 : i1 to i32
    %c0_i32_5 = arith.constant 0 : i32
    %6 = arith.cmpi ne, %5, %c0_i32_5 : i32
    scf.if %6 {
      %cst_12 = arith.constant 0.000000e+00 : f32
      %16 = vector.broadcast %cst_12 : f32 to vector<2x128xf32>
      %c0_13 = arith.constant 0 : index
      %c0_14 = arith.constant 0 : index
      %17 = vector.load %arg4[%c0_13, %c0_14] : memref<2x128xf32, #tpu.memory_space<vmem>>, vector<2x128xf32>
      tpu.vector_store %arg4[%c0_13, %c0_14], %16 {strides = array<i32>} : memref<2x128xf32, #tpu.memory_space<vmem>>, vector<2x128xf32>,
    } else {
    }
    %cst_6 = arith.constant dense<0.000000e+00> : vector<128xf32>
    %7 = vector.multi_reduction <add>, %2, %cst_6 [0] : vector<128x128xf32> to vector<128xf32>
    %8 = vector.shape_cast %7 : vector<128xf32> to vector<1x128xf32>
    %9 = arith.mulf %2, %2 : vector<128x128xf32>
    %cst_7 = arith.constant dense<0.000000e+00> : vector<128xf32>
    %10 = vector.multi_reduction <add>, %9, %cst_7 [0] : vector<128x128xf32> to vector<128xf32>
    %11 = vector.shape_cast %10 : vector<128xf32> to vector<1x128xf32>
    %c0_8 = arith.constant 0 : index
    %c0_9 = arith.constant 0 : index
    %12 = vector.load %arg4[%c0_8, %c0_9] : memref<2x128xf32, #tpu.memory_space<vmem>>, vector<2x128xf32>
    %13 = tpu.concatenate %8, %11 in 0 : vector<1x128xf32>, vector<1x128xf32> -> vector<2x128xf32>
    %14 = arith.addf %12, %13 : vector<2x128xf32>
    %c0_10 = arith.constant 0 : index
    %c0_11 = arith.constant 0 : index
    %15 = vector.load %arg4[%c0_10, %c0_11] : memref<2x128xf32, #tpu.memory_space<vmem>>, vector<2x128xf32>
    tpu.vector_store %arg4[%c0_10, %c0_11], %14 {strides = array<i32>} : memref<2x128xf32, #tpu.memory_space<vmem>>, vector<2x128xf32>,
    return
  }
  func.func @transform_0(%arg0: i32) -> (i32, i32) {
    %c0_i32 = arith.constant 0 : i32
    %c0_i32_0 = arith.constant 0 : i32
    return %arg0, %c0_i32 : i32, i32
  }
  func.func @transform_1(%arg0: i32) -> (i32, i32) {
    %c0_i32 = arith.constant 0 : i32
    %c0_i32_0 = arith.constant 0 : i32
    %c0_i32_1 = arith.constant 0 : i32
    return %c0_i32, %c0_i32_0 : i32, i32
  }
  func.func @transform_2(%arg0: i32) -> (i32, i32) {
    %c0_i32 = arith.constant 0 : i32
    %c0_i32_0 = arith.constant 0 : i32
    return %arg0, %c0_i32 : i32, i32
  }
  func.func @transform_3(%arg0: i32) -> (i32, i32) {
    %c0_i32 = arith.constant 0 : i32
    %c0_i32_0 = arith.constant 0 : i32
    %c0_i32_1 = arith.constant 0 : i32
    return %c0_i32, %c0_i32_0 : i32, i32
  }
}

module attributes {stable_mosaic.version = 11 : i64} {
  func.func @_bn_act_kernel(%arg0: i32, %arg1: memref<128x128xf32, #tpu.memory_space<vmem>>, %arg2: memref<2x128xf32, #tpu.memory_space<vmem>>, %arg3: memref<1x128xf32, #tpu.memory_space<vmem>>, %arg4: memref<1x128xf32, #tpu.memory_space<vmem>>, %arg5: memref<128x128xbf16, #tpu.memory_space<vmem>>) attributes {dimension_semantics = [#tpu.dimension_semantics<parallel>], iteration_bounds = array<i64: 1>, scalar_prefetch = 0 : i64, scratch_operands = 0 : i64, tpu.core_type = #tpu.core_type<tc>, window_params = [{transform_indices = @transform_0, window_bounds = array<i64: 128, 128>}, {pipeline_mode = #tpu.pipeline_mode<synchronous>, transform_indices = @transform_1, window_bounds = array<i64: 2, 128>}, {pipeline_mode = #tpu.pipeline_mode<synchronous>, transform_indices = @transform_2, window_bounds = array<i64: 1, 128>}, {pipeline_mode = #tpu.pipeline_mode<synchronous>, transform_indices = @transform_3, window_bounds = array<i64: 1, 128>}, {transform_indices = @transform_4, window_bounds = array<i64: 128, 128>}]} {
    %c0 = arith.constant 0 : index
    %c0_0 = arith.constant 0 : index
    %0 = vector.load %arg1[%c0, %c0_0] : memref<128x128xf32, #tpu.memory_space<vmem>>, vector<128x128xf32>
    %c0_1 = arith.constant 0 : index
    %c0_2 = arith.constant 0 : index
    %1 = vector.load %arg2[%c0_1, %c0_2] : memref<2x128xf32, #tpu.memory_space<vmem>>, vector<1x128xf32>
    %cst = arith.constant 7.812500e-03 : f32
    %2 = vector.broadcast %cst : f32 to vector<1x128xf32>
    %3 = arith.mulf %1, %2 : vector<1x128xf32>
    %c1 = arith.constant 1 : index
    %c0_3 = arith.constant 0 : index
    %4 = vector.load %arg2[%c1, %c0_3] : memref<2x128xf32, #tpu.memory_space<vmem>>, vector<1x128xf32>
    %cst_4 = arith.constant 7.812500e-03 : f32
    %5 = vector.broadcast %cst_4 : f32 to vector<1x128xf32>
    %6 = arith.mulf %4, %5 : vector<1x128xf32>
    %7 = arith.mulf %3, %3 : vector<1x128xf32>
    %8 = arith.subf %6, %7 : vector<1x128xf32>
    %cst_5 = arith.constant 0.000000e+00 : f32
    %9 = vector.broadcast %cst_5 : f32 to vector<1x128xf32>
    %10 = arith.maximumf %8, %9 : vector<1x128xf32>
    %cst_6 = arith.constant 9.99999974E-6 : f32
    %11 = vector.broadcast %cst_6 : f32 to vector<1x128xf32>
    %12 = arith.addf %10, %11 : vector<1x128xf32>
    %13 = math.rsqrt %12 : vector<1x128xf32>
    %c0_7 = arith.constant 0 : index
    %c0_8 = arith.constant 0 : index
    %14 = vector.load %arg3[%c0_7, %c0_8] : memref<1x128xf32, #tpu.memory_space<vmem>>, vector<1x128xf32>
    %15 = arith.mulf %13, %14 : vector<1x128xf32>
    %16 = vector.broadcast %3 : vector<1x128xf32> to vector<128x128xf32>
    %17 = arith.subf %0, %16 : vector<128x128xf32>
    %18 = vector.broadcast %15 : vector<1x128xf32> to vector<128x128xf32>
    %19 = arith.mulf %17, %18 : vector<128x128xf32>
    %c0_9 = arith.constant 0 : index
    %c0_10 = arith.constant 0 : index
    %20 = vector.load %arg4[%c0_9, %c0_10] : memref<1x128xf32, #tpu.memory_space<vmem>>, vector<1x128xf32>
    %21 = vector.broadcast %20 : vector<1x128xf32> to vector<128x128xf32>
    %22 = arith.addf %19, %21 : vector<128x128xf32>
    %cst_11 = arith.constant 0.000000e+00 : f32
    %23 = vector.broadcast %cst_11 : f32 to vector<128x128xf32>
    %24 = arith.cmpf oge, %22, %23 : vector<128x128xf32>
    %cst_12 = arith.constant 2.000000e-01 : f32
    %25 = vector.broadcast %cst_12 : f32 to vector<128x128xf32>
    %26 = arith.mulf %25, %22 : vector<128x128xf32>
    %27 = arith.select %24, %22, %26 : vector<128x128xi1>, vector<128x128xf32>
    %28 = arith.truncf %27 : vector<128x128xf32> to vector<128x128xbf16>
    %c0_13 = arith.constant 0 : index
    %c0_14 = arith.constant 0 : index
    %29 = vector.load %arg5[%c0_13, %c0_14] : memref<128x128xbf16, #tpu.memory_space<vmem>>, vector<128x128xbf16>
    tpu.vector_store %arg5[%c0_13, %c0_14], %28 {strides = array<i32>} : memref<128x128xbf16, #tpu.memory_space<vmem>>, vector<128x128xbf16>,
    return
  }
  func.func @transform_0(%arg0: i32) -> (i32, i32) {
    %c0_i32 = arith.constant 0 : i32
    %c0_i32_0 = arith.constant 0 : i32
    return %arg0, %c0_i32 : i32, i32
  }
  func.func @transform_1(%arg0: i32) -> (i32, i32) {
    %c0_i32 = arith.constant 0 : i32
    %c0_i32_0 = arith.constant 0 : i32
    %c0_i32_1 = arith.constant 0 : i32
    return %c0_i32, %c0_i32_0 : i32, i32
  }
  func.func @transform_2(%arg0: i32) -> (i32, i32) {
    %c0_i32 = arith.constant 0 : i32
    %c0_i32_0 = arith.constant 0 : i32
    %c0_i32_1 = arith.constant 0 : i32
    return %c0_i32, %c0_i32_0 : i32, i32
  }
  func.func @transform_3(%arg0: i32) -> (i32, i32) {
    %c0_i32 = arith.constant 0 : i32
    %c0_i32_0 = arith.constant 0 : i32
    %c0_i32_1 = arith.constant 0 : i32
    return %c0_i32, %c0_i32_0 : i32, i32
  }
  func.func @transform_4(%arg0: i32) -> (i32, i32) {
    %c0_i32 = arith.constant 0 : i32
    %c0_i32_0 = arith.constant 0 : i32
    return %arg0, %c0_i32 : i32, i32
  }
}

module attributes {stable_mosaic.version = 11 : i64} {
  func.func @_matmul_stats_kernel(%arg0: i32, %arg1: memref<104x1024xbf16, #tpu.memory_space<vmem>>, %arg2: memref<1024x128xbf16, #tpu.memory_space<vmem>>, %arg3: memref<104x128xf32, #tpu.memory_space<vmem>>, %arg4: memref<2x128xf32, #tpu.memory_space<vmem>>) attributes {dimension_semantics = [#tpu.dimension_semantics<arbitrary>], iteration_bounds = array<i64: 1>, scalar_prefetch = 0 : i64, scratch_operands = 0 : i64, tpu.core_type = #tpu.core_type<tc>, window_params = [{transform_indices = @transform_0, window_bounds = array<i64: 104, 1024>}, {pipeline_mode = #tpu.pipeline_mode<synchronous>, transform_indices = @transform_1, window_bounds = array<i64: 1024, 128>}, {transform_indices = @transform_2, window_bounds = array<i64: 104, 128>}, {pipeline_mode = #tpu.pipeline_mode<synchronous>, transform_indices = @transform_3, window_bounds = array<i64: 2, 128>}]} {
    %c0 = arith.constant 0 : index
    %c0_0 = arith.constant 0 : index
    %0 = vector.load %arg1[%c0, %c0_0] : memref<104x1024xbf16, #tpu.memory_space<vmem>>, vector<104x1024xbf16>
    %c0_1 = arith.constant 0 : index
    %c0_2 = arith.constant 0 : index
    %1 = vector.load %arg2[%c0_1, %c0_2] : memref<1024x128xbf16, #tpu.memory_space<vmem>>, vector<1024x128xbf16>
    %cst = arith.constant dense<0.000000e+00> : vector<104x128xf32>
    %2 = tpu.matmul %0, %1, %cst {dimension_numbers = #tpu.dot_dimension_numbers<[1], [0], [0], [1], [0, 0, 1, 1], [], []>} : vector<104x1024xbf16>, vector<1024x128xbf16>, vector<104x128xf32> -> vector<104x128xf32>
    %c0_3 = arith.constant 0 : index
    %c0_4 = arith.constant 0 : index
    %3 = vector.load %arg3[%c0_3, %c0_4] : memref<104x128xf32, #tpu.memory_space<vmem>>, vector<104x128xf32>
    tpu.vector_store %arg3[%c0_3, %c0_4], %2 {strides = array<i32>} : memref<104x128xf32, #tpu.memory_space<vmem>>, vector<104x128xf32>,
    %c0_i32 = arith.constant 0 : i32
    %4 = arith.cmpi eq, %arg0, %c0_i32 : i32
    %5 = arith.extui %4 : i1 to i32
    %c0_i32_5 = arith.constant 0 : i32
    %6 = arith.cmpi ne, %5, %c0_i32_5 : i32
    scf.if %6 {
      %cst_12 = arith.constant 0.000000e+00 : f32
      %16 = vector.broadcast %cst_12 : f32 to vector<2x128xf32>
      %c0_13 = arith.constant 0 : index
      %c0_14 = arith.constant 0 : index
      %17 = vector.load %arg4[%c0_13, %c0_14] : memref<2x128xf32, #tpu.memory_space<vmem>>, vector<2x128xf32>
      tpu.vector_store %arg4[%c0_13, %c0_14], %16 {strides = array<i32>} : memref<2x128xf32, #tpu.memory_space<vmem>>, vector<2x128xf32>,
    } else {
    }
    %cst_6 = arith.constant dense<0.000000e+00> : vector<128xf32>
    %7 = vector.multi_reduction <add>, %2, %cst_6 [0] : vector<104x128xf32> to vector<128xf32>
    %8 = vector.shape_cast %7 : vector<128xf32> to vector<1x128xf32>
    %9 = arith.mulf %2, %2 : vector<104x128xf32>
    %cst_7 = arith.constant dense<0.000000e+00> : vector<128xf32>
    %10 = vector.multi_reduction <add>, %9, %cst_7 [0] : vector<104x128xf32> to vector<128xf32>
    %11 = vector.shape_cast %10 : vector<128xf32> to vector<1x128xf32>
    %c0_8 = arith.constant 0 : index
    %c0_9 = arith.constant 0 : index
    %12 = vector.load %arg4[%c0_8, %c0_9] : memref<2x128xf32, #tpu.memory_space<vmem>>, vector<2x128xf32>
    %13 = tpu.concatenate %8, %11 in 0 : vector<1x128xf32>, vector<1x128xf32> -> vector<2x128xf32>
    %14 = arith.addf %12, %13 : vector<2x128xf32>
    %c0_10 = arith.constant 0 : index
    %c0_11 = arith.constant 0 : index
    %15 = vector.load %arg4[%c0_10, %c0_11] : memref<2x128xf32, #tpu.memory_space<vmem>>, vector<2x128xf32>
    tpu.vector_store %arg4[%c0_10, %c0_11], %14 {strides = array<i32>} : memref<2x128xf32, #tpu.memory_space<vmem>>, vector<2x128xf32>,
    return
  }
  func.func @transform_0(%arg0: i32) -> (i32, i32) {
    %c0_i32 = arith.constant 0 : i32
    %c0_i32_0 = arith.constant 0 : i32
    return %arg0, %c0_i32 : i32, i32
  }
  func.func @transform_1(%arg0: i32) -> (i32, i32) {
    %c0_i32 = arith.constant 0 : i32
    %c0_i32_0 = arith.constant 0 : i32
    %c0_i32_1 = arith.constant 0 : i32
    return %c0_i32, %c0_i32_0 : i32, i32
  }
  func.func @transform_2(%arg0: i32) -> (i32, i32) {
    %c0_i32 = arith.constant 0 : i32
    %c0_i32_0 = arith.constant 0 : i32
    return %arg0, %c0_i32 : i32, i32
  }
  func.func @transform_3(%arg0: i32) -> (i32, i32) {
    %c0_i32 = arith.constant 0 : i32
    %c0_i32_0 = arith.constant 0 : i32
    %c0_i32_1 = arith.constant 0 : i32
    return %c0_i32, %c0_i32_0 : i32, i32
  }
}

module attributes {stable_mosaic.version = 11 : i64} {
  func.func @_bn_act_kernel(%arg0: i32, %arg1: memref<104x128xf32, #tpu.memory_space<vmem>>, %arg2: memref<2x128xf32, #tpu.memory_space<vmem>>, %arg3: memref<1x128xf32, #tpu.memory_space<vmem>>, %arg4: memref<1x128xf32, #tpu.memory_space<vmem>>, %arg5: memref<104x128xbf16, #tpu.memory_space<vmem>>) attributes {dimension_semantics = [#tpu.dimension_semantics<parallel>], iteration_bounds = array<i64: 1>, scalar_prefetch = 0 : i64, scratch_operands = 0 : i64, tpu.core_type = #tpu.core_type<tc>, window_params = [{transform_indices = @transform_0, window_bounds = array<i64: 104, 128>}, {pipeline_mode = #tpu.pipeline_mode<synchronous>, transform_indices = @transform_1, window_bounds = array<i64: 2, 128>}, {pipeline_mode = #tpu.pipeline_mode<synchronous>, transform_indices = @transform_2, window_bounds = array<i64: 1, 128>}, {pipeline_mode = #tpu.pipeline_mode<synchronous>, transform_indices = @transform_3, window_bounds = array<i64: 1, 128>}, {transform_indices = @transform_4, window_bounds = array<i64: 104, 128>}]} {
    %c0 = arith.constant 0 : index
    %c0_0 = arith.constant 0 : index
    %0 = vector.load %arg1[%c0, %c0_0] : memref<104x128xf32, #tpu.memory_space<vmem>>, vector<104x128xf32>
    %c0_1 = arith.constant 0 : index
    %c0_2 = arith.constant 0 : index
    %1 = vector.load %arg2[%c0_1, %c0_2] : memref<2x128xf32, #tpu.memory_space<vmem>>, vector<1x128xf32>
    %cst = arith.constant 0.0102040814 : f32
    %2 = vector.broadcast %cst : f32 to vector<1x128xf32>
    %3 = arith.mulf %1, %2 : vector<1x128xf32>
    %c1 = arith.constant 1 : index
    %c0_3 = arith.constant 0 : index
    %4 = vector.load %arg2[%c1, %c0_3] : memref<2x128xf32, #tpu.memory_space<vmem>>, vector<1x128xf32>
    %cst_4 = arith.constant 0.0102040814 : f32
    %5 = vector.broadcast %cst_4 : f32 to vector<1x128xf32>
    %6 = arith.mulf %4, %5 : vector<1x128xf32>
    %7 = arith.mulf %3, %3 : vector<1x128xf32>
    %8 = arith.subf %6, %7 : vector<1x128xf32>
    %cst_5 = arith.constant 0.000000e+00 : f32
    %9 = vector.broadcast %cst_5 : f32 to vector<1x128xf32>
    %10 = arith.maximumf %8, %9 : vector<1x128xf32>
    %cst_6 = arith.constant 9.99999974E-6 : f32
    %11 = vector.broadcast %cst_6 : f32 to vector<1x128xf32>
    %12 = arith.addf %10, %11 : vector<1x128xf32>
    %13 = math.rsqrt %12 : vector<1x128xf32>
    %c0_7 = arith.constant 0 : index
    %c0_8 = arith.constant 0 : index
    %14 = vector.load %arg3[%c0_7, %c0_8] : memref<1x128xf32, #tpu.memory_space<vmem>>, vector<1x128xf32>
    %15 = arith.mulf %13, %14 : vector<1x128xf32>
    %16 = vector.broadcast %3 : vector<1x128xf32> to vector<104x128xf32>
    %17 = arith.subf %0, %16 : vector<104x128xf32>
    %18 = vector.broadcast %15 : vector<1x128xf32> to vector<104x128xf32>
    %19 = arith.mulf %17, %18 : vector<104x128xf32>
    %c0_9 = arith.constant 0 : index
    %c0_10 = arith.constant 0 : index
    %20 = vector.load %arg4[%c0_9, %c0_10] : memref<1x128xf32, #tpu.memory_space<vmem>>, vector<1x128xf32>
    %21 = vector.broadcast %20 : vector<1x128xf32> to vector<104x128xf32>
    %22 = arith.addf %19, %21 : vector<104x128xf32>
    %cst_11 = arith.constant 0.000000e+00 : f32
    %23 = vector.broadcast %cst_11 : f32 to vector<104x128xf32>
    %24 = arith.cmpf oge, %22, %23 : vector<104x128xf32>
    %cst_12 = arith.constant 2.000000e-01 : f32
    %25 = vector.broadcast %cst_12 : f32 to vector<104x128xf32>
    %26 = arith.mulf %25, %22 : vector<104x128xf32>
    %27 = arith.select %24, %22, %26 : vector<104x128xi1>, vector<104x128xf32>
    %28 = arith.truncf %27 : vector<104x128xf32> to vector<104x128xbf16>
    %c0_13 = arith.constant 0 : index
    %c0_14 = arith.constant 0 : index
    %29 = vector.load %arg5[%c0_13, %c0_14] : memref<104x128xbf16, #tpu.memory_space<vmem>>, vector<104x128xbf16>
    tpu.vector_store %arg5[%c0_13, %c0_14], %28 {strides = array<i32>} : memref<104x128xbf16, #tpu.memory_space<vmem>>, vector<104x128xbf16>,
    return
  }
  func.func @transform_0(%arg0: i32) -> (i32, i32) {
    %c0_i32 = arith.constant 0 : i32
    %c0_i32_0 = arith.constant 0 : i32
    return %arg0, %c0_i32 : i32, i32
  }
  func.func @transform_1(%arg0: i32) -> (i32, i32) {
    %c0_i32 = arith.constant 0 : i32
    %c0_i32_0 = arith.constant 0 : i32
    %c0_i32_1 = arith.constant 0 : i32
    return %c0_i32, %c0_i32_0 : i32, i32
  }
  func.func @transform_2(%arg0: i32) -> (i32, i32) {
    %c0_i32 = arith.constant 0 : i32
    %c0_i32_0 = arith.constant 0 : i32
    %c0_i32_1 = arith.constant 0 : i32
    return %c0_i32, %c0_i32_0 : i32, i32
  }
  func.func @transform_3(%arg0: i32) -> (i32, i32) {
    %c0_i32 = arith.constant 0 : i32
    %c0_i32_0 = arith.constant 0 : i32
    %c0_i32_1 = arith.constant 0 : i32
    return %c0_i32, %c0_i32_0 : i32, i32
  }
  func.func @transform_4(%arg0: i32) -> (i32, i32) {
    %c0_i32 = arith.constant 0 : i32
    %c0_i32_0 = arith.constant 0 : i32
    return %arg0, %c0_i32 : i32, i32
  }
}

module attributes {stable_mosaic.version = 11 : i64} {
  func.func @_matmul_bias_act_kernel(%arg0: i32, %arg1: memref<72x2048xbf16, #tpu.memory_space<vmem>>, %arg2: memref<2048x128xbf16, #tpu.memory_space<vmem>>, %arg3: memref<1x128xf32, #tpu.memory_space<vmem>>, %arg4: memref<72x128xf32, #tpu.memory_space<vmem>>) attributes {dimension_semantics = [#tpu.dimension_semantics<parallel>], iteration_bounds = array<i64: 1>, scalar_prefetch = 0 : i64, scratch_operands = 0 : i64, tpu.core_type = #tpu.core_type<tc>, window_params = [{transform_indices = @transform_0, window_bounds = array<i64: 72, 2048>}, {pipeline_mode = #tpu.pipeline_mode<synchronous>, transform_indices = @transform_1, window_bounds = array<i64: 2048, 128>}, {pipeline_mode = #tpu.pipeline_mode<synchronous>, transform_indices = @transform_2, window_bounds = array<i64: 1, 128>}, {transform_indices = @transform_3, window_bounds = array<i64: 72, 128>}]} {
    %c0 = arith.constant 0 : index
    %c0_0 = arith.constant 0 : index
    %0 = vector.load %arg1[%c0, %c0_0] : memref<72x2048xbf16, #tpu.memory_space<vmem>>, vector<72x2048xbf16>
    %c0_1 = arith.constant 0 : index
    %c0_2 = arith.constant 0 : index
    %1 = vector.load %arg2[%c0_1, %c0_2] : memref<2048x128xbf16, #tpu.memory_space<vmem>>, vector<2048x128xbf16>
    %cst = arith.constant dense<0.000000e+00> : vector<72x128xf32>
    %2 = tpu.matmul %0, %1, %cst {dimension_numbers = #tpu.dot_dimension_numbers<[1], [0], [0], [1], [0, 0, 1, 1], [], []>} : vector<72x2048xbf16>, vector<2048x128xbf16>, vector<72x128xf32> -> vector<72x128xf32>
    %c0_3 = arith.constant 0 : index
    %c0_4 = arith.constant 0 : index
    %3 = vector.load %arg3[%c0_3, %c0_4] : memref<1x128xf32, #tpu.memory_space<vmem>>, vector<1x128xf32>
    %4 = vector.broadcast %3 : vector<1x128xf32> to vector<72x128xf32>
    %5 = arith.addf %2, %4 : vector<72x128xf32>
    %c0_5 = arith.constant 0 : index
    %c0_6 = arith.constant 0 : index
    %6 = vector.load %arg4[%c0_5, %c0_6] : memref<72x128xf32, #tpu.memory_space<vmem>>, vector<72x128xf32>
    tpu.vector_store %arg4[%c0_5, %c0_6], %5 {strides = array<i32>} : memref<72x128xf32, #tpu.memory_space<vmem>>, vector<72x128xf32>,
    return
  }
  func.func @transform_0(%arg0: i32) -> (i32, i32) {
    %c0_i32 = arith.constant 0 : i32
    %c0_i32_0 = arith.constant 0 : i32
    return %arg0, %c0_i32 : i32, i32
  }
  func.func @transform_1(%arg0: i32) -> (i32, i32) {
    %c0_i32 = arith.constant 0 : i32
    %c0_i32_0 = arith.constant 0 : i32
    %c0_i32_1 = arith.constant 0 : i32
    return %c0_i32, %c0_i32_0 : i32, i32
  }
  func.func @transform_2(%arg0: i32) -> (i32, i32) {
    %c0_i32 = arith.constant 0 : i32
    %c0_i32_0 = arith.constant 0 : i32
    %c0_i32_1 = arith.constant 0 : i32
    return %c0_i32, %c0_i32_0 : i32, i32
  }
  func.func @transform_3(%arg0: i32) -> (i32, i32) {
    %c0_i32 = arith.constant 0 : i32
    %c0_i32_0 = arith.constant 0 : i32
    return %arg0, %c0_i32 : i32, i32
  }
}

</mosaic_0001>

<bundles_post_ra>
// kernel: _lambda_.8
= control target key start
LH: loop header
LB: loop body
LE: loop exit
PB: predicated region body
PF: predicated region fallthrough
CT: control target
= control target key end

     0   :  { %s690_s12 = smov 0   ;;  %s769_s0 = inlined_call_operand.vmem [shape: bf16[2048,128], index: 0, kind: input, shape index: {}]   ;;  %s770_s1 = inlined_call_operand.vmem [shape: bf16[128,128], index: 1, kind: input, shape index: {}]   ;;  %s771_s2 = inlined_call_operand.vmem [shape: f32[1,128], index: 2, kind: input, shape index: {}]   ;;  %s772_s3 = inlined_call_operand.vmem [shape: bf16[2048,128], index: 3, kind: output, shape index: {}]  }
   0x1 LB: > { %s491_s13 = sadd.s32 4294967295, %s668_s12   ;;  %p495_p0 = scmp.ge.s32.totalorder %s668_s12, 1  ;;  %s668_s12 = sphi %s690_s12, %s13_s12  }
   0x2   : > { %p138_p1 = scmp.lt.s32.totalorder %s668_s12, 17 }
   0x4   : > { %p139_p2 = pnand %p495_p0, %p138_p1 }
   0x5   : > { %s496_s22 = sshll.u32 (!%p139_p2), %s491_s13, 4 }
   0x6   : > { %142 = sbr.rel (%p139_p2) target bundleno = 209 (0xd1), region = 32  ;;  %p163_p3 = scmp.lt.s32.totalorder (!%p139_p2), %s496_s22, 255 }
   0xb   : > { %v581_v0 = vld [vmem:[%s770_s1 + $0x38] sm:$0xff]  ;;  %v580_v1 = vld [vmem:[%s770_s1 + $0x30] sm:$0xff]  ;;  %v579_v2 = vld [vmem:[%s770_s1 + $0x28] sm:$0xff]  ;;  %s774_s22 = smov (!%p163_p3, %s496_s22), 255 }
   0xc   : > { %306 = vmatpush.bf16.msra.mxu0 %v581_v0  ;;  %629 = vmatpush.bf16.msra.mxu1 %v581_v0  ;;  %v578_v3 = vld [vmem:[%s770_s1 + $0x20] sm:$0xff]  ;;  %v577_v4 = vld [vmem:[%s770_s1 + $0x18] sm:$0xff]  ;;  %v576_v5 = vld [vmem:[%s770_s1 + $0x10] sm:$0xff]  ;;  %s497_s29 = sshll.u32 %s774_s22, 2 }
   0xd   : > { %630 = vmatpush.bf16.msra.mxu2 %v581_v0  ;;  %631 = vmatpush.bf16.msra.mxu3 %v581_v0  ;;  %v575_v6 = vld [vmem:[%s770_s1 + $0x8] sm:$0xff]  ;;  %v574_v7 = vld [vmem:[%s770_s1] sm:$0xff]  ;;  %s166_s7 = scalar_lea.vmem %s769_s0, %s497_s29  ;;  %s746_s13 = scalar_lea.vmem %s772_s3, %s497_s29 }
   0xe   : > { %v566_v8 = vld [vmem:[%s166_s7] sm:$0xff]  ;;  %v568_v9 = vld [vmem:[%s166_s7 + $0x10] sm:$0xff]  ;;  %v567_v12 = vld [vmem:[%s166_s7 + $0x8] sm:$0xff] }
   0xf   : > { %v570_v10 = vld [vmem:[%s166_s7 + $0x20] sm:$0xff]  ;;  %v572_v11 = vld [vmem:[%s166_s7 + $0x30] sm:$0xff]  ;;  %v569_v13 = vld [vmem:[%s166_s7 + $0x18] sm:$0xff] }
  0x10   : > { %307 = vmatpush.bf16.msra.mxu0 %v580_v1  ;;  %632 = vmatpush.bf16.msra.mxu1 %v580_v1  ;;  %v571_v14 = vld [vmem:[%s166_s7 + $0x28] sm:$0xff]  ;;  %v573_v15 = vld [vmem:[%s166_s7 + $0x38] sm:$0xff]  ;;  %v733_v18 = vld [vmem:[%s771_s2] ss:$0 sm:$0xff] }
  0x11   : > { %633 = vmatpush.bf16.msra.mxu2 %v580_v1  ;;  %634 = vmatpush.bf16.msra.mxu3 %v580_v1 }
  0x14   : > { %308 = vmatpush.bf16.msra.mxu0 %v579_v2  ;;  %635 = vmatpush.bf16.msra.mxu1 %v579_v2 }
  0x15   : > { %636 = vmatpush.bf16.msra.mxu2 %v579_v2  ;;  %637 = vmatpush.bf16.msra.mxu3 %v579_v2 }
  0x18   : > { %309 = vmatpush.bf16.msra.mxu0 %v578_v3  ;;  %638 = vmatpush.bf16.msra.mxu1 %v578_v3 }
  0x19   : > { %639 = vmatpush.bf16.msra.mxu2 %v578_v3  ;;  %640 = vmatpush.bf16.msra.mxu3 %v578_v3 }
  0x1c   : > { %310 = vmatpush.bf16.msra.mxu0 %v577_v4  ;;  %641 = vmatpush.bf16.msra.mxu1 %v577_v4 }
  0x1d   : > { %642 = vmatpush.bf16.msra.mxu2 %v577_v4  ;;  %643 = vmatpush.bf16.msra.mxu3 %v577_v4 }
  0x20   : > { %311 = vmatpush.bf16.msra.mxu0 %v576_v5  ;;  %644 = vmatpush.bf16.msra.mxu1 %v576_v5 }
  0x21   : > { %645 = vmatpush.bf16.msra.mxu2 %v576_v5  ;;  %646 = vmatpush.bf16.msra.mxu3 %v576_v5 }
  0x24   : > { %312 = vmatpush.bf16.msra.mxu0 %v575_v6  ;;  %647 = vmatpush.bf16.msra.mxu1 %v575_v6 }
  0x25   : > { %648 = vmatpush.bf16.msra.mxu2 %v575_v6  ;;  %649 = vmatpush.bf16.msra.mxu3 %v575_v6 }
  0x28   : > { %313 = vmatpush.bf16.msra.mxu0 %v574_v7  ;;  %650 = vmatpush.bf16.msra.mxu1 %v574_v7 }
  0x29   : > { %651 = vmatpush.bf16.msra.mxu2 %v574_v7  ;;  %652 = vmatpush.bf16.msra.mxu3 %v574_v7 }
  0x2b   : > { %314 = vmatmul.bf16.vlgmr.msra.gmra.mxu0 %v566_v8  ;;  %324 = vmatmul.bf16.vlgmr.msra.gmra.mxu1 %v568_v9 }
  0x2c   : > { %334 = vmatmul.bf16.vlgmr.msra.gmra.mxu2 %v570_v10  ;;  %344 = vmatmul.bf16.vlgmr.msra.gmra.mxu3 %v572_v11 }
  0x3b   : > { %319 = vmatmul.bf16.gmra.mxu0 %v567_v12  ;;  %329 = vmatmul.bf16.gmra.mxu1 %v569_v13 }
  0x3c   : > { %339 = vmatmul.bf16.gmra.mxu2 %v571_v14  ;;  %349 = vmatmul.bf16.gmra.mxu3 %v573_v15 }
  0xa8   : > { %v315_v16 = vpop.f32.mrf.mxu0  ;;  %v325_v17 = vpop.f32.mrf.mxu1 }
  0xa9   : > { %v316_v19 = vadd.f32 %v733_v18, %v315_v16  ;;  %v326_v20 = vadd.f32 %v733_v18, %v325_v17 }
  0xab   : > { %v371_v25 = vmul.f32 0.2, %v316_v19  ;;  %v375_v26 = vmul.f32 0.2, %v326_v20  ;;  %vm355_vm0 = vcmp.ge.f32.partialorder %v316_v19, 0.0  ;;  %vm359_vm1 = vcmp.ge.f32.partialorder %v326_v20, 0.0 }
  0xad   : > { %v387_v33 = vsel %vm355_vm0, %v316_v19, %v371_v25  ;;  %v391_v34 = vsel %vm359_vm1, %v326_v20, %v375_v26 }
  0xaf   : > { %v335_v21 = vpop.f32.mrf.mxu2  ;;  %v345_v22 = vpop.f32.mrf.mxu3 }
  0xb0   : > { %v317_v23 = vpop.f32.mrf.mxu0  ;;  %v327_v24 = vpop.f32.mrf.mxu1  ;;  %v336_v31 = vadd.f32 %v733_v18, %v335_v21  ;;  %v346_v32 = vadd.f32 %v733_v18, %v345_v22 }
  0xb1   : > { %v318_v27 = vadd.f32 %v733_v18, %v317_v23  ;;  %v328_v28 = vadd.f32 %v733_v18, %v327_v24 }
  0xb2   : > { %v379_v41 = vmul.f32 0.2, %v336_v31  ;;  %v383_v42 = vmul.f32 0.2, %v346_v32  ;;  %vm363_vm4 = vcmp.ge.f32.partialorder %v336_v31, 0.0  ;;  %vm367_vm5 = vcmp.ge.f32.partialorder %v346_v32, 0.0 }
  0xb3   : > { %vm356_vm2 = vcmp.ge.f32.partialorder %v318_v27, 0.0  ;;  %v372_v29 = vmul.f32 0.2, %v318_v27  ;;  %vm360_vm3 = vcmp.ge.f32.partialorder %v328_v28, 0.0  ;;  %v376_v30 = vmul.f32 0.2, %v328_v28 }
  0xb4   : > { %v395_v49 = vsel %vm363_vm4, %v336_v31, %v379_v41  ;;  %v399_v50 = vsel %vm367_vm5, %v346_v32, %v383_v42 }
  0xb5   : > { %v388_v35 = vsel %vm356_vm2, %v318_v27, %v372_v29  ;;  %v392_v36 = vsel %vm360_vm3, %v328_v28, %v376_v30 }
  0xb6   : > { %v585_v37 = vpack.c.bf16 %v388_v35, %v387_v33  ;;  %v595_v38 = vpack.c.bf16 %v392_v36, %v391_v34 }
  0xb7   : > { %v337_v39 = vpop.f32.mrf.mxu2  ;;  %v347_v40 = vpop.f32.mrf.mxu3 }
  0xb8   : > { %586 = vst [vmem:[%s746_s13] sm:$0xff] %v585_v37   ;;  %v338_v43 = vadd.f32 %v733_v18, %v337_v39  ;;  %v348_v44 = vadd.f32 %v733_v18, %v347_v40  ;;  %v320_v45 = vpop.f32.mrf.mxu0  ;;  %v330_v46 = vpop.f32.mrf.mxu1 }
  0xb9   : > { %623 = vst [vmem:[%s746_s13 + $0x10] sm:$0xff] %v595_v38   ;;  %v321_v55 = vadd.f32 %v733_v18, %v320_v45  ;;  %v331_v56 = vadd.f32 %v733_v18, %v330_v46 }
  0xba   : > { %vm364_vm6 = vcmp.ge.f32.partialorder %v338_v43, 0.0  ;;  %v380_v47 = vmul.f32 0.2, %v338_v43  ;;  %vm368_vm7 = vcmp.ge.f32.partialorder %v348_v44, 0.0  ;;  %v384_v48 = vmul.f32 0.2, %v348_v44 }
  0xbb   : > { %v373_v61 = vmul.f32 0.2, %v321_v55  ;;  %v377_v62 = vmul.f32 0.2, %v331_v56  ;;  %vm357_vm8 = vcmp.ge.f32.partialorder %v321_v55, 0.0  ;;  %vm361_vm9 = vcmp.ge.f32.partialorder %v331_v56, 0.0 }
  0xbc   : > { %v396_v51 = vsel %vm364_vm6, %v338_v43, %v380_v47  ;;  %v400_v52 = vsel %vm368_vm7, %v348_v44, %v384_v48 }
  0xbd   : > { %v605_v53 = vpack.c.bf16 %v396_v51, %v395_v49  ;;  %v615_v54 = vpack.c.bf16 %v400_v52, %v399_v50  ;;  %v389_v5 = vsel %vm357_vm8, %v321_v55, %v373_v61  ;;  %v393_v6 = vsel %vm361_vm9, %v331_v56, %v377_v62 }
  0xbf   : > { %625 = vst [vmem:[%s746_s13 + $0x20] sm:$0xff] %v605_v53   ;;  %v340_v57 = vpop.f32.mrf.mxu2  ;;  %v350_v58 = vpop.f32.mrf.mxu3 }
  0xc0   : > { %627 = vst [vmem:[%s746_s13 + $0x30] sm:$0xff] %v615_v54   ;;  %v322_v59 = vpop.f32.mrf.mxu0  ;;  %v332_v60 = vpop.f32.mrf.mxu1  ;;  %v341_v3 = vadd.f32 %v733_v18, %v340_v57  ;;  %v351_v4 = vadd.f32 %v733_v18, %v350_v58 }
  0xc1   : > { %v323_v63 = vadd.f32 %v733_v18, %v322_v59  ;;  %v333_v0 = vadd.f32 %v733_v18, %v332_v60 }
  0xc2   : > { %v381_v13 = vmul.f32 0.2, %v341_v3  ;;  %v385_v14 = vmul.f32 0.2, %v351_v4  ;;  %vm365_vm12 = vcmp.ge.f32.partialorder %v341_v3, 0.0  ;;  %vm369_vm13 = vcmp.ge.f32.partialorder %v351_v4, 0.0 }
  0xc3   : > { %vm358_vm10 = vcmp.ge.f32.partialorder %v323_v63, 0.0  ;;  %v374_v1 = vmul.f32 0.2, %v323_v63  ;;  %vm362_vm11 = vcmp.ge.f32.partialorder %v333_v0, 0.0  ;;  %v378_v2 = vmul.f32 0.2, %v333_v0 }
  0xc4   : > { %v397_v20 = vsel %vm365_vm12, %v341_v3, %v381_v13  ;;  %v401_v21 = vsel %vm369_vm13, %v351_v4, %v385_v14 }
  0xc5   : > { %v390_v7 = vsel %vm358_vm10, %v323_v63, %v374_v1  ;;  %v394_v8 = vsel %vm362_vm11, %v333_v0, %v378_v2 }
  0xc6   : > { %v590_v9 = vpack.c.bf16 %v390_v7, %v389_v5  ;;  %v600_v10 = vpack.c.bf16 %v394_v8, %v393_v6 }
  0xc7   : > { %v342_v11 = vpop.f32.mrf.mxu2  ;;  %v352_v12 = vpop.f32.mrf.mxu3 }
  0xc8   : > { %622 = vst [vmem:[%s746_s13 + $0x8] sm:$0xff] %v590_v9   ;;  %v343_v15 = vadd.f32 %v733_v18, %v342_v11  ;;  %v353_v16 = vadd.f32 %v733_v18, %v352_v12 }
  0xc9   : > { %624 = vst [vmem:[%s746_s13 + $0x18] sm:$0xff] %v600_v10  }
  0xca   : > { %vm366_vm14 = vcmp.ge.f32.partialorder %v343_v15, 0.0  ;;  %v382_v17 = vmul.f32 0.2, %v343_v15  ;;  %vm370_vm15 = vcmp.ge.f32.partialorder %v353_v16, 0.0  ;;  %v386_v19 = vmul.f32 0.2, %v353_v16 }
  0xcc   : > { %v398_v22 = vsel %vm366_vm14, %v343_v15, %v382_v17  ;;  %v402_v23 = vsel %vm370_vm15, %v353_v16, %v386_v19 }
  0xcd   : > { %v610_v24 = vpack.c.bf16 %v398_v22, %v397_v20  ;;  %v620_v25 = vpack.c.bf16 %v402_v23, %v401_v21 }
  0xcf   : > { %626 = vst [vmem:[%s746_s13 + $0x28] sm:$0xff] %v610_v24  }
  0xd0   : > { %628 = vst [vmem:[%s746_s13 + $0x38] sm:$0xff] %v620_v25  }
  0xd1 PF: > { %s13_s12 = sadd.s32 1, %s668_s12  }
  0xd2   : > { %p10_p4 = scmp.ge.s32.totalorder %s13_s12, 18  }
  0xd4   :  { %12 = sbr.rel (!%p10_p4) target bundleno = 1 (0x1), region = 62 }

// kernel: _lambda_.9
= control target key start
LH: loop header
LB: loop body
LE: loop exit
PB: predicated region body
PF: predicated region fallthrough
CT: control target
= control target key end

     0   :  { %s871_s12 = smov 0   ;;  %s1044_s0 = inlined_call_operand.vmem [shape: bf16[512,256], index: 0, kind: input, shape index: {}]   ;;  %s1045_s1 = inlined_call_operand.vmem [shape: bf16[256,128], index: 1, kind: input, shape index: {}]   ;;  %s1046_s2 = inlined_call_operand.vmem [shape: f32[512,128], index: 2, kind: output, shape index: {0}]   ;;  %s1047_s3 = inlined_call_operand.vmem [shape: f32[2,128], index: 3, kind: output, shape index: {1}]  }
   0x1 LB: > { %s643_s13 = sadd.s32 4294967295, %s848_s12   ;;  %p647_p0 = scmp.ge.s32.totalorder %s848_s12, 1  ;;  %s848_s12 = sphi %s871_s12, %s14_s12  }
   0x2   : > { %p137_p1 = scmp.lt.s32.totalorder %s848_s12, 5 }
   0x4   : > { %p138_p2 = pnand %p647_p0, %p137_p1 }
   0x5   : > { %s648_s26 = sshll.u32 (!%p138_p2), %s643_s13, 4  ;;  %p781_p4 = scmp.ne.s32.totalorder (!%p138_p2), %s643_s13, 0 }
   0x6   : > { %141 = sbr.rel (%p138_p2) target bundleno = 285 (0x11d), region = 28  ;;  %p163_p3 = scmp.lt.s32.totalorder (!%p138_p2), %s648_s26, 63 }
   0xb   : > { %v808_v0 = vld [vmem:[%s1045_s1 + $0x38] sm:$0xff]  ;;  %v807_v2 = vld [vmem:[%s1045_s1 + $0x30] sm:$0xff]  ;;  %v806_v4 = vld [vmem:[%s1045_s1 + $0x28] sm:$0xff]  ;;  %s1049_s26 = smov (!%p163_p3, %s648_s26), 63 }
   0xc   : > { %v816_v1 = vld [vmem:[%s1045_s1 + $0x78] sm:$0xff]  ;;  %399 = vmatpush.bf16.msra.mxu0 %v808_v0  ;;  %817 = vmatpush.bf16.msra.mxu2 %v808_v0  ;;  %v815_v3 = vld [vmem:[%s1045_s1 + $0x70] sm:$0xff]  ;;  %v814_v5 = vld [vmem:[%s1045_s1 + $0x68] sm:$0xff]  ;;  %s784_s14 = sshll.u32 %s1049_s26, 3 }
   0xd   : > { %448 = vmatpush.bf16.msra.mxu1 %v816_v1  ;;  %825 = vmatpush.bf16.msra.mxu3 %v816_v1  ;;  %v805_v6 = vld [vmem:[%s1045_s1 + $0x20] sm:$0xff]  ;;  %v804_v8 = vld [vmem:[%s1045_s1 + $0x18] sm:$0xff]  ;;  %v803_v10 = vld [vmem:[%s1045_s1 + $0x10] sm:$0xff]  ;;  %s928_s19 = scalar_lea.vmem %s1044_s0, %s784_s14  ;;  %s976_s29 = scalar_lea.vmem %s1046_s2, %s784_s14 }
   0xe   : > { %v813_v7 = vld [vmem:[%s1045_s1 + $0x60] sm:$0xff]  ;;  %v812_v9 = vld [vmem:[%s1045_s1 + $0x58] sm:$0xff]  ;;  %v811_v11 = vld [vmem:[%s1045_s1 + $0x50] sm:$0xff] }
   0xf   : > { %v802_v12 = vld [vmem:[%s1045_s1 + $0x8] sm:$0xff]  ;;  %v801_v14 = vld [vmem:[%s1045_s1] sm:$0xff]  ;;  %v663_v28 = vld [vmem:[%s928_s19 + $0x10] sm:$0xf] }
  0x10   : > { %400 = vmatpush.bf16.msra.mxu0 %v807_v2  ;;  %818 = vmatpush.bf16.msra.mxu2 %v807_v2  ;;  %v810_v13 = vld [vmem:[%s1045_s1 + $0x48] sm:$0xff]  ;;  %v809_v15 = vld [vmem:[%s1045_s1 + $0x40] sm:$0xff]  ;;  %v788_v29 = vld [vmem:[%s928_s19 + $0x14] sm:$0xf0] }
  0x11   : > { %449 = vmatpush.bf16.msra.mxu1 %v815_v3  ;;  %826 = vmatpush.bf16.msra.mxu3 %v815_v3  ;;  %v655_v16 = vld [vmem:[%s928_s19] sm:$0xf]  ;;  %v786_v17 = vld [vmem:[%s928_s19 + $0x4] sm:$0xf0]  ;;  %v785_v20 = vld [vmem:[%s928_s19 + $0x4] sm:$0xf]  ;;  %v664_v36 = vor.u32 %v788_v29, %v663_v28 }
  0x12   : > { %v687_v18 = vld [vmem:[%s928_s19 + $0x40] sm:$0xf]  ;;  %v794_v19 = vld [vmem:[%s928_s19 + $0x44] sm:$0xf0]  ;;  %v657_v21 = vld [vmem:[%s928_s19 + $0x8] sm:$0xf0]  ;;  %v656_v24 = vor.u32 %v786_v17, %v655_v16 }
  0x13   : > { %v793_v22 = vld [vmem:[%s928_s19 + $0x44] sm:$0xf]  ;;  %v689_v23 = vld [vmem:[%s928_s19 + $0x48] sm:$0xf0]  ;;  %v688_v25 = vor.u32 %v794_v19, %v687_v18  ;;  %v660_v26 = vor.u32 %v785_v20, %v657_v21  ;;  %v695_v30 = vld [vmem:[%s928_s19 + $0x50] sm:$0xf] }
  0x14   : > { %401 = vmatpush.bf16.msra.mxu0 %v806_v4  ;;  %819 = vmatpush.bf16.msra.mxu2 %v806_v4  ;;  %v692_v27 = vor.u32 %v793_v22, %v689_v23  ;;  %v796_v31 = vld [vmem:[%s928_s19 + $0x54] sm:$0xf0]  ;;  %v787_v32 = vld [vmem:[%s928_s19 + $0x14] sm:$0xf]  ;;  %v665_v33 = vld [vmem:[%s928_s19 + $0x18] sm:$0xf0] }
  0x15   : > { %450 = vmatpush.bf16.msra.mxu1 %v814_v5  ;;  %827 = vmatpush.bf16.msra.mxu3 %v814_v5  ;;  %v795_v34 = vld [vmem:[%s928_s19 + $0x54] sm:$0xf]  ;;  %v697_v35 = vld [vmem:[%s928_s19 + $0x58] sm:$0xf0]  ;;  %v696_v37 = vor.u32 %v796_v31, %v695_v30  ;;  %v668_v38 = vor.u32 %v787_v32, %v665_v33  ;;  %v671_v40 = vld [vmem:[%s928_s19 + $0x20] sm:$0xf] }
  0x16   : > { %v700_v39 = vor.u32 %v795_v34, %v697_v35  ;;  %v790_v41 = vld [vmem:[%s928_s19 + $0x24] sm:$0xf0]  ;;  %v703_v42 = vld [vmem:[%s928_s19 + $0x60] sm:$0xf]  ;;  %v789_v44 = vld [vmem:[%s928_s19 + $0x24] sm:$0xf] }
  0x17   : > { %v798_v43 = vld [vmem:[%s928_s19 + $0x64] sm:$0xf0]  ;;  %v673_v45 = vld [vmem:[%s928_s19 + $0x28] sm:$0xf0]  ;;  %v797_v46 = vld [vmem:[%s928_s19 + $0x64] sm:$0xf]  ;;  %v672_v48 = vor.u32 %v790_v41, %v671_v40 }
  0x18   : > { %402 = vmatpush.bf16.msra.mxu0 %v805_v6  ;;  %820 = vmatpush.bf16.msra.mxu2 %v805_v6  ;;  %v705_v47 = vld [vmem:[%s928_s19 + $0x68] sm:$0xf0]  ;;  %v704_v49 = vor.u32 %v798_v43, %v703_v42  ;;  %v676_v50 = vor.u32 %v789_v44, %v673_v45  ;;  %v679_v52 = vld [vmem:[%s928_s19 + $0x30] sm:$0xf]  ;;  %v792_v53 = vld [vmem:[%s928_s19 + $0x34] sm:$0xf0] }
  0x19   : > { %451 = vmatpush.bf16.msra.mxu1 %v813_v7  ;;  %828 = vmatpush.bf16.msra.mxu3 %v813_v7  ;;  %v708_v51 = vor.u32 %v797_v46, %v705_v47  ;;  %v711_v54 = vld [vmem:[%s928_s19 + $0x70] sm:$0xf]  ;;  %v800_v55 = vld [vmem:[%s928_s19 + $0x74] sm:$0xf0]  ;;  %v791_v56 = vld [vmem:[%s928_s19 + $0x34] sm:$0xf]  ;;  %v680_v60 = vor.u32 %v792_v53, %v679_v52 }
  0x1a   : > { %v681_v57 = vld [vmem:[%s928_s19 + $0x38] sm:$0xf0]  ;;  %v799_v58 = vld [vmem:[%s928_s19 + $0x74] sm:$0xf]  ;;  %v712_v61 = vor.u32 %v800_v55, %v711_v54 }
  0x1b   : > { %v713_v59 = vld [vmem:[%s928_s19 + $0x78] sm:$0xf0]  ;;  %v684_v62 = vor.u32 %v791_v56, %v681_v57 }
  0x1c   : > { %403 = vmatpush.bf16.msra.mxu0 %v804_v8  ;;  %821 = vmatpush.bf16.msra.mxu2 %v804_v8  ;;  %v716_v63 = vor.u32 %v799_v58, %v713_v59 }
  0x1d   : > { %452 = vmatpush.bf16.msra.mxu1 %v812_v9  ;;  %829 = vmatpush.bf16.msra.mxu3 %v812_v9 }
  0x20   : > { %404 = vmatpush.bf16.msra.mxu0 %v803_v10  ;;  %822 = vmatpush.bf16.msra.mxu2 %v803_v10 }
  0x21   : > { %453 = vmatpush.bf16.msra.mxu1 %v811_v11  ;;  %830 = vmatpush.bf16.msra.mxu3 %v811_v11 }
  0x24   : > { %405 = vmatpush.bf16.msra.mxu0 %v802_v12  ;;  %823 = vmatpush.bf16.msra.mxu2 %v802_v12 }
  0x25   : > { %454 = vmatpush.bf16.msra.mxu1 %v810_v13  ;;  %831 = vmatpush.bf16.msra.mxu3 %v810_v13 }
  0x28   : > { %406 = vmatpush.bf16.msra.mxu0 %v801_v14  ;;  %824 = vmatpush.bf16.msra.mxu2 %v801_v14 }
  0x29   : > { %455 = vmatpush.bf16.msra.mxu1 %v809_v15  ;;  %832 = vmatpush.bf16.msra.mxu3 %v809_v15 }
  0x2b   : > { %407 = vmatmul.bf16.vlgmr.msra.gmra.mxu0 %v656_v24  ;;  %427 = vmatmul.bf16.vlgmr.msra.gmra.mxu2 %v688_v25 }
  0x2c   : > { %456 = vmatmul.bf16.vlgmr.msra.gmra.mxu1 %v660_v26  ;;  %476 = vmatmul.bf16.vlgmr.msra.gmra.mxu3 %v692_v27 }
  0x3b   : > { %412 = vmatmul.bf16.gmra.mxu0 %v664_v36  ;;  %432 = vmatmul.bf16.gmra.mxu2 %v696_v37 }
  0x3c   : > { %461 = vmatmul.bf16.gmra.mxu1 %v668_v38  ;;  %481 = vmatmul.bf16.gmra.mxu3 %v700_v39 }
  0x4b   : > { %417 = vmatmul.bf16.gmra.mxu0 %v672_v48  ;;  %437 = vmatmul.bf16.gmra.mxu2 %v704_v49 }
  0x4c   : > { %466 = vmatmul.bf16.gmra.mxu1 %v676_v50  ;;  %486 = vmatmul.bf16.gmra.mxu3 %v708_v51 }
  0x5b   : > { %422 = vmatmul.bf16.gmra.mxu0 %v680_v60  ;;  %442 = vmatmul.bf16.gmra.mxu2 %v712_v61 }
  0x5c   : > { %471 = vmatmul.bf16.gmra.mxu1 %v684_v62  ;;  %491 = vmatmul.bf16.gmra.mxu3 %v716_v63 }
  0xa8   : > { %v408_v0 = vpop.f32.mrf.mxu0 }
  0xa9   : > { %v457_v1 = vpop.f32.mrf.mxu1 }
  0xaa   : > { %v978_v2 = vadd.f32 %v457_v1, %v408_v0 }
  0xac   : > { %497 = vst [vmem:[%s976_s29] sm:$0xff] %v978_v2 }
  0xae   : > { %v428_v3 = vpop.f32.mrf.mxu2 }
  0xaf   : > { %v477_v4 = vpop.f32.mrf.mxu3 }
  0xb0   : > { %v982_v5 = vadd.f32 %v477_v4, %v428_v3  ;;  %v410_v6 = vpop.f32.mrf.mxu0 }
  0xb1   : > { %v459_v7 = vpop.f32.mrf.mxu1 }
  0xb2   : > { %505 = vst [vmem:[%s976_s29 + $0x40] sm:$0xff] %v982_v5  ;;  %v460_v8 = vadd.f32 %v459_v7, %v410_v6 }
  0xb4   : > { %498 = vst [vmem:[%s976_s29 + $0x8] sm:$0xff] %v460_v8 }
  0xb6   : > { %v430_v9 = vpop.f32.mrf.mxu2 }
  0xb7   : > { %v479_v10 = vpop.f32.mrf.mxu3 }
  0xb8   : > { %v987_v11 = vadd.f32 %v479_v10, %v430_v9  ;;  %v413_v12 = vpop.f32.mrf.mxu0 }
  0xb9   : > { %v462_v13 = vpop.f32.mrf.mxu1 }
  0xba   : > { %506 = vst [vmem:[%s976_s29 + $0x48] sm:$0xff] %v987_v11  ;;  %v463_v14 = vadd.f32 %v462_v13, %v413_v12 }
  0xbc   : > { %499 = vst [vmem:[%s976_s29 + $0x10] sm:$0xff] %v463_v14 }
  0xbe   : > { %v433_v15 = vpop.f32.mrf.mxu2 }
  0xbf   : > { %v482_v16 = vpop.f32.mrf.mxu3 }
  0xc0   : > { %v992_v17 = vadd.f32 %v482_v16, %v433_v15  ;;  %v415_v18 = vpop.f32.mrf.mxu0 }
  0xc1   : > { %v464_v19 = vpop.f32.mrf.mxu1 }
  0xc2   : > { %507 = vst [vmem:[%s976_s29 + $0x50] sm:$0xff] %v992_v17  ;;  %v465_v20 = vadd.f32 %v464_v19, %v415_v18 }
  0xc4   : > { %500 = vst [vmem:[%s976_s29 + $0x18] sm:$0xff] %v465_v20 }
  0xc6   : > { %v435_v21 = vpop.f32.mrf.mxu2 }
  0xc7   : > { %v484_v22 = vpop.f32.mrf.mxu3 }
  0xc8   : > { %v997_v23 = vadd.f32 %v484_v22, %v435_v21  ;;  %v418_v24 = vpop.f32.mrf.mxu0 }
  0xc9   : > { %v467_v25 = vpop.f32.mrf.mxu1 }
  0xca   : > { %508 = vst [vmem:[%s976_s29 + $0x58] sm:$0xff] %v997_v23  ;;  %v468_v26 = vadd.f32 %v467_v25, %v418_v24 }
  0xcc   : > { %501 = vst [vmem:[%s976_s29 + $0x20] sm:$0xff] %v468_v26 }
  0xce   : > { %v438_v27 = vpop.f32.mrf.mxu2 }
  0xcf   : > { %v487_v28 = vpop.f32.mrf.mxu3 }
  0xd0   : > { %v1002_v29 = vadd.f32 %v487_v28, %v438_v27  ;;  %v420_v30 = vpop.f32.mrf.mxu0 }
  0xd1   : > { %v469_v31 = vpop.f32.mrf.mxu1 }
  0xd2   : > { %509 = vst [vmem:[%s976_s29 + $0x60] sm:$0xff] %v1002_v29  ;;  %v470_v32 = vadd.f32 %v469_v31, %v420_v30 }
  0xd4   : > { %502 = vst [vmem:[%s976_s29 + $0x28] sm:$0xff] %v470_v32 }
  0xd6   : > { %v440_v33 = vpop.f32.mrf.mxu2 }
  0xd7   : > { %v489_v34 = vpop.f32.mrf.mxu3 }
  0xd8   : > { %v490_v35 = vadd.f32 %v489_v34, %v440_v33  ;;  %v423_v36 = vpop.f32.mrf.mxu0 }
  0xd9   : > { %v472_v37 = vpop.f32.mrf.mxu1 }
  0xda   : > { %510 = vst [vmem:[%s976_s29 + $0x68] sm:$0xff] %v490_v35  ;;  %v473_v38 = vadd.f32 %v472_v37, %v423_v36 }
  0xdc   : > { %503 = vst [vmem:[%s976_s29 + $0x30] sm:$0xff] %v473_v38 }
  0xde   : > { %v443_v39 = vpop.f32.mrf.mxu2 }
  0xdf   : > { %v492_v40 = vpop.f32.mrf.mxu3 }
  0xe0   : > { %v493_v41 = vadd.f32 %v492_v40, %v443_v39  ;;  %v425_v42 = vpop.f32.mrf.mxu0 }
  0xe1   : > { %v474_v43 = vpop.f32.mrf.mxu1 }
  0xe2   : > { %511 = vst [vmem:[%s976_s29 + $0x70] sm:$0xff] %v493_v41  ;;  %v475_v44 = vadd.f32 %v474_v43, %v425_v42 }
  0xe4   : > { %504 = vst [vmem:[%s976_s29 + $0x38] sm:$0xff] %v475_v44 }
  0xe6   : > { %v445_v45 = vpop.f32.mrf.mxu2  ;;  %516 = sbr.rel (%p781_p4) target bundleno = 237 (0xed), region = 32 }
  0xe7   : > { %v494_v46 = vpop.f32.mrf.mxu3 }
  0xe8   : > { %v495_v47 = vadd.f32 %v494_v46, %v445_v45 }
  0xea   : > { %512 = vst [vmem:[%s976_s29 + $0x78] sm:$0xff] %v495_v47 }
  0xeb   : > { %v850_v48 = vmov 0.0  }
  0xec   : > { %517 = vst [vmem:[%s1047_s3] sm:$0x3] %v850_v48 }
  0xed PF: > { %v518_v49 = vadd.f32 %v460_v8, %v978_v2  ;;  %v539_v50 = vmul.f32 %v978_v2, %v978_v2  ;;  %v540_v51 = vmul.f32 %v460_v8, %v460_v8  ;;  %v541_v53 = vmul.f32 %v463_v14, %v463_v14 }
  0xee   : > { %v542_v55 = vmul.f32 %v465_v20, %v465_v20  ;;  %v543_v58 = vmul.f32 %v468_v26, %v468_v26  ;;  %v544_v61 = vmul.f32 %v470_v32, %v470_v32  ;;  %v545_v0 = vmul.f32 %v473_v38, %v473_v38 }
  0xef   : > { %v519_v52 = vadd.f32 %v518_v49, %v463_v14  ;;  %v555_v56 = vadd.f32 %v540_v51, %v539_v50  ;;  %v546_v4 = vmul.f32 %v475_v44, %v475_v44  ;;  %v547_v7 = vmul.f32 %v982_v5, %v982_v5 }
  0xf0   : > { %v548_v10 = vmul.f32 %v987_v11, %v987_v11  ;;  %v549_v14 = vmul.f32 %v992_v17, %v992_v17  ;;  %v550_v18 = vmul.f32 %v997_v23, %v997_v23  ;;  %v552_v22 = vmul.f32 %v490_v35, %v490_v35 }
  0xf1   : > { %v520_v54 = vadd.f32 %v519_v52, %v465_v20  ;;  %v556_v59 = vadd.f32 %v555_v56, %v541_v53  ;;  %v551_v20 = vmul.f32 %v1002_v29, %v1002_v29  ;;  %v554_v28 = vmul.f32 %v495_v47, %v495_v47 }
  0xf2   : > { %vm577_vm0 = vcmask 1040384  }
  0xf3   : > { %v521_v57 = vadd.f32 %v520_v54, %v468_v26  ;;  %v557_v62 = vadd.f32 %v556_v59, %v542_v55  ;;  %v553_v26 = vmul.f32 %v493_v41, %v493_v41 }
  0xf5   : > { %v522_v60 = vadd.f32 %v521_v57, %v470_v32  ;;  %v558_v1 = vadd.f32 %v557_v62, %v543_v58 }
  0xf7   : > { %v523_v63 = vadd.f32 %v522_v60, %v473_v38  ;;  %v559_v6 = vadd.f32 %v558_v1, %v544_v61 }
  0xf9   : > { %v524_v3 = vadd.f32 %v523_v63, %v475_v44  ;;  %v560_v8 = vadd.f32 %v559_v6, %v545_v0 }
  0xfb   : > { %v525_v2 = vadd.f32 %v524_v3, %v982_v5  ;;  %v561_v12 = vadd.f32 %v560_v8, %v546_v4 }
  0xfd   : > { %v526_v9 = vadd.f32 %v525_v2, %v987_v11  ;;  %v562_v15 = vadd.f32 %v561_v12, %v547_v7 }
  0xff   : > { %v527_v13 = vadd.f32 %v526_v9, %v992_v17  ;;  %v563_v19 = vadd.f32 %v562_v15, %v548_v10 }
 0x101   : > { %v528_v16 = vadd.f32 %v527_v13, %v997_v23  ;;  %v564_v21 = vadd.f32 %v563_v19, %v549_v14 }
 0x103   : > { %v529_v5 = vadd.f32 %v528_v16, %v1002_v29  ;;  %v565_v24 = vadd.f32 %v564_v21, %v550_v18 }
 0x105   : > { %v530_v11 = vadd.f32 %v529_v5, %v490_v35  ;;  %v566_v27 = vadd.f32 %v565_v24, %v551_v20 }
 0x107   : > { %v531_v25 = vadd.f32 %v530_v11, %v493_v41  ;;  %v567_v30 = vadd.f32 %v566_v27, %v552_v22  ;;  %v576_v41 = vld [vmem:[%s1047_s3] sm:$0x3] }
 0x109   : > { %v532_v17 = vadd.f32 %v531_v25, %v495_v47  ;;  %v568_v32 = vadd.f32 %v567_v30, %v553_v26 }
 0x10b   : > { %v533_v31 = vrot.slane %v532_v17, 4  ;;  %v569_v23 = vadd.f32 %v568_v32, %v554_v28 }
 0x10d   : > { %v534_v33 = vadd.f32 %v533_v31, %v532_v17  ;;  %v570_v36 = vrot.slane %v569_v23, 4 }
 0x10f   : > { %v535_v34 = vrot.slane %v534_v33, 2  ;;  %v571_v38 = vadd.f32 %v570_v36, %v569_v23 }
 0x111   : > { %v536_v37 = vadd.f32 %v535_v34, %v534_v33  ;;  %v572_v29 = vrot.slane %v571_v38, 2 }
 0x113   : > { %v537_v39 = vrot.slane %v536_v37, 1  ;;  %v573_v40 = vadd.f32 %v572_v29, %v571_v38 }
 0x115   : > { %v538_v42 = vadd.f32 %v537_v39, %v536_v37  ;;  %v574_v35 = vrot.slane %v573_v40, 1 }
 0x117   : > { %v575_v43 = vadd.f32 %v574_v35, %v573_v40 }
 0x119   : > { %v578_v44 = vsel %vm577_vm0, %v538_v42, %v575_v43 }
 0x11a   : > { %v579_v45 = vadd.f32 %v578_v44, %v576_v41 }
 0x11c   : > { %580 = vst [vmem:[%s1047_s3] sm:$0x3] %v579_v45 }
 0x11d PF: > { %s14_s12 = sadd.s32 1, %s848_s12  }
 0x11e   : > { %p11_p5 = scmp.ge.s32.totalorder %s14_s12, 6  }
 0x120   :  { %13 = sbr.rel (!%p11_p5) target bundleno = 1 (0x1), region = 70 }

// kernel: _lambda_.10
= control target key start
LH: loop header
LB: loop body
LE: loop exit
PB: predicated region body
PF: predicated region fallthrough
CT: control target
= control target key end

     0   :  { %s529_s15 = smov 0   ;;  %s686_s0 = inlined_call_operand.vmem [shape: f32[512,128], index: 0, kind: input, shape index: {}]   ;;  %s687_s1 = inlined_call_operand.vmem [shape: f32[2,128], index: 1, kind: input, shape index: {}]   ;;  %s688_s2 = inlined_call_operand.vmem [shape: f32[1,128], index: 2, kind: input, shape index: {}]   ;;  %s689_s3 = inlined_call_operand.vmem [shape: f32[1,128], index: 3, kind: input, shape index: {}]   ;;  %s690_s4 = inlined_call_operand.vmem [shape: bf16[512,128], index: 4, kind: output, shape index: {}]  }
   0x1 LB: > { %s427_s16 = sadd.s32 4294967295, %s502_s15   ;;  %p431_p0 = scmp.ge.s32.totalorder %s502_s15, 1  ;;  %s502_s15 = sphi %s529_s15, %s14_s15  }
   0x2   : > { %p163_p1 = scmp.lt.s32.totalorder %s502_s15, 5 }
   0x4   : > { %p164_p2 = pnand %p431_p0, %p163_p1 }
   0x5   : > { %s432_s21 = sshll.u32 (!%p164_p2), %s427_s16, 4 }
   0x6   : > { %167 = sbr.rel (%p164_p2) target bundleno = 72 (0x48), region = 36  ;;  %p190_p3 = scmp.lt.s32.totalorder (!%p164_p2), %s432_s21, 63 }
   0xb   : > { %v217_v0 = vld [vmem:[%s687_s1] sm:$0x1]  ;;  %v219_v1 = vld [vmem:[%s687_s1 + $0x1] sm:$0x1]  ;;  %s694_s21 = smov (!%p190_p3, %s432_s21), 63 }
   0xc   : > { %v218_v2 = vmul.f32 0.001953125, %v217_v0  ;;  %v220_v3 = vmul.f32 0.001953125, %v219_v1  ;;  %s433_s22 = sshll.u32 %s694_s21, 3  ;;  %v235_v15 = vld [vmem:[%s688_s2] sm:$0x1]  ;;  %s435_s30 = sshll.u32 %s694_s21, 2 }
   0xd   : > { %s549_s25 = scalar_lea.vmem %s686_s0, %s433_s22  ;;  %v609_v45 = vld [vmem:[%s689_s3] ss:$0 sm:$0xff]  ;;  %s645_s7 = scalar_lea.vmem %s690_s4, %s435_s30 }
   0xe   : > { %v221_v4 = vmul.f32 %v218_v2, %v218_v2  ;;  %v201_v12 = vld [vmem:[%s549_s25] sm:$0xff]  ;;  %v202_v13 = vld [vmem:[%s549_s25 + $0x8] sm:$0xff]  ;;  %v556_v16 = vperm.slane %v218_v2, 0  ;;  %v203_v18 = vld [vmem:[%s549_s25 + $0x10] sm:$0xff] }
   0xf   : > { %v204_v19 = vld [vmem:[%s549_s25 + $0x18] sm:$0xff]  ;;  %v205_v21 = vld [vmem:[%s549_s25 + $0x20] sm:$0xff]  ;;  %v206_v22 = vld [vmem:[%s549_s25 + $0x28] sm:$0xff] }
  0x10   : > { %v222_v5 = vsub.f32 %v220_v3, %v221_v4  ;;  %v207_v23 = vld [vmem:[%s549_s25 + $0x30] sm:$0xff]  ;;  %v208_v24 = vld [vmem:[%s549_s25 + $0x38] sm:$0xff]  ;;  %v569_v25 = vld [vmem:[%s549_s25 + $0x40] sm:$0xff]  ;;  %v238_v28 = vsub.f32 %v201_v12, %v556_v16  ;;  %v239_v29 = vsub.f32 %v202_v13, %v556_v16  ;;  %v240_v34 = vsub.f32 %v203_v18, %v556_v16 }
  0x11   : > { %v572_v26 = vld [vmem:[%s549_s25 + $0x48] sm:$0xff]  ;;  %v579_v30 = vld [vmem:[%s549_s25 + $0x50] sm:$0xff]  ;;  %v582_v31 = vld [vmem:[%s549_s25 + $0x58] sm:$0xff]  ;;  %v241_v35 = vsub.f32 %v204_v19, %v556_v16  ;;  %v242_v36 = vsub.f32 %v205_v21, %v556_v16  ;;  %v243_v40 = vsub.f32 %v206_v22, %v556_v16  ;;  %v244_v41 = vsub.f32 %v207_v23, %v556_v16 }
  0x12   : > { %v223_v6 = vmax.f32 %v222_v5, 0.0  ;;  %v585_v32 = vld [vmem:[%s549_s25 + $0x60] sm:$0xff]  ;;  %v591_v37 = vld [vmem:[%s549_s25 + $0x68] sm:$0xff]  ;;  %v594_v38 = vld [vmem:[%s549_s25 + $0x70] sm:$0xff]  ;;  %v245_v42 = vsub.f32 %v208_v24, %v556_v16  ;;  %v246_v43 = vsub.f32 %v569_v25, %v556_v16  ;;  %v247_v46 = vsub.f32 %v572_v26, %v556_v16 }
  0x13   : > { %v597_v39 = vld [vmem:[%s549_s25 + $0x78] sm:$0xff]  ;;  %v248_v47 = vsub.f32 %v579_v30, %v556_v16  ;;  %v249_v48 = vsub.f32 %v582_v31, %v556_v16  ;;  %v250_v49 = vsub.f32 %v585_v32, %v556_v16  ;;  %v251_v50 = vsub.f32 %v591_v37, %v556_v16 }
  0x14   : > { %v224_v7 = vadd.f32 1e-05, %v223_v6  ;;  %v252_v51 = vsub.f32 %v594_v38, %v556_v16  ;;  %v253_v52 = vsub.f32 %v597_v39, %v556_v16 }
  0x16   : > { %494 = vrsqrt.f32 %v224_v7  ;;  %vm231_vm0 = vweird.f32 %v224_v7 }
  0x1c   : > { %v495_v8 = vpop.eup %494 }
  0x1d   : > { %v226_v9 = vmul.f32 %v495_v8, %v224_v7  ;;  %vm232_vm1 = vweird.f32 %v495_v8 }
  0x1e   : > { %vm558_vm2 = vmor %vm231_vm0, %vm232_vm1 }
  0x1f   : > { %v227_v10 = vmul.f32 %v495_v8, %v226_v9 }
  0x21   : > { %v228_v11 = vmul.f32 0.5, %v227_v10 }
  0x23   : > { %v229_v14 = vsub.f32 1.5, %v228_v11 }
  0x25   : > { %v230_v20 = vmul.f32 %v495_v8, %v229_v14 }
  0x27   : > { %v234_v27 = vsel %vm558_vm2, %v495_v8, %v230_v20 }
  0x28   : > { %v236_v33 = vmul.f32 %v235_v15, %v234_v27 }
  0x2a   : > { %v604_v44 = vperm.slane %v236_v33, 0 }
  0x2c   : > { %v255_v53 = vmul.f32 %v604_v44, %v238_v28  ;;  %v256_v54 = vmul.f32 %v604_v44, %v239_v29  ;;  %v257_v55 = vmul.f32 %v604_v44, %v240_v34  ;;  %v258_v56 = vmul.f32 %v604_v44, %v241_v35 }
  0x2d   : > { %v259_v57 = vmul.f32 %v604_v44, %v242_v36  ;;  %v260_v58 = vmul.f32 %v604_v44, %v243_v40  ;;  %v261_v59 = vmul.f32 %v604_v44, %v244_v41  ;;  %v262_v60 = vmul.f32 %v604_v44, %v245_v42 }
  0x2e   : > { %v275_v61 = vadd.f32 %v609_v45, %v255_v53  ;;  %v276_v62 = vadd.f32 %v609_v45, %v256_v54  ;;  %v277_v63 = vadd.f32 %v609_v45, %v257_v55  ;;  %v278_v0 = vadd.f32 %v609_v45, %v258_v56 }
  0x2f   : > { %v279_v1 = vadd.f32 %v609_v45, %v259_v57  ;;  %v280_v2 = vadd.f32 %v609_v45, %v260_v58  ;;  %v281_v3 = vadd.f32 %v609_v45, %v261_v59  ;;  %v282_v4 = vadd.f32 %v609_v45, %v262_v60 }
  0x30   : > { %vm291_vm3 = vcmp.ge.f32.partialorder %v275_v61, 0.0  ;;  %vm292_vm4 = vcmp.ge.f32.partialorder %v276_v62, 0.0  ;;  %v307_v5 = vmul.f32 0.2, %v275_v61  ;;  %v308_v6 = vmul.f32 0.2, %v276_v62 }
  0x31   : > { %vm293_vm5 = vcmp.ge.f32.partialorder %v277_v63, 0.0  ;;  %vm294_vm6 = vcmp.ge.f32.partialorder %v278_v0, 0.0  ;;  %v309_v7 = vmul.f32 0.2, %v277_v63  ;;  %v310_v8 = vmul.f32 0.2, %v278_v0 }
  0x32   : > { %v323_v9 = vsel %vm291_vm3, %v275_v61, %v307_v5  ;;  %v324_v10 = vsel %vm292_vm4, %v276_v62, %v308_v6  ;;  %vm295_vm7 = vcmp.ge.f32.partialorder %v279_v1, 0.0  ;;  %vm296_vm8 = vcmp.ge.f32.partialorder %v280_v2, 0.0 }
  0x33   : > { %v441_v11 = vpack.c.bf16 %v324_v10, %v323_v9  ;;  %v325_v12 = vsel %vm293_vm5, %v277_v63, %v309_v7  ;;  %v326_v13 = vsel %vm294_vm6, %v278_v0, %v310_v8  ;;  %v311_v14 = vmul.f32 0.2, %v279_v1 }
  0x34   : > { %v446_v15 = vpack.c.bf16 %v326_v13, %v325_v12  ;;  %v312_v17 = vmul.f32 0.2, %v280_v2  ;;  %vm297_vm9 = vcmp.ge.f32.partialorder %v281_v3, 0.0  ;;  %vm298_vm10 = vcmp.ge.f32.partialorder %v282_v4, 0.0 }
  0x35   : > { %442 = vst [vmem:[%s645_s7] sm:$0xff] %v441_v11   ;;  %v327_v18 = vsel %vm295_vm7, %v279_v1, %v311_v14  ;;  %v313_v19 = vmul.f32 0.2, %v281_v3  ;;  %v314_v20 = vmul.f32 0.2, %v282_v4  ;;  %v263_v21 = vmul.f32 %v604_v44, %v246_v43 }
  0x36   : > { %478 = vst [vmem:[%s645_s7 + $0x8] sm:$0xff] %v446_v15   ;;  %v328_v22 = vsel %vm296_vm8, %v280_v2, %v312_v17  ;;  %v264_v23 = vmul.f32 %v604_v44, %v247_v46  ;;  %v265_v24 = vmul.f32 %v604_v44, %v248_v47  ;;  %v266_v25 = vmul.f32 %v604_v44, %v249_v48 }
  0x37   : > { %v451_v26 = vpack.c.bf16 %v328_v22, %v327_v18  ;;  %v329_v27 = vsel %vm297_vm9, %v281_v3, %v313_v19  ;;  %v330_v28 = vsel %vm298_vm10, %v282_v4, %v314_v20  ;;  %v283_v29 = vadd.f32 %v609_v45, %v263_v21 }
  0x38   : > { %v456_v30 = vpack.c.bf16 %v330_v28, %v329_v27  ;;  %v284_v31 = vadd.f32 %v609_v45, %v264_v23  ;;  %v285_v33 = vadd.f32 %v609_v45, %v265_v24  ;;  %v286_v34 = vadd.f32 %v609_v45, %v266_v25 }
  0x39   : > { %479 = vst [vmem:[%s645_s7 + $0x10] sm:$0xff] %v451_v26   ;;  %vm299_vm11 = vcmp.ge.f32.partialorder %v283_v29, 0.0  ;;  %v315_v35 = vmul.f32 0.2, %v283_v29  ;;  %v267_v36 = vmul.f32 %v604_v44, %v250_v49  ;;  %v268_v40 = vmul.f32 %v604_v44, %v251_v50 }
  0x3a   : > { %480 = vst [vmem:[%s645_s7 + $0x18] sm:$0xff] %v456_v30   ;;  %vm300_vm12 = vcmp.ge.f32.partialorder %v284_v31, 0.0  ;;  %v316_v41 = vmul.f32 0.2, %v284_v31  ;;  %vm301_vm13 = vcmp.ge.f32.partialorder %v285_v33, 0.0  ;;  %vm302_vm14 = vcmp.ge.f32.partialorder %v286_v34, 0.0 }
  0x3b   : > { %v331_v42 = vsel %vm299_vm11, %v283_v29, %v315_v35  ;;  %v317_v43 = vmul.f32 0.2, %v285_v33  ;;  %v318_v46 = vmul.f32 0.2, %v286_v34  ;;  %v287_v47 = vadd.f32 %v609_v45, %v267_v36 }
  0x3c   : > { %v332_v32 = vsel %vm300_vm12, %v284_v31, %v316_v41  ;;  %v288_v48 = vadd.f32 %v609_v45, %v268_v40  ;;  %v269_v37 = vmul.f32 %v604_v44, %v252_v51  ;;  %v270_v49 = vmul.f32 %v604_v44, %v253_v52 }
  0x3d   : > { %v461_v50 = vpack.c.bf16 %v332_v32, %v331_v42  ;;  %v333_v53 = vsel %vm301_vm13, %v285_v33, %v317_v43  ;;  %v334_v54 = vsel %vm302_vm14, %v286_v34, %v318_v46  ;;  %vm303_vm15 = vcmp.ge.f32.partialorder %v287_v47, 0.0 }
  0x3e   : > { %v466_v55 = vpack.c.bf16 %v334_v54, %v333_v53  ;;  %vm304_vm0 = vcmp.ge.f32.partialorder %v288_v48, 0.0  ;;  %v319_v56 = vmul.f32 0.2, %v287_v47  ;;  %v320_v57 = vmul.f32 0.2, %v288_v48 }
  0x3f   : > { %481 = vst [vmem:[%s645_s7 + $0x20] sm:$0xff] %v461_v50   ;;  %v289_v38 = vadd.f32 %v609_v45, %v269_v37  ;;  %v290_v51 = vadd.f32 %v609_v45, %v270_v49 }
  0x40   : > { %482 = vst [vmem:[%s645_s7 + $0x28] sm:$0xff] %v466_v55   ;;  %v335_v58 = vsel %vm303_vm15, %v287_v47, %v319_v56  ;;  %v336_v16 = vsel %vm304_vm0, %v288_v48, %v320_v57 }
  0x41   : > { %v471_v39 = vpack.c.bf16 %v336_v16, %v335_v58  ;;  %vm305_vm1 = vcmp.ge.f32.partialorder %v289_v38, 0.0  ;;  %vm306_vm2 = vcmp.ge.f32.partialorder %v290_v51, 0.0  ;;  %v321_v44 = vmul.f32 0.2, %v289_v38 }
  0x42   : > { %v322_v52 = vmul.f32 0.2, %v290_v51 }
  0x43   : > { %483 = vst [vmem:[%s645_s7 + $0x30] sm:$0xff] %v471_v39   ;;  %v337_v59 = vsel %vm305_vm1, %v289_v38, %v321_v44 }
  0x44   : > { %v338_v60 = vsel %vm306_vm2, %v290_v51, %v322_v52 }
  0x45   : > { %v476_v61 = vpack.c.bf16 %v338_v60, %v337_v59 }
  0x47   : > { %484 = vst [vmem:[%s645_s7 + $0x38] sm:$0xff] %v476_v61  }
  0x48 PF: > { %s14_s15 = sadd.s32 1, %s502_s15  }
  0x49   : > { %p11_p4 = scmp.ge.s32.totalorder %s14_s15, 6  }
  0x4b   :  { %13 = sbr.rel (!%p11_p4) target bundleno = 1 (0x1), region = 66 }

// kernel: _lambda_.12
= control target key start
LH: loop header
LB: loop body
LE: loop exit
PB: predicated region body
PF: predicated region fallthrough
CT: control target
= control target key end

     0   :  { %s440_s1 = inlined_call_operand.vmem [shape: f32[2,128], index: 1, kind: input, shape index: {}]   ;;  %s441_s3 = inlined_call_operand.vmem [shape: f32[1,128], index: 3, kind: input, shape index: {}]   ;;  %s442_s0 = inlined_call_operand.vmem [shape: f32[128,128], index: 0, kind: input, shape index: {}]   ;;  %s443_s2 = inlined_call_operand.vmem [shape: f32[1,128], index: 2, kind: input, shape index: {}]   ;;  %s444_s4 = inlined_call_operand.vmem [shape: bf16[128,128], index: 4, kind: output, shape index: {}]  }
   0x1   :  { %v33_v0 = vld [vmem:[%s440_s1] sm:$0x1]  ;;  %v35_v2 = vld [vmem:[%s440_s1 + $0x1] sm:$0x1]  ;;  %v18_v13 = vld [vmem:[%s442_s0 + $0x8] sm:$0xff] }
   0x2   :  { %v34_v1 = vmul.f32 0.0078125, %v33_v0  ;;  %v36_v3 = vmul.f32 0.0078125, %v35_v2  ;;  %v17_v12 = vld [vmem:[%s442_s0] sm:$0xff]  ;;  %v19_v18 = vld [vmem:[%s442_s0 + $0x10] sm:$0xff]  ;;  %v20_v19 = vld [vmem:[%s442_s0 + $0x18] sm:$0xff] }
   0x3   :  { %v51_v15 = vld [vmem:[%s443_s2] sm:$0x1]  ;;  %v22_v22 = vld [vmem:[%s442_s0 + $0x28] sm:$0xff]  ;;  %v23_v23 = vld [vmem:[%s442_s0 + $0x30] sm:$0xff] }
   0x4   :  { %v37_v4 = vmul.f32 %v34_v1, %v34_v1  ;;  %v281_v16 = vperm.slane %v34_v1, 0  ;;  %v21_v21 = vld [vmem:[%s442_s0 + $0x20] sm:$0xff]  ;;  %v24_v24 = vld [vmem:[%s442_s0 + $0x38] sm:$0xff]  ;;  %v313_v26 = vld [vmem:[%s442_s0 + $0x48] sm:$0xff] }
   0x5   :  { %v308_v25 = vld [vmem:[%s442_s0 + $0x40] sm:$0xff]  ;;  %v322_v30 = vld [vmem:[%s442_s0 + $0x50] sm:$0xff]  ;;  %v327_v31 = vld [vmem:[%s442_s0 + $0x58] sm:$0xff] }
   0x6   :  { %v38_v5 = vsub.f32 %v36_v3, %v37_v4  ;;  %v54_v28 = vsub.f32 %v17_v12, %v281_v16  ;;  %v55_v29 = vsub.f32 %v18_v13, %v281_v16  ;;  %v332_v32 = vld [vmem:[%s442_s0 + $0x60] sm:$0xff]  ;;  %v56_v34 = vsub.f32 %v19_v18, %v281_v16  ;;  %v340_v37 = vld [vmem:[%s442_s0 + $0x68] sm:$0xff]  ;;  %v345_v38 = vld [vmem:[%s442_s0 + $0x70] sm:$0xff] }
   0x7   :  { %v57_v35 = vsub.f32 %v20_v19, %v281_v16  ;;  %v58_v36 = vsub.f32 %v21_v21, %v281_v16  ;;  %v350_v39 = vld [vmem:[%s442_s0 + $0x78] sm:$0xff]  ;;  %v59_v40 = vsub.f32 %v22_v22, %v281_v16  ;;  %v60_v41 = vsub.f32 %v23_v23, %v281_v16  ;;  %v362_v45 = vld [vmem:[%s441_s3] ss:$0 sm:$0xff] }
   0x8   :  { %v39_v6 = vmax.f32 %v38_v5, 0.0  ;;  %v61_v42 = vsub.f32 %v24_v24, %v281_v16  ;;  %v62_v43 = vsub.f32 %v308_v25, %v281_v16  ;;  %v63_v46 = vsub.f32 %v313_v26, %v281_v16 }
   0x9   :  { %v64_v47 = vsub.f32 %v322_v30, %v281_v16  ;;  %v65_v48 = vsub.f32 %v327_v31, %v281_v16  ;;  %v66_v49 = vsub.f32 %v332_v32, %v281_v16  ;;  %v67_v50 = vsub.f32 %v340_v37, %v281_v16 }
   0xa   :  { %v40_v7 = vadd.f32 1e-05, %v39_v6  ;;  %v68_v51 = vsub.f32 %v345_v38, %v281_v16  ;;  %v69_v52 = vsub.f32 %v350_v39, %v281_v16 }
   0xc   :  { %239 = vrsqrt.f32 %v40_v7  ;;  %vm47_vm0 = vweird.f32 %v40_v7 }
  0x12   :  { %v240_v8 = vpop.eup %239 }
  0x13   :  { %v42_v9 = vmul.f32 %v240_v8, %v40_v7  ;;  %vm48_vm1 = vweird.f32 %v240_v8 }
  0x14   :  { %vm283_vm2 = vmor %vm47_vm0, %vm48_vm1 }
  0x15   :  { %v43_v10 = vmul.f32 %v240_v8, %v42_v9 }
  0x17   :  { %v44_v11 = vmul.f32 0.5, %v43_v10 }
  0x19   :  { %v45_v14 = vsub.f32 1.5, %v44_v11 }
  0x1b   :  { %v46_v20 = vmul.f32 %v240_v8, %v45_v14 }
  0x1d   :  { %v50_v27 = vsel %vm283_vm2, %v240_v8, %v46_v20 }
  0x1e   :  { %v52_v33 = vmul.f32 %v51_v15, %v50_v27 }
  0x20   :  { %v357_v44 = vperm.slane %v52_v33, 0 }
  0x22   :  { %v71_v53 = vmul.f32 %v357_v44, %v54_v28  ;;  %v72_v54 = vmul.f32 %v357_v44, %v55_v29  ;;  %v73_v55 = vmul.f32 %v357_v44, %v56_v34  ;;  %v74_v56 = vmul.f32 %v357_v44, %v57_v35 }
  0x23   :  { %v75_v57 = vmul.f32 %v357_v44, %v58_v36  ;;  %v76_v58 = vmul.f32 %v357_v44, %v59_v40  ;;  %v77_v59 = vmul.f32 %v357_v44, %v60_v41  ;;  %v78_v60 = vmul.f32 %v357_v44, %v61_v42 }
  0x24   :  { %v91_v61 = vadd.f32 %v362_v45, %v71_v53  ;;  %v92_v62 = vadd.f32 %v362_v45, %v72_v54  ;;  %v93_v63 = vadd.f32 %v362_v45, %v73_v55  ;;  %v94_v0 = vadd.f32 %v362_v45, %v74_v56 }
  0x25   :  { %v95_v1 = vadd.f32 %v362_v45, %v75_v57  ;;  %v96_v2 = vadd.f32 %v362_v45, %v76_v58  ;;  %v97_v3 = vadd.f32 %v362_v45, %v77_v59  ;;  %v98_v4 = vadd.f32 %v362_v45, %v78_v60 }
  0x26   :  { %vm107_vm3 = vcmp.ge.f32.partialorder %v91_v61, 0.0  ;;  %vm108_vm4 = vcmp.ge.f32.partialorder %v92_v62, 0.0  ;;  %v123_v5 = vmul.f32 0.2, %v91_v61  ;;  %v124_v6 = vmul.f32 0.2, %v92_v62 }
  0x27   :  { %vm109_vm5 = vcmp.ge.f32.partialorder %v93_v63, 0.0  ;;  %vm110_vm6 = vcmp.ge.f32.partialorder %v94_v0, 0.0  ;;  %v125_v7 = vmul.f32 0.2, %v93_v63  ;;  %v126_v8 = vmul.f32 0.2, %v94_v0 }
  0x28   :  { %v139_v9 = vsel %vm107_vm3, %v91_v61, %v123_v5  ;;  %v140_v10 = vsel %vm108_vm4, %v92_v62, %v124_v6  ;;  %vm111_vm7 = vcmp.ge.f32.partialorder %v95_v1, 0.0  ;;  %vm112_vm8 = vcmp.ge.f32.partialorder %v96_v2, 0.0 }
  0x29   :  { %v194_v11 = vpack.c.bf16 %v140_v10, %v139_v9  ;;  %v141_v12 = vsel %vm109_vm5, %v93_v63, %v125_v7  ;;  %v142_v13 = vsel %vm110_vm6, %v94_v0, %v126_v8  ;;  %v127_v14 = vmul.f32 0.2, %v95_v1 }
  0x2a   :  { %v199_v15 = vpack.c.bf16 %v142_v13, %v141_v12  ;;  %v128_v17 = vmul.f32 0.2, %v96_v2  ;;  %vm113_vm9 = vcmp.ge.f32.partialorder %v97_v3, 0.0  ;;  %vm114_vm10 = vcmp.ge.f32.partialorder %v98_v4, 0.0 }
  0x2b   :  { %195 = vst [vmem:[%s444_s4] sm:$0xff] %v194_v11   ;;  %v143_v18 = vsel %vm111_vm7, %v95_v1, %v127_v14  ;;  %v129_v19 = vmul.f32 0.2, %v97_v3  ;;  %v130_v20 = vmul.f32 0.2, %v98_v4  ;;  %v79_v21 = vmul.f32 %v357_v44, %v62_v43 }
  0x2c   :  { %231 = vst [vmem:[%s444_s4 + $0x8] sm:$0xff] %v199_v15   ;;  %v144_v22 = vsel %vm112_vm8, %v96_v2, %v128_v17  ;;  %v80_v23 = vmul.f32 %v357_v44, %v63_v46  ;;  %v81_v24 = vmul.f32 %v357_v44, %v64_v47  ;;  %v82_v25 = vmul.f32 %v357_v44, %v65_v48 }
  0x2d   :  { %v204_v26 = vpack.c.bf16 %v144_v22, %v143_v18  ;;  %v145_v27 = vsel %vm113_vm9, %v97_v3, %v129_v19  ;;  %v146_v28 = vsel %vm114_vm10, %v98_v4, %v130_v20  ;;  %v99_v29 = vadd.f32 %v362_v45, %v79_v21 }
  0x2e   :  { %v209_v30 = vpack.c.bf16 %v146_v28, %v145_v27  ;;  %v100_v31 = vadd.f32 %v362_v45, %v80_v23  ;;  %v101_v32 = vadd.f32 %v362_v45, %v81_v24  ;;  %v102_v33 = vadd.f32 %v362_v45, %v82_v25 }
  0x2f   :  { %232 = vst [vmem:[%s444_s4 + $0x10] sm:$0xff] %v204_v26   ;;  %vm115_vm11 = vcmp.ge.f32.partialorder %v99_v29, 0.0  ;;  %v131_v34 = vmul.f32 0.2, %v99_v29  ;;  %v83_v35 = vmul.f32 %v357_v44, %v66_v49  ;;  %v84_v36 = vmul.f32 %v357_v44, %v67_v50 }
  0x30   :  { %233 = vst [vmem:[%s444_s4 + $0x18] sm:$0xff] %v209_v30   ;;  %vm116_vm12 = vcmp.ge.f32.partialorder %v100_v31, 0.0  ;;  %v132_v37 = vmul.f32 0.2, %v100_v31  ;;  %vm117_vm13 = vcmp.ge.f32.partialorder %v101_v32, 0.0  ;;  %vm118_vm14 = vcmp.ge.f32.partialorder %v102_v33, 0.0 }
  0x31   :  { %v147_v40 = vsel %vm115_vm11, %v99_v29, %v131_v34  ;;  %v133_v41 = vmul.f32 0.2, %v101_v32  ;;  %v134_v42 = vmul.f32 0.2, %v102_v33  ;;  %v103_v43 = vadd.f32 %v362_v45, %v83_v35 }
  0x32   :  { %v148_v46 = vsel %vm116_vm12, %v100_v31, %v132_v37  ;;  %v104_v47 = vadd.f32 %v362_v45, %v84_v36  ;;  %v85_v48 = vmul.f32 %v357_v44, %v68_v51  ;;  %v86_v49 = vmul.f32 %v357_v44, %v69_v52 }
  0x33   :  { %v214_v50 = vpack.c.bf16 %v148_v46, %v147_v40  ;;  %v149_v53 = vsel %vm117_vm13, %v101_v32, %v133_v41  ;;  %v150_v54 = vsel %vm118_vm14, %v102_v33, %v134_v42  ;;  %vm119_vm15 = vcmp.ge.f32.partialorder %v103_v43, 0.0 }
  0x34   :  { %v219_v55 = vpack.c.bf16 %v150_v54, %v149_v53  ;;  %vm120_vm0 = vcmp.ge.f32.partialorder %v104_v47, 0.0  ;;  %v135_v56 = vmul.f32 0.2, %v103_v43  ;;  %v136_v57 = vmul.f32 0.2, %v104_v47 }
  0x35   :  { %234 = vst [vmem:[%s444_s4 + $0x20] sm:$0xff] %v214_v50   ;;  %v105_v38 = vadd.f32 %v362_v45, %v85_v48  ;;  %v106_v51 = vadd.f32 %v362_v45, %v86_v49 }
  0x36   :  { %235 = vst [vmem:[%s444_s4 + $0x28] sm:$0xff] %v219_v55   ;;  %v151_v16 = vsel %vm119_vm15, %v103_v43, %v135_v56  ;;  %v152_v39 = vsel %vm120_vm0, %v104_v47, %v136_v57 }
  0x37   :  { %v224_v44 = vpack.c.bf16 %v152_v39, %v151_v16  ;;  %vm121_vm1 = vcmp.ge.f32.partialorder %v105_v38, 0.0  ;;  %vm122_vm2 = vcmp.ge.f32.partialorder %v106_v51, 0.0  ;;  %v137_v52 = vmul.f32 0.2, %v105_v38 }
  0x38   :  { %v138_v58 = vmul.f32 0.2, %v106_v51 }
  0x39   :  { %236 = vst [vmem:[%s444_s4 + $0x30] sm:$0xff] %v224_v44   ;;  %v153_v59 = vsel %vm121_vm1, %v105_v38, %v137_v52 }
  0x3a   :  { %v154_v60 = vsel %vm122_vm2, %v106_v51, %v138_v58 }
  0x3b   :  { %v229_v61 = vpack.c.bf16 %v154_v60, %v153_v59 }
  0x3d   :  { %237 = vst [vmem:[%s444_s4 + $0x38] sm:$0xff] %v229_v61  }

// kernel: _lambda_.11
= control target key start
LH: loop header
LB: loop body
LE: loop exit
PB: predicated region body
PF: predicated region fallthrough
CT: control target
= control target key end

     0   :  { %vm737_vm0 = vcmask 1040384   ;;  %s1454_s1 = inlined_call_operand.vmem [shape: bf16[512,128], index: 1, kind: input, shape index: {}]   ;;  %s1455_s0 = inlined_call_operand.vmem [shape: bf16[128,512], index: 0, kind: input, shape index: {}]   ;;  %s1456_s2 = inlined_call_operand.vmem [shape: f32[128,128], index: 2, kind: output, shape index: {0}]   ;;  %s1457_s3 = inlined_call_operand.vmem [shape: f32[2,128], index: 3, kind: output, shape index: {1}]  }
   0x1   :  { %v1044_v0 = vld [vmem:[%s1454_s1 + $0x38] sm:$0xff]  ;;  %v1043_v4 = vld [vmem:[%s1454_s1 + $0x30] sm:$0xff]  ;;  %v1042_v8 = vld [vmem:[%s1454_s1 + $0x28] sm:$0xff] }
   0x2   :  { %v1052_v1 = vld [vmem:[%s1454_s1 + $0x78] sm:$0xff]  ;;  %461 = vmatpush.bf16.msra.mxu0 %v1044_v0  ;;  %v1051_v5 = vld [vmem:[%s1454_s1 + $0x70] sm:$0xff]  ;;  %v1050_v9 = vld [vmem:[%s1454_s1 + $0x68] sm:$0xff] }
   0x3   :  { %v1060_v2 = vld [vmem:[%s1454_s1 + $0xb8] sm:$0xff]  ;;  %510 = vmatpush.bf16.msra.mxu1 %v1052_v1  ;;  %v1059_v6 = vld [vmem:[%s1454_s1 + $0xb0] sm:$0xff]  ;;  %v1058_v10 = vld [vmem:[%s1454_s1 + $0xa8] sm:$0xff] }
   0x4   :  { %v1068_v3 = vld [vmem:[%s1454_s1 + $0xf8] sm:$0xff]  ;;  %559 = vmatpush.bf16.msra.mxu2 %v1060_v2  ;;  %v1067_v7 = vld [vmem:[%s1454_s1 + $0xf0] sm:$0xff]  ;;  %v1066_v11 = vld [vmem:[%s1454_s1 + $0xe8] sm:$0xff] }
   0x5   :  { %608 = vmatpush.bf16.msra.mxu3 %v1068_v3  ;;  %v1041_v12 = vld [vmem:[%s1454_s1 + $0x20] sm:$0xff]  ;;  %v1040_v16 = vld [vmem:[%s1454_s1 + $0x18] sm:$0xff]  ;;  %v1039_v20 = vld [vmem:[%s1454_s1 + $0x10] sm:$0xff] }
   0x6   :  { %462 = vmatpush.bf16.msra.mxu0 %v1043_v4  ;;  %v1049_v13 = vld [vmem:[%s1454_s1 + $0x60] sm:$0xff]  ;;  %v1048_v17 = vld [vmem:[%s1454_s1 + $0x58] sm:$0xff]  ;;  %v1047_v21 = vld [vmem:[%s1454_s1 + $0x50] sm:$0xff] }
   0x7   :  { %511 = vmatpush.bf16.msra.mxu1 %v1051_v5  ;;  %v1057_v14 = vld [vmem:[%s1454_s1 + $0xa0] sm:$0xff]  ;;  %v1056_v18 = vld [vmem:[%s1454_s1 + $0x98] sm:$0xff]  ;;  %v1055_v22 = vld [vmem:[%s1454_s1 + $0x90] sm:$0xff] }
   0x8   :  { %560 = vmatpush.bf16.msra.mxu2 %v1059_v6  ;;  %v1065_v15 = vld [vmem:[%s1454_s1 + $0xe0] sm:$0xff]  ;;  %v1064_v19 = vld [vmem:[%s1454_s1 + $0xd8] sm:$0xff]  ;;  %v1063_v23 = vld [vmem:[%s1454_s1 + $0xd0] sm:$0xff] }
   0x9   :  { %609 = vmatpush.bf16.msra.mxu3 %v1067_v7  ;;  %v1038_v24 = vld [vmem:[%s1454_s1 + $0x8] sm:$0xff]  ;;  %v1037_v28 = vld [vmem:[%s1454_s1] sm:$0xff]  ;;  %v1007_v33 = vld [vmem:[%s1455_s0 + $0xc] sm:$0xf0] }
   0xa   :  { %463 = vmatpush.bf16.msra.mxu0 %v1042_v8  ;;  %v1046_v25 = vld [vmem:[%s1454_s1 + $0x48] sm:$0xff]  ;;  %v1045_v29 = vld [vmem:[%s1454_s1 + $0x40] sm:$0xff]  ;;  %v753_v35 = vld [vmem:[%s1455_s0 + $0x10] sm:$0xf0] }
   0xb   :  { %512 = vmatpush.bf16.msra.mxu1 %v1050_v9  ;;  %v1054_v26 = vld [vmem:[%s1454_s1 + $0x88] sm:$0xff]  ;;  %v1053_v30 = vld [vmem:[%s1454_s1 + $0x80] sm:$0xff]  ;;  %v1008_v37 = vld [vmem:[%s1455_s0 + $0x14] sm:$0xf0] }
   0xc   :  { %561 = vmatpush.bf16.msra.mxu2 %v1058_v10  ;;  %v1062_v27 = vld [vmem:[%s1454_s1 + $0xc8] sm:$0xff]  ;;  %v1061_v31 = vld [vmem:[%s1454_s1 + $0xc0] sm:$0xff]  ;;  %v761_v39 = vld [vmem:[%s1455_s0 + $0x18] sm:$0xf0] }
   0xd   :  { %610 = vmatpush.bf16.msra.mxu3 %v1066_v11  ;;  %v751_v32 = vld [vmem:[%s1455_s0] sm:$0xf]  ;;  %v1005_v34 = vld [vmem:[%s1455_s0 + $0x4] sm:$0xf]  ;;  %v759_v36 = vld [vmem:[%s1455_s0 + $0x8] sm:$0xf] }
   0xe   :  { %464 = vmatpush.bf16.msra.mxu0 %v1041_v12  ;;  %v1006_v38 = vld [vmem:[%s1455_s0 + $0xc] sm:$0xf]  ;;  %v752_v40 = vor.u32 %v1007_v33, %v751_v32  ;;  %v756_v41 = vor.u32 %v1005_v34, %v753_v35  ;;  %v760_v42 = vor.u32 %v1008_v37, %v759_v36  ;;  %v767_v44 = vld [vmem:[%s1455_s0 + $0x20] sm:$0xf]  ;;  %v1011_v45 = vld [vmem:[%s1455_s0 + $0x2c] sm:$0xf0] }
   0xf   :  { %513 = vmatpush.bf16.msra.mxu1 %v1049_v13  ;;  %v764_v43 = vor.u32 %v1006_v38, %v761_v39  ;;  %v1009_v46 = vld [vmem:[%s1455_s0 + $0x24] sm:$0xf]  ;;  %v769_v47 = vld [vmem:[%s1455_s0 + $0x30] sm:$0xf0]  ;;  %v775_v48 = vld [vmem:[%s1455_s0 + $0x28] sm:$0xf]  ;;  %v768_v52 = vor.u32 %v1011_v45, %v767_v44 }
  0x10   :  { %562 = vmatpush.bf16.msra.mxu2 %v1057_v14  ;;  %v1012_v49 = vld [vmem:[%s1455_s0 + $0x34] sm:$0xf0]  ;;  %v1010_v50 = vld [vmem:[%s1455_s0 + $0x2c] sm:$0xf]  ;;  %v777_v51 = vld [vmem:[%s1455_s0 + $0x38] sm:$0xf0]  ;;  %v772_v53 = vor.u32 %v1009_v46, %v769_v47 }
  0x11   :  { %611 = vmatpush.bf16.msra.mxu3 %v1065_v15  ;;  %v776_v54 = vor.u32 %v1012_v49, %v775_v48  ;;  %v780_v55 = vor.u32 %v1010_v50, %v777_v51  ;;  %v783_v56 = vld [vmem:[%s1455_s0 + $0x40] sm:$0xf]  ;;  %v1015_v57 = vld [vmem:[%s1455_s0 + $0x4c] sm:$0xf0]  ;;  %v1013_v58 = vld [vmem:[%s1455_s0 + $0x44] sm:$0xf] }
  0x12   :  { %465 = vmatpush.bf16.msra.mxu0 %v1040_v16  ;;  %v785_v59 = vld [vmem:[%s1455_s0 + $0x50] sm:$0xf0]  ;;  %v791_v60 = vld [vmem:[%s1455_s0 + $0x48] sm:$0xf]  ;;  %v1016_v61 = vld [vmem:[%s1455_s0 + $0x54] sm:$0xf0]  ;;  %v784_v0 = vor.u32 %v1015_v57, %v783_v56 }
  0x13   :  { %514 = vmatpush.bf16.msra.mxu1 %v1048_v17  ;;  %v1014_v62 = vld [vmem:[%s1455_s0 + $0x4c] sm:$0xf]  ;;  %v793_v63 = vld [vmem:[%s1455_s0 + $0x58] sm:$0xf0]  ;;  %v788_v1 = vor.u32 %v1013_v58, %v785_v59  ;;  %v792_v2 = vor.u32 %v1016_v61, %v791_v60  ;;  %v799_v4 = vld [vmem:[%s1455_s0 + $0x60] sm:$0xf] }
  0x14   :  { %563 = vmatpush.bf16.msra.mxu2 %v1056_v18  ;;  %v796_v3 = vor.u32 %v1014_v62, %v793_v63  ;;  %v1019_v5 = vld [vmem:[%s1455_s0 + $0x6c] sm:$0xf0]  ;;  %v1017_v6 = vld [vmem:[%s1455_s0 + $0x64] sm:$0xf]  ;;  %v801_v7 = vld [vmem:[%s1455_s0 + $0x70] sm:$0xf0] }
  0x15   :  { %612 = vmatpush.bf16.msra.mxu3 %v1064_v19  ;;  %v807_v8 = vld [vmem:[%s1455_s0 + $0x68] sm:$0xf]  ;;  %v1020_v9 = vld [vmem:[%s1455_s0 + $0x74] sm:$0xf0]  ;;  %v1018_v10 = vld [vmem:[%s1455_s0 + $0x6c] sm:$0xf]  ;;  %v800_v12 = vor.u32 %v1019_v5, %v799_v4  ;;  %v804_v13 = vor.u32 %v1017_v6, %v801_v7 }
  0x16   :  { %466 = vmatpush.bf16.msra.mxu0 %v1039_v20  ;;  %v809_v11 = vld [vmem:[%s1455_s0 + $0x78] sm:$0xf0]  ;;  %v808_v14 = vor.u32 %v1020_v9, %v807_v8  ;;  %v815_v16 = vld [vmem:[%s1455_s0 + $0x80] sm:$0xf]  ;;  %v1023_v17 = vld [vmem:[%s1455_s0 + $0x8c] sm:$0xf0] }
  0x17   :  { %515 = vmatpush.bf16.msra.mxu1 %v1047_v21  ;;  %v812_v15 = vor.u32 %v1018_v10, %v809_v11  ;;  %v1021_v18 = vld [vmem:[%s1455_s0 + $0x84] sm:$0xf]  ;;  %v817_v19 = vld [vmem:[%s1455_s0 + $0x90] sm:$0xf0]  ;;  %v823_v20 = vld [vmem:[%s1455_s0 + $0x88] sm:$0xf] }
  0x18   :  { %564 = vmatpush.bf16.msra.mxu2 %v1055_v22  ;;  %v1024_v21 = vld [vmem:[%s1455_s0 + $0x94] sm:$0xf0]  ;;  %v1022_v22 = vld [vmem:[%s1455_s0 + $0x8c] sm:$0xf]  ;;  %v839_v32 = vld [vmem:[%s1455_s0 + $0xa8] sm:$0xf] }
  0x19   :  { %613 = vmatpush.bf16.msra.mxu3 %v1063_v23  ;;  %v825_v23 = vld [vmem:[%s1455_s0 + $0x98] sm:$0xf0]  ;;  %v1028_v33 = vld [vmem:[%s1455_s0 + $0xb4] sm:$0xf0]  ;;  %v1026_v34 = vld [vmem:[%s1455_s0 + $0xac] sm:$0xf] }
  0x1a   :  { %467 = vmatpush.bf16.msra.mxu0 %v1038_v24  ;;  %v816_v24 = vor.u32 %v1023_v17, %v815_v16  ;;  %v841_v35 = vld [vmem:[%s1455_s0 + $0xb8] sm:$0xf0]  ;;  %v840_v38 = vor.u32 %v1028_v33, %v839_v32  ;;  %v855_v44 = vld [vmem:[%s1455_s0 + $0xc8] sm:$0xf]  ;;  %v1032_v45 = vld [vmem:[%s1455_s0 + $0xd4] sm:$0xf0] }
  0x1b   :  { %516 = vmatpush.bf16.msra.mxu1 %v1046_v25  ;;  %v820_v25 = vor.u32 %v1021_v18, %v817_v19  ;;  %v844_v39 = vor.u32 %v1026_v34, %v841_v35  ;;  %v1030_v46 = vld [vmem:[%s1455_s0 + $0xcc] sm:$0xf]  ;;  %v857_v47 = vld [vmem:[%s1455_s0 + $0xd8] sm:$0xf0]  ;;  %v856_v50 = vor.u32 %v1032_v45, %v855_v44  ;;  %v871_v56 = vld [vmem:[%s1455_s0 + $0xe8] sm:$0xf] }
  0x1c   :  { %565 = vmatpush.bf16.msra.mxu2 %v1054_v26  ;;  %v824_v26 = vor.u32 %v1024_v21, %v823_v20  ;;  %v860_v51 = vor.u32 %v1030_v46, %v857_v47  ;;  %v1036_v57 = vld [vmem:[%s1455_s0 + $0xf4] sm:$0xf0]  ;;  %v1034_v58 = vld [vmem:[%s1455_s0 + $0xec] sm:$0xf]  ;;  %v873_v59 = vld [vmem:[%s1455_s0 + $0xf8] sm:$0xf0] }
  0x1d   :  { %614 = vmatpush.bf16.msra.mxu3 %v1062_v27  ;;  %v828_v27 = vor.u32 %v1022_v22, %v825_v23  ;;  %v872_v62 = vor.u32 %v1036_v57, %v871_v56  ;;  %v876_v63 = vor.u32 %v1034_v58, %v873_v59 }
  0x1e   :  { %468 = vmatpush.bf16.msra.mxu0 %v1037_v28  ;;  %v831_v28 = vld [vmem:[%s1455_s0 + $0xa0] sm:$0xf] }
  0x1f   :  { %517 = vmatpush.bf16.msra.mxu1 %v1045_v29  ;;  %v1027_v29 = vld [vmem:[%s1455_s0 + $0xac] sm:$0xf0] }
  0x20   :  { %566 = vmatpush.bf16.msra.mxu2 %v1053_v30  ;;  %v1025_v30 = vld [vmem:[%s1455_s0 + $0xa4] sm:$0xf]  ;;  %v832_v36 = vor.u32 %v1027_v29, %v831_v28 }
  0x21   :  { %615 = vmatpush.bf16.msra.mxu3 %v1061_v31  ;;  %469 = vmatmul.bf16.vlgmr.msra.gmra.mxu0 %v752_v40  ;;  %v833_v31 = vld [vmem:[%s1455_s0 + $0xb0] sm:$0xf0]  ;;  %v847_v40 = vld [vmem:[%s1455_s0 + $0xc0] sm:$0xf] }
  0x22   :  { %518 = vmatmul.bf16.vlgmr.msra.gmra.mxu1 %v756_v41  ;;  %v836_v37 = vor.u32 %v1025_v30, %v833_v31  ;;  %v1031_v41 = vld [vmem:[%s1455_s0 + $0xcc] sm:$0xf0] }
  0x23   :  { %567 = vmatmul.bf16.vlgmr.msra.gmra.mxu2 %v760_v42  ;;  %v1029_v42 = vld [vmem:[%s1455_s0 + $0xc4] sm:$0xf]  ;;  %v848_v48 = vor.u32 %v1031_v41, %v847_v40 }
  0x24   :  { %616 = vmatmul.bf16.vlgmr.msra.gmra.mxu3 %v764_v43  ;;  %v849_v43 = vld [vmem:[%s1455_s0 + $0xd0] sm:$0xf0] }
  0x25   :  { %v852_v49 = vor.u32 %v1029_v42, %v849_v43 }
  0x31   :  { %474 = vmatmul.bf16.gmra.mxu0 %v768_v52  ;;  %v863_v52 = vld [vmem:[%s1455_s0 + $0xe0] sm:$0xf] }
  0x32   :  { %523 = vmatmul.bf16.gmra.mxu1 %v772_v53  ;;  %v1035_v53 = vld [vmem:[%s1455_s0 + $0xec] sm:$0xf0] }
  0x33   :  { %572 = vmatmul.bf16.gmra.mxu2 %v776_v54  ;;  %v1033_v54 = vld [vmem:[%s1455_s0 + $0xe4] sm:$0xf]  ;;  %v864_v60 = vor.u32 %v1035_v53, %v863_v52 }
  0x34   :  { %621 = vmatmul.bf16.gmra.mxu3 %v780_v55  ;;  %v865_v55 = vld [vmem:[%s1455_s0 + $0xf0] sm:$0xf0] }
  0x35   :  { %v868_v61 = vor.u32 %v1033_v54, %v865_v55 }
  0x41   :  { %479 = vmatmul.bf16.gmra.mxu0 %v784_v0 }
  0x42   :  { %528 = vmatmul.bf16.gmra.mxu1 %v788_v1 }
  0x43   :  { %577 = vmatmul.bf16.gmra.mxu2 %v792_v2 }
  0x44   :  { %626 = vmatmul.bf16.gmra.mxu3 %v796_v3 }
  0x51   :  { %484 = vmatmul.bf16.gmra.mxu0 %v800_v12 }
  0x52   :  { %533 = vmatmul.bf16.gmra.mxu1 %v804_v13 }
  0x53   :  { %582 = vmatmul.bf16.gmra.mxu2 %v808_v14 }
  0x54   :  { %631 = vmatmul.bf16.gmra.mxu3 %v812_v15 }
  0x61   :  { %489 = vmatmul.bf16.gmra.mxu0 %v816_v24 }
  0x62   :  { %538 = vmatmul.bf16.gmra.mxu1 %v820_v25 }
  0x63   :  { %587 = vmatmul.bf16.gmra.mxu2 %v824_v26 }
  0x64   :  { %636 = vmatmul.bf16.gmra.mxu3 %v828_v27 }
  0x71   :  { %494 = vmatmul.bf16.gmra.mxu0 %v832_v36 }
  0x72   :  { %543 = vmatmul.bf16.gmra.mxu1 %v836_v37 }
  0x73   :  { %592 = vmatmul.bf16.gmra.mxu2 %v840_v38 }
  0x74   :  { %641 = vmatmul.bf16.gmra.mxu3 %v844_v39 }
  0x81   :  { %499 = vmatmul.bf16.gmra.mxu0 %v848_v48 }
  0x82   :  { %548 = vmatmul.bf16.gmra.mxu1 %v852_v49 }
  0x83   :  { %597 = vmatmul.bf16.gmra.mxu2 %v856_v50 }
  0x84   :  { %646 = vmatmul.bf16.gmra.mxu3 %v860_v51 }
  0x91   :  { %504 = vmatmul.bf16.gmra.mxu0 %v864_v60 }
  0x92   :  { %553 = vmatmul.bf16.gmra.mxu1 %v868_v61 }
  0x93   :  { %602 = vmatmul.bf16.gmra.mxu2 %v872_v62 }
  0x94   :  { %651 = vmatmul.bf16.gmra.mxu3 %v876_v63 }
  0x9e   :  { %v470_v0 = vpop.f32.mrf.mxu0 }
  0x9f   :  { %v519_v1 = vpop.f32.mrf.mxu1 }
  0xa0   :  { %v520_v2 = vadd.f32 %v519_v1, %v470_v0 }
  0xa6   :  { %v568_v3 = vpop.f32.mrf.mxu2  ;;  %v472_v6 = vpop.f32.mrf.mxu0 }
  0xa7   :  { %v617_v4 = vpop.f32.mrf.mxu3  ;;  %v569_v5 = vadd.f32 %v568_v3, %v520_v2  ;;  %v521_v7 = vpop.f32.mrf.mxu1 }
  0xa8   :  { %v522_v9 = vadd.f32 %v521_v7, %v472_v6 }
  0xa9   :  { %v618_v8 = vadd.f32 %v617_v4, %v569_v5 }
  0xab   :  { %657 = vst [vmem:[%s1456_s2] sm:$0xff] %v618_v8  ;;  %v699_v16 = vmul.f32 %v618_v8, %v618_v8 }
  0xae   :  { %v570_v10 = vpop.f32.mrf.mxu2  ;;  %v475_v13 = vpop.f32.mrf.mxu0 }
  0xaf   :  { %v619_v11 = vpop.f32.mrf.mxu3  ;;  %v571_v12 = vadd.f32 %v570_v10, %v522_v9  ;;  %v524_v14 = vpop.f32.mrf.mxu1 }
  0xb0   :  { %v525_v19 = vadd.f32 %v524_v14, %v475_v13 }
  0xb1   :  { %v620_v15 = vadd.f32 %v619_v11, %v571_v12 }
  0xb3   :  { %658 = vst [vmem:[%s1456_s2 + $0x8] sm:$0xff] %v620_v15  ;;  %v678_v17 = vadd.f32 %v620_v15, %v618_v8  ;;  %v700_v18 = vmul.f32 %v620_v15, %v620_v15 }
  0xb5   :  { %v715_v20 = vadd.f32 %v700_v18, %v699_v16 }
  0xb6   :  { %v573_v21 = vpop.f32.mrf.mxu2  ;;  %v477_v24 = vpop.f32.mrf.mxu0 }
  0xb7   :  { %v622_v22 = vpop.f32.mrf.mxu3  ;;  %v574_v23 = vadd.f32 %v573_v21, %v525_v19  ;;  %v526_v25 = vpop.f32.mrf.mxu1 }
  0xb8   :  { %v527_v30 = vadd.f32 %v526_v25, %v477_v24 }
  0xb9   :  { %v623_v26 = vadd.f32 %v622_v22, %v574_v23 }
  0xbb   :  { %659 = vst [vmem:[%s1456_s2 + $0x10] sm:$0xff] %v623_v26  ;;  %v679_v27 = vadd.f32 %v678_v17, %v623_v26  ;;  %v701_v28 = vmul.f32 %v623_v26, %v623_v26 }
  0xbd   :  { %v716_v29 = vadd.f32 %v715_v20, %v701_v28 }
  0xbe   :  { %v575_v31 = vpop.f32.mrf.mxu2  ;;  %v480_v34 = vpop.f32.mrf.mxu0 }
  0xbf   :  { %v624_v32 = vpop.f32.mrf.mxu3  ;;  %v576_v33 = vadd.f32 %v575_v31, %v527_v30  ;;  %v529_v35 = vpop.f32.mrf.mxu1 }
  0xc0   :  { %v530_v39 = vadd.f32 %v529_v35, %v480_v34 }
  0xc1   :  { %v625_v36 = vadd.f32 %v624_v32, %v576_v33 }
  0xc3   :  { %660 = vst [vmem:[%s1456_s2 + $0x18] sm:$0xff] %v625_v36  ;;  %v680_v37 = vadd.f32 %v679_v27, %v625_v36  ;;  %v702_v38 = vmul.f32 %v625_v36, %v625_v36  ;;  %v1070_v36 = vmov 0.0  }
  0xc4   :  { %677 = vst [vmem:[%s1457_s3] sm:$0x3] %v1070_v36 }
  0xc5   :  { %v717_v40 = vadd.f32 %v716_v29, %v702_v38 }
  0xc6   :  { %v578_v41 = vpop.f32.mrf.mxu2  ;;  %v482_v44 = vpop.f32.mrf.mxu0 }
  0xc7   :  { %v627_v42 = vpop.f32.mrf.mxu3  ;;  %v579_v43 = vadd.f32 %v578_v41, %v530_v39  ;;  %v531_v45 = vpop.f32.mrf.mxu1 }
  0xc8   :  { %v532_v50 = vadd.f32 %v531_v45, %v482_v44 }
  0xc9   :  { %v628_v46 = vadd.f32 %v627_v42, %v579_v43 }
  0xcb   :  { %661 = vst [vmem:[%s1456_s2 + $0x20] sm:$0xff] %v628_v46  ;;  %v1394_v47 = vadd.f32 %v680_v37, %v628_v46  ;;  %v703_v48 = vmul.f32 %v628_v46, %v628_v46 }
  0xcd   :  { %v1396_v49 = vadd.f32 %v717_v40, %v703_v48 }
  0xce   :  { %v580_v51 = vpop.f32.mrf.mxu2  ;;  %v485_v54 = vpop.f32.mrf.mxu0 }
  0xcf   :  { %v629_v52 = vpop.f32.mrf.mxu3  ;;  %v581_v53 = vadd.f32 %v580_v51, %v532_v50  ;;  %v534_v55 = vpop.f32.mrf.mxu1 }
  0xd0   :  { %v535_v57 = vadd.f32 %v534_v55, %v485_v54 }
  0xd1   :  { %v1398_v56 = vadd.f32 %v629_v52, %v581_v53 }
  0xd3   :  { %662 = vst [vmem:[%s1456_s2 + $0x28] sm:$0xff] %v1398_v56  ;;  %v704_v43 = vmul.f32 %v1398_v56, %v1398_v56  ;;  %v682_v48 = vadd.f32 %v1394_v47, %v1398_v56 }
  0xd5   :  { %v719_v54 = vadd.f32 %v1396_v49, %v704_v43  ;;  %v736_v43 = vld [vmem:[%s1457_s3] sm:$0x3] }
  0xd6   :  { %v583_v58 = vpop.f32.mrf.mxu2  ;;  %v487_v61 = vpop.f32.mrf.mxu0 }
  0xd7   :  { %v632_v59 = vpop.f32.mrf.mxu3  ;;  %v584_v60 = vadd.f32 %v583_v58, %v535_v57  ;;  %v536_v62 = vpop.f32.mrf.mxu1 }
  0xd8   :  { %v537_v0 = vadd.f32 %v536_v62, %v487_v61 }
  0xd9   :  { %v1404_v63 = vadd.f32 %v632_v59, %v584_v60 }
  0xdb   :  { %663 = vst [vmem:[%s1456_s2 + $0x30] sm:$0xff] %v1404_v63  ;;  %v705_v50 = vmul.f32 %v1404_v63, %v1404_v63  ;;  %v683_v55 = vadd.f32 %v682_v48, %v1404_v63 }
  0xdd   :  { %v720_v59 = vadd.f32 %v719_v54, %v705_v50 }
  0xde   :  { %v585_v1 = vpop.f32.mrf.mxu2  ;;  %v490_v4 = vpop.f32.mrf.mxu0 }
  0xdf   :  { %v634_v2 = vpop.f32.mrf.mxu3  ;;  %v586_v3 = vadd.f32 %v585_v1, %v537_v0  ;;  %v539_v5 = vpop.f32.mrf.mxu1 }
  0xe0   :  { %v540_v7 = vadd.f32 %v539_v5, %v490_v4 }
  0xe1   :  { %v635_v6 = vadd.f32 %v634_v2, %v586_v3 }
  0xe3   :  { %664 = vst [vmem:[%s1456_s2 + $0x38] sm:$0xff] %v635_v6  ;;  %v706_v57 = vmul.f32 %v635_v6, %v635_v6  ;;  %v684_v60 = vadd.f32 %v683_v55, %v635_v6 }
  0xe5   :  { %v721_v56 = vadd.f32 %v720_v59, %v706_v57 }
  0xe6   :  { %v588_v8 = vpop.f32.mrf.mxu2  ;;  %v492_v11 = vpop.f32.mrf.mxu0 }
  0xe7   :  { %v637_v9 = vpop.f32.mrf.mxu3  ;;  %v589_v10 = vadd.f32 %v588_v8, %v540_v7  ;;  %v541_v12 = vpop.f32.mrf.mxu1 }
  0xe8   :  { %v542_v14 = vadd.f32 %v541_v12, %v492_v11 }
  0xe9   :  { %v638_v13 = vadd.f32 %v637_v9, %v589_v10 }
  0xeb   :  { %665 = vst [vmem:[%s1456_s2 + $0x40] sm:$0xff] %v638_v13  ;;  %v707_v61 = vmul.f32 %v638_v13, %v638_v13  ;;  %v685_v62 = vadd.f32 %v684_v60, %v638_v13 }
  0xed   :  { %v722_v3 = vadd.f32 %v721_v56, %v707_v61 }
  0xee   :  { %v590_v15 = vpop.f32.mrf.mxu2  ;;  %v495_v18 = vpop.f32.mrf.mxu0 }
  0xef   :  { %v639_v16 = vpop.f32.mrf.mxu3  ;;  %v591_v17 = vadd.f32 %v590_v15, %v542_v14  ;;  %v544_v19 = vpop.f32.mrf.mxu1 }
  0xf0   :  { %v545_v21 = vadd.f32 %v544_v19, %v495_v18 }
  0xf1   :  { %v640_v20 = vadd.f32 %v639_v16, %v591_v17 }
  0xf3   :  { %666 = vst [vmem:[%s1456_s2 + $0x48] sm:$0xff] %v640_v20  ;;  %v708_v0 = vmul.f32 %v640_v20, %v640_v20  ;;  %v686_v4 = vadd.f32 %v685_v62, %v640_v20 }
  0xf5   :  { %v723_v63 = vadd.f32 %v722_v3, %v708_v0 }
  0xf6   :  { %v593_v22 = vpop.f32.mrf.mxu2  ;;  %v497_v25 = vpop.f32.mrf.mxu0 }
  0xf7   :  { %v642_v23 = vpop.f32.mrf.mxu3  ;;  %v594_v24 = vadd.f32 %v593_v22, %v545_v21  ;;  %v546_v26 = vpop.f32.mrf.mxu1 }
  0xf8   :  { %v547_v28 = vadd.f32 %v546_v26, %v497_v25 }
  0xf9   :  { %v643_v27 = vadd.f32 %v642_v23, %v594_v24 }
  0xfb   :  { %667 = vst [vmem:[%s1456_s2 + $0x50] sm:$0xff] %v643_v27  ;;  %v709_v49 = vmul.f32 %v643_v27, %v643_v27  ;;  %v687_v7 = vadd.f32 %v686_v4, %v643_v27 }
  0xfd   :  { %v724_v11 = vadd.f32 %v723_v63, %v709_v49 }
  0xfe   :  { %v595_v29 = vpop.f32.mrf.mxu2  ;;  %v500_v32 = vpop.f32.mrf.mxu0 }
  0xff   :  { %v644_v30 = vpop.f32.mrf.mxu3  ;;  %v596_v31 = vadd.f32 %v595_v29, %v547_v28  ;;  %v549_v33 = vpop.f32.mrf.mxu1 }
 0x100   :  { %v550_v35 = vadd.f32 %v549_v33, %v500_v32 }
 0x101   :  { %v645_v34 = vadd.f32 %v644_v30, %v596_v31 }
 0x103   :  { %668 = vst [vmem:[%s1456_s2 + $0x58] sm:$0xff] %v645_v34  ;;  %v710_v8 = vmul.f32 %v645_v34, %v645_v34  ;;  %v688_v12 = vadd.f32 %v687_v7, %v645_v34 }
 0x105   :  { %v725_v13 = vadd.f32 %v724_v11, %v710_v8 }
 0x106   :  { %v598_v37 = vpop.f32.mrf.mxu2  ;;  %v502_v40 = vpop.f32.mrf.mxu0 }
 0x107   :  { %v647_v38 = vpop.f32.mrf.mxu3  ;;  %v599_v39 = vadd.f32 %v598_v37, %v550_v35  ;;  %v551_v41 = vpop.f32.mrf.mxu1 }
 0x108   :  { %v552_v44 = vadd.f32 %v551_v41, %v502_v40 }
 0x109   :  { %v648_v42 = vadd.f32 %v647_v38, %v599_v39 }
 0x10b   :  { %669 = vst [vmem:[%s1456_s2 + $0x60] sm:$0xff] %v648_v42  ;;  %v711_v14 = vmul.f32 %v648_v42, %v648_v42  ;;  %v689_v15 = vadd.f32 %v688_v12, %v648_v42 }
 0x10d   :  { %v726_v19 = vadd.f32 %v725_v13, %v711_v14 }
 0x10e   :  { %v600_v45 = vpop.f32.mrf.mxu2  ;;  %v505_v52 = vpop.f32.mrf.mxu0 }
 0x10f   :  { %v649_v46 = vpop.f32.mrf.mxu3  ;;  %v601_v51 = vadd.f32 %v600_v45, %v552_v44  ;;  %v554_v53 = vpop.f32.mrf.mxu1 }
 0x110   :  { %v555_v47 = vadd.f32 %v554_v53, %v505_v52 }
 0x111   :  { %v650_v58 = vadd.f32 %v649_v46, %v601_v51 }
 0x113   :  { %670 = vst [vmem:[%s1456_s2 + $0x68] sm:$0xff] %v650_v58  ;;  %v712_v16 = vmul.f32 %v650_v58, %v650_v58  ;;  %v690_v20 = vadd.f32 %v689_v15, %v650_v58 }
 0x115   :  { %v727_v24 = vadd.f32 %v726_v19, %v712_v16 }
 0x116   :  { %v603_v1 = vpop.f32.mrf.mxu2  ;;  %v507_v6 = vpop.f32.mrf.mxu0 }
 0x117   :  { %v652_v2 = vpop.f32.mrf.mxu3  ;;  %v604_v5 = vadd.f32 %v603_v1, %v555_v47  ;;  %v556_v10 = vpop.f32.mrf.mxu1 }
 0x118   :  { %v557_v17 = vadd.f32 %v556_v10, %v507_v6 }
 0x119   :  { %v653_v9 = vadd.f32 %v652_v2, %v604_v5 }
 0x11b   :  { %671 = vst [vmem:[%s1456_s2 + $0x70] sm:$0xff] %v653_v9  ;;  %v713_v21 = vmul.f32 %v653_v9, %v653_v9  ;;  %v691_v25 = vadd.f32 %v690_v20, %v653_v9 }
 0x11d   :  { %v728_v27 = vadd.f32 %v727_v24, %v713_v21 }
 0x11e   :  { %v605_v18 = vpop.f32.mrf.mxu2 }
 0x11f   :  { %v606_v22 = vadd.f32 %v605_v18, %v557_v17  ;;  %v654_v23 = vpop.f32.mrf.mxu3 }
 0x121   :  { %v655_v26 = vadd.f32 %v654_v23, %v606_v22 }
 0x123   :  { %672 = vst [vmem:[%s1456_s2 + $0x78] sm:$0xff] %v655_v26  ;;  %v692_v28 = vadd.f32 %v691_v25, %v655_v26  ;;  %v714_v29 = vmul.f32 %v655_v26, %v655_v26 }
 0x125   :  { %v693_v30 = vrot.slane %v692_v28, 4  ;;  %v729_v31 = vadd.f32 %v728_v27, %v714_v29 }
 0x127   :  { %v694_v32 = vadd.f32 %v693_v30, %v692_v28  ;;  %v730_v33 = vrot.slane %v729_v31, 4 }
 0x129   :  { %v695_v34 = vrot.slane %v694_v32, 2  ;;  %v731_v35 = vadd.f32 %v730_v33, %v729_v31 }
 0x12b   :  { %v696_v36 = vadd.f32 %v695_v34, %v694_v32  ;;  %v732_v37 = vrot.slane %v731_v35, 2 }
 0x12d   :  { %v697_v38 = vrot.slane %v696_v36, 1  ;;  %v733_v39 = vadd.f32 %v732_v37, %v731_v35 }
 0x12f   :  { %v734_v40 = vrot.slane %v733_v39, 1  ;;  %v698_v41 = vadd.f32 %v697_v38, %v696_v36 }
 0x131   :  { %v735_v42 = vadd.f32 %v734_v40, %v733_v39 }
 0x133   :  { %v738_v44 = vsel %vm737_vm0, %v698_v41, %v735_v42 }
 0x134   :  { %v739_v45 = vadd.f32 %v738_v44, %v736_v43 }
 0x136   :  { %740 = vst [vmem:[%s1457_s3] sm:$0x3] %v739_v45 }

// kernel: _lambda_.14
= control target key start
LH: loop header
LB: loop body
LE: loop exit
PB: predicated region body
PF: predicated region fallthrough
CT: control target
= control target key end

     0   :  { %s350_s1 = inlined_call_operand.vmem [shape: f32[2,128], index: 1, kind: input, shape index: {}]   ;;  %s351_s3 = inlined_call_operand.vmem [shape: f32[1,128], index: 3, kind: input, shape index: {}]   ;;  %s352_s0 = inlined_call_operand.vmem [shape: f32[104,128], index: 0, kind: input, shape index: {}]   ;;  %s353_s2 = inlined_call_operand.vmem [shape: f32[1,128], index: 2, kind: input, shape index: {}]   ;;  %s354_s4 = inlined_call_operand.vmem [shape: bf16[104,128], index: 4, kind: output, shape index: {}]  }
   0x1   :  { %v30_v0 = vld [vmem:[%s350_s1] sm:$0x1]  ;;  %v32_v2 = vld [vmem:[%s350_s1 + $0x1] sm:$0x1]  ;;  %v18_v15 = vld [vmem:[%s352_s0 + $0x8] sm:$0xff] }
   0x2   :  { %v31_v1 = vmul.f32 0.010204081, %v30_v0  ;;  %v33_v3 = vmul.f32 0.010204081, %v32_v2  ;;  %v17_v12 = vld [vmem:[%s352_s0] sm:$0xff]  ;;  %v19_v18 = vld [vmem:[%s352_s0 + $0x10] sm:$0xff] }
   0x3   :  { %v48_v16 = vld [vmem:[%s353_s2] sm:$0x1]  ;;  %v20_v19 = vld [vmem:[%s352_s0 + $0x18] sm:$0xff]  ;;  %v22_v21 = vld [vmem:[%s352_s0 + $0x28] sm:$0xff] }
   0x4   :  { %v34_v4 = vmul.f32 %v31_v1, %v31_v1  ;;  %v236_v14 = vperm.slane %v31_v1, 0  ;;  %v21_v20 = vld [vmem:[%s352_s0 + $0x20] sm:$0xff]  ;;  %v23_v22 = vld [vmem:[%s352_s0 + $0x30] sm:$0xff]  ;;  %v24_v23 = vld [vmem:[%s352_s0 + $0x38] sm:$0xff] }
   0x5   :  { %v25_v26 = vld [vmem:[%s352_s0 + $0x40] sm:$0xff]  ;;  %v269_v27 = vld [vmem:[%s352_s0 + $0x48] sm:$0xff]  ;;  %v27_v32 = vld [vmem:[%s352_s0 + $0x50] sm:$0xff] }
   0x6   :  { %v35_v5 = vsub.f32 %v33_v3, %v34_v4  ;;  %v51_v25 = vsub.f32 %v17_v12, %v236_v14  ;;  %v52_v29 = vsub.f32 %v18_v15, %v236_v14  ;;  %v53_v30 = vsub.f32 %v19_v18, %v236_v14  ;;  %v28_v33 = vld [vmem:[%s352_s0 + $0x58] sm:$0xff]  ;;  %v283_v34 = vld [vmem:[%s352_s0 + $0x60] sm:$0xff] }
   0x7   :  { %v54_v31 = vsub.f32 %v20_v19, %v236_v14  ;;  %v55_v35 = vsub.f32 %v21_v20, %v236_v14  ;;  %v56_v36 = vsub.f32 %v22_v21, %v236_v14  ;;  %v57_v37 = vsub.f32 %v23_v22, %v236_v14  ;;  %v294_v40 = vld [vmem:[%s351_s3] ss:$0 sm:$0xff] }
   0x8   :  { %v36_v6 = vmax.f32 %v35_v5, 0.0  ;;  %v58_v38 = vsub.f32 %v24_v23, %v236_v14  ;;  %v59_v41 = vsub.f32 %v25_v26, %v236_v14  ;;  %v60_v42 = vsub.f32 %v269_v27, %v236_v14 }
   0x9   :  { %v61_v43 = vsub.f32 %v27_v32, %v236_v14  ;;  %v62_v44 = vsub.f32 %v28_v33, %v236_v14  ;;  %v63_v45 = vsub.f32 %v283_v34, %v236_v14 }
   0xa   :  { %v37_v7 = vadd.f32 1e-05, %v36_v6 }
   0xc   :  { %200 = vrsqrt.f32 %v37_v7  ;;  %vm44_vm0 = vweird.f32 %v37_v7 }
  0x12   :  { %v201_v8 = vpop.eup %200 }
  0x13   :  { %v39_v9 = vmul.f32 %v201_v8, %v37_v7  ;;  %vm45_vm1 = vweird.f32 %v201_v8 }
  0x14   :  { %vm46_vm2 = vmor %vm44_vm0, %vm45_vm1 }
  0x15   :  { %v40_v10 = vmul.f32 %v201_v8, %v39_v9 }
  0x17   :  { %v41_v11 = vmul.f32 0.5, %v40_v10 }
  0x19   :  { %v42_v13 = vsub.f32 1.5, %v41_v11 }
  0x1b   :  { %v43_v17 = vmul.f32 %v201_v8, %v42_v13 }
  0x1d   :  { %v47_v24 = vsel %vm46_vm2, %v201_v8, %v43_v17 }
  0x1e   :  { %v49_v28 = vmul.f32 %v48_v16, %v47_v24 }
  0x20   :  { %v289_v39 = vperm.slane %v49_v28, 0 }
  0x22   :  { %v65_v46 = vmul.f32 %v289_v39, %v51_v25  ;;  %v66_v47 = vmul.f32 %v289_v39, %v52_v29  ;;  %v67_v48 = vmul.f32 %v289_v39, %v53_v30  ;;  %v68_v49 = vmul.f32 %v289_v39, %v54_v31 }
  0x23   :  { %v69_v50 = vmul.f32 %v289_v39, %v55_v35  ;;  %v70_v51 = vmul.f32 %v289_v39, %v56_v36  ;;  %v71_v52 = vmul.f32 %v289_v39, %v57_v37  ;;  %v72_v53 = vmul.f32 %v289_v39, %v58_v38 }
  0x24   :  { %v82_v54 = vadd.f32 %v294_v40, %v65_v46  ;;  %v83_v55 = vadd.f32 %v294_v40, %v66_v47  ;;  %v84_v56 = vadd.f32 %v294_v40, %v67_v48  ;;  %v85_v57 = vadd.f32 %v294_v40, %v68_v49 }
  0x25   :  { %v86_v58 = vadd.f32 %v294_v40, %v69_v50  ;;  %v87_v59 = vadd.f32 %v294_v40, %v70_v51  ;;  %v88_v60 = vadd.f32 %v294_v40, %v71_v52  ;;  %v89_v61 = vadd.f32 %v294_v40, %v72_v53 }
  0x26   :  { %vm95_vm3 = vcmp.ge.f32.partialorder %v82_v54, 0.0  ;;  %vm96_vm4 = vcmp.ge.f32.partialorder %v83_v55, 0.0  ;;  %v108_v62 = vmul.f32 0.2, %v82_v54  ;;  %v109_v63 = vmul.f32 0.2, %v83_v55 }
  0x27   :  { %vm97_vm5 = vcmp.ge.f32.partialorder %v84_v56, 0.0  ;;  %vm98_vm6 = vcmp.ge.f32.partialorder %v85_v57, 0.0  ;;  %v110_v0 = vmul.f32 0.2, %v84_v56  ;;  %v111_v1 = vmul.f32 0.2, %v85_v57 }
  0x28   :  { %v121_v2 = vsel %vm95_vm3, %v82_v54, %v108_v62  ;;  %v122_v3 = vsel %vm96_vm4, %v83_v55, %v109_v63  ;;  %vm99_vm7 = vcmp.ge.f32.partialorder %v86_v58, 0.0  ;;  %vm100_vm8 = vcmp.ge.f32.partialorder %v87_v59, 0.0 }
  0x29   :  { %v167_v4 = vpack.c.bf16 %v122_v3, %v121_v2  ;;  %v123_v5 = vsel %vm97_vm5, %v84_v56, %v110_v0  ;;  %v124_v6 = vsel %vm98_vm6, %v85_v57, %v111_v1  ;;  %v112_v7 = vmul.f32 0.2, %v86_v58 }
  0x2a   :  { %v172_v8 = vpack.c.bf16 %v124_v6, %v123_v5  ;;  %v113_v9 = vmul.f32 0.2, %v87_v59  ;;  %vm101_vm9 = vcmp.ge.f32.partialorder %v88_v60, 0.0  ;;  %vm102_vm10 = vcmp.ge.f32.partialorder %v89_v61, 0.0 }
  0x2b   :  { %168 = vst [vmem:[%s354_s4] sm:$0xff] %v167_v4   ;;  %v125_v10 = vsel %vm99_vm7, %v86_v58, %v112_v7  ;;  %v114_v11 = vmul.f32 0.2, %v88_v60  ;;  %v115_v12 = vmul.f32 0.2, %v89_v61  ;;  %v73_v13 = vmul.f32 %v289_v39, %v59_v41 }
  0x2c   :  { %194 = vst [vmem:[%s354_s4 + $0x8] sm:$0xff] %v172_v8   ;;  %v126_v14 = vsel %vm100_vm8, %v87_v59, %v113_v9  ;;  %v74_v15 = vmul.f32 %v289_v39, %v60_v42  ;;  %v75_v16 = vmul.f32 %v289_v39, %v61_v43  ;;  %v76_v17 = vmul.f32 %v289_v39, %v62_v44 }
  0x2d   :  { %v177_v18 = vpack.c.bf16 %v126_v14, %v125_v10  ;;  %v127_v19 = vsel %vm101_vm9, %v88_v60, %v114_v11  ;;  %v128_v20 = vsel %vm102_vm10, %v89_v61, %v115_v12  ;;  %v90_v21 = vadd.f32 %v294_v40, %v73_v13 }
  0x2e   :  { %v182_v22 = vpack.c.bf16 %v128_v20, %v127_v19  ;;  %v91_v23 = vadd.f32 %v294_v40, %v74_v15  ;;  %v92_v24 = vadd.f32 %v294_v40, %v75_v16  ;;  %v93_v25 = vadd.f32 %v294_v40, %v76_v17 }
  0x2f   :  { %195 = vst [vmem:[%s354_s4 + $0x10] sm:$0xff] %v177_v18   ;;  %vm103_vm11 = vcmp.ge.f32.partialorder %v90_v21, 0.0  ;;  %v116_v26 = vmul.f32 0.2, %v90_v21  ;;  %v77_v27 = vmul.f32 %v289_v39, %v63_v45 }
  0x30   :  { %196 = vst [vmem:[%s354_s4 + $0x18] sm:$0xff] %v182_v22   ;;  %vm104_vm12 = vcmp.ge.f32.partialorder %v91_v23, 0.0  ;;  %v117_v28 = vmul.f32 0.2, %v91_v23  ;;  %vm105_vm13 = vcmp.ge.f32.partialorder %v92_v24, 0.0  ;;  %vm106_vm14 = vcmp.ge.f32.partialorder %v93_v25, 0.0 }
  0x31   :  { %v129_v29 = vsel %vm103_vm11, %v90_v21, %v116_v26  ;;  %v118_v30 = vmul.f32 0.2, %v92_v24  ;;  %v119_v31 = vmul.f32 0.2, %v93_v25  ;;  %v94_v32 = vadd.f32 %v294_v40, %v77_v27 }
  0x32   :  { %v130_v33 = vsel %vm104_vm12, %v91_v23, %v117_v28 }
  0x33   :  { %v187_v34 = vpack.c.bf16 %v130_v33, %v129_v29  ;;  %v131_v35 = vsel %vm105_vm13, %v92_v24, %v118_v30  ;;  %v132_v36 = vsel %vm106_vm14, %v93_v25, %v119_v31  ;;  %vm107_vm15 = vcmp.ge.f32.partialorder %v94_v32, 0.0 }
  0x34   :  { %v192_v37 = vpack.c.bf16 %v132_v36, %v131_v35  ;;  %v120_v38 = vmul.f32 0.2, %v94_v32 }
  0x35   :  { %197 = vst [vmem:[%s354_s4 + $0x20] sm:$0xff] %v187_v34  }
  0x36   :  { %198 = vst [vmem:[%s354_s4 + $0x28] sm:$0xff] %v192_v37   ;;  %v133_v39 = vsel %vm107_vm15, %v94_v32, %v120_v38 }
  0x37   :  { %v146_v41 = vpack.c.bf16 %v133_v39, %v133_v39 }
  0x39   :  { %159 = vst [vmem:[%s354_s4 + $0x30] sm:$0xf] %v146_v41 }

// kernel: _lambda_.13
= control target key start
LH: loop header
LB: loop body
LE: loop exit
PB: predicated region body
PF: predicated region fallthrough
CT: control target
= control target key end

     0   :  { %vm1257_vm0 = vcmask 1040384   ;;  %s2430_s1 = inlined_call_operand.vmem [shape: bf16[1024,128], index: 1, kind: input, shape index: {}]   ;;  %s2431_s0 = inlined_call_operand.vmem [shape: bf16[104,1024], index: 0, kind: input, shape index: {}]   ;;  %s2432_s2 = inlined_call_operand.vmem [shape: f32[104,128], index: 2, kind: output, shape index: {0}]   ;;  %s2433_s3 = inlined_call_operand.vmem [shape: f32[2,128], index: 3, kind: output, shape index: {1}]  }
   0x1   :  { %v1772_v0 = vld [vmem:[%s2430_s1 + $0x38] sm:$0xff]  ;;  %v1771_v4 = vld [vmem:[%s2430_s1 + $0x30] sm:$0xff]  ;;  %v1770_v8 = vld [vmem:[%s2430_s1 + $0x28] sm:$0xff] }
   0x2   :  { %v1780_v1 = vld [vmem:[%s2430_s1 + $0x78] sm:$0xff]  ;;  %845 = vmatpush.bf16.msra.mxu0 %v1772_v0  ;;  %v1779_v5 = vld [vmem:[%s2430_s1 + $0x70] sm:$0xff]  ;;  %v1778_v9 = vld [vmem:[%s2430_s1 + $0x68] sm:$0xff] }
   0x3   :  { %v1788_v2 = vld [vmem:[%s2430_s1 + $0xb8] sm:$0xff]  ;;  %888 = vmatpush.bf16.msra.mxu1 %v1780_v1  ;;  %v1787_v6 = vld [vmem:[%s2430_s1 + $0xb0] sm:$0xff]  ;;  %v1786_v10 = vld [vmem:[%s2430_s1 + $0xa8] sm:$0xff] }
   0x4   :  { %v1796_v3 = vld [vmem:[%s2430_s1 + $0xf8] sm:$0xff]  ;;  %931 = vmatpush.bf16.msra.mxu2 %v1788_v2  ;;  %v1795_v7 = vld [vmem:[%s2430_s1 + $0xf0] sm:$0xff]  ;;  %v1794_v11 = vld [vmem:[%s2430_s1 + $0xe8] sm:$0xff] }
   0x5   :  { %974 = vmatpush.bf16.msra.mxu3 %v1796_v3  ;;  %v1769_v12 = vld [vmem:[%s2430_s1 + $0x20] sm:$0xff]  ;;  %v1768_v16 = vld [vmem:[%s2430_s1 + $0x18] sm:$0xff]  ;;  %v1767_v20 = vld [vmem:[%s2430_s1 + $0x10] sm:$0xff] }
   0x6   :  { %846 = vmatpush.bf16.msra.mxu0 %v1771_v4  ;;  %v1777_v13 = vld [vmem:[%s2430_s1 + $0x60] sm:$0xff]  ;;  %v1776_v17 = vld [vmem:[%s2430_s1 + $0x58] sm:$0xff]  ;;  %v1775_v21 = vld [vmem:[%s2430_s1 + $0x50] sm:$0xff] }
   0x7   :  { %889 = vmatpush.bf16.msra.mxu1 %v1779_v5  ;;  %v1785_v14 = vld [vmem:[%s2430_s1 + $0xa0] sm:$0xff]  ;;  %v1784_v18 = vld [vmem:[%s2430_s1 + $0x98] sm:$0xff]  ;;  %v1783_v22 = vld [vmem:[%s2430_s1 + $0x90] sm:$0xff] }
   0x8   :  { %932 = vmatpush.bf16.msra.mxu2 %v1787_v6  ;;  %v1793_v15 = vld [vmem:[%s2430_s1 + $0xe0] sm:$0xff]  ;;  %v1792_v19 = vld [vmem:[%s2430_s1 + $0xd8] sm:$0xff]  ;;  %v1791_v23 = vld [vmem:[%s2430_s1 + $0xd0] sm:$0xff] }
   0x9   :  { %975 = vmatpush.bf16.msra.mxu3 %v1795_v7  ;;  %v1766_v24 = vld [vmem:[%s2430_s1 + $0x8] sm:$0xff]  ;;  %v1765_v28 = vld [vmem:[%s2430_s1] sm:$0xff]  ;;  %v1820_v40 = vld [vmem:[%s2430_s1 + $0x1b8] sm:$0xff] }
   0xa   :  { %847 = vmatpush.bf16.msra.mxu0 %v1770_v8  ;;  %v1774_v25 = vld [vmem:[%s2430_s1 + $0x48] sm:$0xff]  ;;  %v1773_v29 = vld [vmem:[%s2430_s1 + $0x40] sm:$0xff]  ;;  %v1804_v41 = vld [vmem:[%s2430_s1 + $0x138] sm:$0xff] }
   0xb   :  { %890 = vmatpush.bf16.msra.mxu1 %v1778_v9  ;;  %v1782_v26 = vld [vmem:[%s2430_s1 + $0x88] sm:$0xff]  ;;  %v1781_v30 = vld [vmem:[%s2430_s1 + $0x80] sm:$0xff]  ;;  %v1828_v46 = vld [vmem:[%s2430_s1 + $0x1f8] sm:$0xff] }
   0xc   :  { %933 = vmatpush.bf16.msra.mxu2 %v1786_v10  ;;  %v1790_v27 = vld [vmem:[%s2430_s1 + $0xc8] sm:$0xff]  ;;  %v1789_v31 = vld [vmem:[%s2430_s1 + $0xc0] sm:$0xff]  ;;  %v1812_v47 = vld [vmem:[%s2430_s1 + $0x178] sm:$0xff] }
   0xd   :  { %976 = vmatpush.bf16.msra.mxu3 %v1794_v11  ;;  %v1271_v32 = vld [vmem:[%s2431_s0] sm:$0xf]  ;;  %v1717_v34 = vld [vmem:[%s2431_s0 + $0x4] sm:$0xf]  ;;  %v1279_v36 = vld [vmem:[%s2431_s0 + $0x8] sm:$0xf] }
   0xe   :  { %848 = vmatpush.bf16.msra.mxu0 %v1769_v12  ;;  %v1721_v33 = vld [vmem:[%s2431_s0 + $0x1c] sm:$0xf0]  ;;  %v1273_v35 = vld [vmem:[%s2431_s0 + $0x20] sm:$0xf0]  ;;  %v1722_v37 = vld [vmem:[%s2431_s0 + $0x24] sm:$0xf0] }
   0xf   :  { %891 = vmatpush.bf16.msra.mxu1 %v1777_v13  ;;  %v1718_v38 = vld [vmem:[%s2431_s0 + $0xc] sm:$0xf]  ;;  %v1272_v42 = vor.u32 %v1721_v33, %v1271_v32  ;;  %v1276_v43 = vor.u32 %v1717_v34, %v1273_v35  ;;  %v1280_v44 = vor.u32 %v1722_v37, %v1279_v36  ;;  %v1819_v48 = vld [vmem:[%s2430_s1 + $0x1b0] sm:$0xff]  ;;  %v1303_v56 = vld [vmem:[%s2431_s0 + $0x40] sm:$0xf] }
  0x10   :  { %934 = vmatpush.bf16.msra.mxu2 %v1785_v14  ;;  %v1281_v39 = vld [vmem:[%s2431_s0 + $0x28] sm:$0xf0]  ;;  %v1803_v49 = vld [vmem:[%s2430_s1 + $0x130] sm:$0xff]  ;;  %v1817_v57 = vld [vmem:[%s2430_s1 + $0x1a0] sm:$0xff] }
  0x11   :  { %977 = vmatpush.bf16.msra.mxu3 %v1793_v15  ;;  %v1284_v45 = vor.u32 %v1718_v38, %v1281_v39  ;;  %v1827_v50 = vld [vmem:[%s2430_s1 + $0x1f0] sm:$0xff]  ;;  %v1818_v52 = vld [vmem:[%s2430_s1 + $0x1a8] sm:$0xff]  ;;  %v1801_v58 = vld [vmem:[%s2430_s1 + $0x120] sm:$0xff] }
  0x12   :  { %849 = vmatpush.bf16.msra.mxu0 %v1768_v16  ;;  %v1811_v51 = vld [vmem:[%s2430_s1 + $0x170] sm:$0xff]  ;;  %v1802_v53 = vld [vmem:[%s2430_s1 + $0x128] sm:$0xff]  ;;  %v1729_v59 = vld [vmem:[%s2431_s0 + $0x5c] sm:$0xf0] }
  0x13   :  { %892 = vmatpush.bf16.msra.mxu1 %v1776_v17  ;;  %v1826_v54 = vld [vmem:[%s2430_s1 + $0x1e8] sm:$0xff]  ;;  %v1725_v60 = vld [vmem:[%s2431_s0 + $0x44] sm:$0xf]  ;;  %v1304_v4 = vor.u32 %v1729_v59, %v1303_v56  ;;  %v1816_v8 = vld [vmem:[%s2430_s1 + $0x198] sm:$0xff] }
  0x14   :  { %935 = vmatpush.bf16.msra.mxu2 %v1784_v18  ;;  %v1810_v55 = vld [vmem:[%s2430_s1 + $0x168] sm:$0xff]  ;;  %v1305_v61 = vld [vmem:[%s2431_s0 + $0x60] sm:$0xf0]  ;;  %v1800_v9 = vld [vmem:[%s2430_s1 + $0x118] sm:$0xff] }
  0x15   :  { %978 = vmatpush.bf16.msra.mxu3 %v1792_v19  ;;  %v1311_v62 = vld [vmem:[%s2431_s0 + $0x48] sm:$0xf]  ;;  %v1726_v0 = vld [vmem:[%s2431_s0 + $0x4c] sm:$0xf]  ;;  %v1825_v2 = vld [vmem:[%s2430_s1 + $0x1e0] sm:$0xff]  ;;  %v1308_v5 = vor.u32 %v1725_v60, %v1305_v61 }
  0x16   :  { %850 = vmatpush.bf16.msra.mxu0 %v1767_v20  ;;  %v1730_v63 = vld [vmem:[%s2431_s0 + $0x64] sm:$0xf0]  ;;  %v1313_v1 = vld [vmem:[%s2431_s0 + $0x68] sm:$0xf0]  ;;  %v1809_v3 = vld [vmem:[%s2430_s1 + $0x160] sm:$0xff] }
  0x17   :  { %893 = vmatpush.bf16.msra.mxu1 %v1775_v21  ;;  %v1312_v6 = vor.u32 %v1730_v63, %v1311_v62  ;;  %v1316_v7 = vor.u32 %v1726_v0, %v1313_v1  ;;  %v1824_v10 = vld [vmem:[%s2430_s1 + $0x1d8] sm:$0xff]  ;;  %v1335_v12 = vld [vmem:[%s2431_s0 + $0x80] sm:$0xf]  ;;  %v1733_v14 = vld [vmem:[%s2431_s0 + $0x84] sm:$0xf] }
  0x18   :  { %936 = vmatpush.bf16.msra.mxu2 %v1783_v22  ;;  %v1808_v11 = vld [vmem:[%s2430_s1 + $0x158] sm:$0xff]  ;;  %v1737_v13 = vld [vmem:[%s2431_s0 + $0x9c] sm:$0xf0]  ;;  %v1337_v15 = vld [vmem:[%s2431_s0 + $0xa0] sm:$0xf0] }
  0x19   :  { %979 = vmatpush.bf16.msra.mxu3 %v1791_v23  ;;  %v1343_v16 = vld [vmem:[%s2431_s0 + $0x88] sm:$0xf]  ;;  %v1734_v18 = vld [vmem:[%s2431_s0 + $0x8c] sm:$0xf]  ;;  %v1336_v20 = vor.u32 %v1737_v13, %v1335_v12  ;;  %v1340_v21 = vor.u32 %v1733_v14, %v1337_v15  ;;  %v1813_v56 = vld [vmem:[%s2430_s1 + $0x180] sm:$0xff] }
  0x1a   :  { %851 = vmatpush.bf16.msra.mxu0 %v1766_v24  ;;  %v1738_v17 = vld [vmem:[%s2431_s0 + $0xa4] sm:$0xf0]  ;;  %v1345_v19 = vld [vmem:[%s2431_s0 + $0xa8] sm:$0xf0]  ;;  %v1815_v24 = vld [vmem:[%s2430_s1 + $0x190] sm:$0xff] }
  0x1b   :  { %894 = vmatpush.bf16.msra.mxu1 %v1774_v25  ;;  %v1344_v22 = vor.u32 %v1738_v17, %v1343_v16  ;;  %v1348_v23 = vor.u32 %v1734_v18, %v1345_v19  ;;  %v1799_v25 = vld [vmem:[%s2430_s1 + $0x110] sm:$0xff]  ;;  %v1375_v32 = vld [vmem:[%s2431_s0 + $0xc8] sm:$0xf]  ;;  %v1742_v34 = vld [vmem:[%s2431_s0 + $0xcc] sm:$0xf] }
  0x1c   :  { %937 = vmatpush.bf16.msra.mxu2 %v1782_v26  ;;  %v1823_v26 = vld [vmem:[%s2430_s1 + $0x1d0] sm:$0xff]  ;;  %v1746_v33 = vld [vmem:[%s2431_s0 + $0xe4] sm:$0xf0]  ;;  %v1377_v35 = vld [vmem:[%s2431_s0 + $0xe8] sm:$0xf0] }
  0x1d   :  { %980 = vmatpush.bf16.msra.mxu3 %v1790_v27  ;;  %v1807_v27 = vld [vmem:[%s2430_s1 + $0x150] sm:$0xff]  ;;  %v1376_v38 = vor.u32 %v1746_v33, %v1375_v32  ;;  %v1380_v39 = vor.u32 %v1742_v34, %v1377_v35  ;;  %v1805_v59 = vld [vmem:[%s2430_s1 + $0x140] sm:$0xff]  ;;  %v1439_v0 = vld [vmem:[%s2431_s0 + $0x148] sm:$0xf] }
  0x1e   :  { %852 = vmatpush.bf16.msra.mxu0 %v1765_v28  ;;  %v1367_v28 = vld [vmem:[%s2431_s0 + $0xc0] sm:$0xf]  ;;  %v1757_v62 = vld [vmem:[%s2431_s0 + $0x144] sm:$0xf]  ;;  %v1762_v1 = vld [vmem:[%s2431_s0 + $0x164] sm:$0xf0] }
  0x1f   :  { %895 = vmatpush.bf16.msra.mxu1 %v1773_v29  ;;  %v1745_v29 = vld [vmem:[%s2431_s0 + $0xdc] sm:$0xf0]  ;;  %v1433_v63 = vld [vmem:[%s2431_s0 + $0x160] sm:$0xf0]  ;;  %v1287_v18 = vld [vmem:[%s2431_s0 + $0x10] sm:$0xf] }
  0x20   :  { %938 = vmatpush.bf16.msra.mxu2 %v1781_v30  ;;  %v1741_v30 = vld [vmem:[%s2431_s0 + $0xc4] sm:$0xf]  ;;  %v1368_v36 = vor.u32 %v1745_v29, %v1367_v28  ;;  %v1431_v60 = vld [vmem:[%s2431_s0 + $0x140] sm:$0xf]  ;;  %v1723_v19 = vld [vmem:[%s2431_s0 + $0x2c] sm:$0xf0] }
  0x21   :  { %981 = vmatpush.bf16.msra.mxu3 %v1789_v31  ;;  %853 = vmatmul.bf16.vlgmr.msra.gmra.mxu0 %v1272_v42  ;;  %v1369_v31 = vld [vmem:[%s2431_s0 + $0xe0] sm:$0xf0]  ;;  %v1822_v42 = vld [vmem:[%s2430_s1 + $0x1c8] sm:$0xff]  ;;  %v1761_v61 = vld [vmem:[%s2431_s0 + $0x15c] sm:$0xf0] }
  0x22   :  { %1017 = vmatpush.bf16.msrb.mxu0 %v1804_v41  ;;  %896 = vmatmul.bf16.vlgmr.msra.gmra.mxu1 %v1276_v43  ;;  %v1372_v37 = vor.u32 %v1741_v30, %v1369_v31  ;;  %v1798_v41 = vld [vmem:[%s2430_s1 + $0x108] sm:$0xff]  ;;  %v1319_v30 = vld [vmem:[%s2431_s0 + $0x50] sm:$0xf]  ;;  %v1727_v32 = vld [vmem:[%s2431_s0 + $0x54] sm:$0xf] }
  0x23   :  { %939 = vmatmul.bf16.vlgmr.msra.gmra.mxu2 %v1280_v44  ;;  %1060 = vmatpush.bf16.msrb.mxu1 %v1812_v47  ;;  %v1806_v43 = vld [vmem:[%s2430_s1 + $0x148] sm:$0xff]  ;;  %v1399_v44 = vld [vmem:[%s2431_s0 + $0x100] sm:$0xf]  ;;  %v1401_v47 = vld [vmem:[%s2431_s0 + $0x120] sm:$0xf0] }
  0x24   :  { %1103 = vmatpush.bf16.msrb.mxu2 %v1820_v40  ;;  %982 = vmatmul.bf16.vlgmr.msra.gmra.mxu3 %v1284_v45  ;;  %v1814_v40 = vld [vmem:[%s2430_s1 + $0x188] sm:$0xff]  ;;  %v1753_v45 = vld [vmem:[%s2431_s0 + $0x11c] sm:$0xf0]  ;;  %v1731_v31 = vld [vmem:[%s2431_s0 + $0x6c] sm:$0xf0] }
  0x25   :  { %1146 = vmatpush.bf16.msrb.mxu3 %v1828_v46  ;;  %v1749_v46 = vld [vmem:[%s2431_s0 + $0x104] sm:$0xf]  ;;  %v1321_v33 = vld [vmem:[%s2431_s0 + $0x70] sm:$0xf0]  ;;  %v1327_v34 = vld [vmem:[%s2431_s0 + $0x58] sm:$0xf] }
  0x26   :  { %1018 = vmatpush.bf16.msrb.mxu0 %v1803_v49  ;;  %v1754_v49 = vld [vmem:[%s2431_s0 + $0x124] sm:$0xf0]  ;;  %v1732_v35 = vld [vmem:[%s2431_s0 + $0x74] sm:$0xf0] }
  0x27   :  { %1061 = vmatpush.bf16.msrb.mxu1 %v1811_v51  ;;  %v1409_v51 = vld [vmem:[%s2431_s0 + $0x128] sm:$0xf0] }
  0x28   :  { %1104 = vmatpush.bf16.msrb.mxu2 %v1819_v48  ;;  %v1407_v48 = vld [vmem:[%s2431_s0 + $0x108] sm:$0xf] }
  0x29   :  { %1147 = vmatpush.bf16.msrb.mxu3 %v1827_v50  ;;  %v1750_v50 = vld [vmem:[%s2431_s0 + $0x10c] sm:$0xf] }
  0x2a   :  { %1019 = vmatpush.bf16.msrb.mxu0 %v1802_v53  ;;  %v1404_v53 = vor.u32 %v1749_v46, %v1401_v47 }
  0x2b   :  { %1062 = vmatpush.bf16.msrb.mxu1 %v1810_v55  ;;  %v1412_v55 = vor.u32 %v1750_v50, %v1409_v51 }
  0x2c   :  { %1105 = vmatpush.bf16.msrb.mxu2 %v1818_v52  ;;  %v1400_v52 = vor.u32 %v1753_v45, %v1399_v44 }
  0x2d   :  { %1148 = vmatpush.bf16.msrb.mxu3 %v1826_v54  ;;  %v1408_v54 = vor.u32 %v1754_v49, %v1407_v48 }
  0x2e   :  { %1020 = vmatpush.bf16.msrb.mxu0 %v1801_v58  ;;  %v1821_v58 = vld [vmem:[%s2430_s1 + $0x1c0] sm:$0xff] }
  0x2f   :  { %1063 = vmatpush.bf16.msrb.mxu1 %v1809_v3  ;;  %v1441_v3 = vld [vmem:[%s2431_s0 + $0x168] sm:$0xf0] }
  0x30   :  { %1106 = vmatpush.bf16.msrb.mxu2 %v1817_v57  ;;  %v1797_v57 = vld [vmem:[%s2430_s1 + $0x100] sm:$0xff] }
  0x31   :  { %1149 = vmatpush.bf16.msrb.mxu3 %v1825_v2  ;;  %858 = vmatmul.bf16.gmra.mxu0 %v1304_v4  ;;  %v1758_v2 = vld [vmem:[%s2431_s0 + $0x14c] sm:$0xf]  ;;  %v1432_v4 = vor.u32 %v1761_v61, %v1431_v60 }
  0x32   :  { %901 = vmatmul.bf16.gmra.mxu1 %v1308_v5  ;;  %1021 = vmatpush.bf16.msrb.mxu0 %v1800_v9  ;;  %v1436_v5 = vor.u32 %v1757_v62, %v1433_v63  ;;  %v62_v9 = vld [vmem:[%s2431_s0 + $0x188] sm:$0xff] }
  0x33   :  { %944 = vmatmul.bf16.gmra.mxu2 %v1312_v6  ;;  %1064 = vmatpush.bf16.msrb.mxu1 %v1808_v11  ;;  %v1440_v6 = vor.u32 %v1762_v1, %v1439_v0  ;;  %v343_v12 = vunpack.c.l.b16 %v62_v9  ;;  %v344_v13 = vunpack.c.h.b16 %v62_v9 }
  0x34   :  { %987 = vmatmul.bf16.gmra.mxu3 %v1316_v7  ;;  %1107 = vmatpush.bf16.msrb.mxu2 %v1816_v8  ;;  %v1444_v7 = vor.u32 %v1758_v2, %v1441_v3  ;;  %v61_v8 = vld [vmem:[%s2431_s0 + $0x180] sm:$0xff] }
  0x35   :  { %1150 = vmatpush.bf16.msrb.mxu3 %v1824_v10  ;;  %v341_v10 = vunpack.c.l.b16 %v61_v8  ;;  %v342_v11 = vunpack.c.h.b16 %v61_v8  ;;  %v399_v16 = vpack.c.b16 %v343_v12, %v343_v12  ;;  %v400_v17 = vpack.c.b16 %v344_v13, %v344_v13 }
  0x36   :  { %1022 = vmatpush.bf16.msrb.mxu0 %v1799_v25  ;;  %v1297_v25 = vld [vmem:[%s2431_s0 + $0x38] sm:$0xf0] }
  0x37   :  { %1065 = vmatpush.bf16.msrb.mxu1 %v1807_v27  ;;  %v397_v14 = vpack.c.b16 %v341_v10, %v341_v10  ;;  %v398_v15 = vpack.c.b16 %v342_v11, %v342_v11 }
  0x38   :  { %1108 = vmatpush.bf16.msrb.mxu2 %v1815_v24  ;;  %v1720_v24 = vld [vmem:[%s2431_s0 + $0x1c] sm:$0xf] }
  0x39   :  { %1151 = vmatpush.bf16.msrb.mxu3 %v1823_v26  ;;  %v1288_v26 = vor.u32 %v1723_v19, %v1287_v18  ;;  %v1300_v29 = vor.u32 %v1720_v24, %v1297_v25  ;;  %v1391_v18 = vld [vmem:[%s2431_s0 + $0xd8] sm:$0xf] }
  0x3a   :  { %1023 = vmatpush.bf16.msrb.mxu0 %v1798_v41  ;;  %v1748_v19 = vld [vmem:[%s2431_s0 + $0xf4] sm:$0xf0] }
  0x3b   :  { %1066 = vmatpush.bf16.msrb.mxu1 %v1806_v43 }
  0x3c   :  { %1109 = vmatpush.bf16.msrb.mxu2 %v1814_v40 }
  0x3d   :  { %1152 = vmatpush.bf16.msrb.mxu3 %v1822_v42  ;;  %v1328_v42 = vor.u32 %v1732_v35, %v1327_v34 }
  0x3e   :  { %1024 = vmatpush.bf16.msrb.mxu0 %v1797_v57  ;;  %v1740_v57 = vld [vmem:[%s2431_s0 + $0xb4] sm:$0xf0] }
  0x3f   :  { %1067 = vmatpush.bf16.msrb.mxu1 %v1805_v59  ;;  %v1361_v59 = vld [vmem:[%s2431_s0 + $0xb8] sm:$0xf0] }
  0x40   :  { %1110 = vmatpush.bf16.msrb.mxu2 %v1813_v56  ;;  %v1359_v56 = vld [vmem:[%s2431_s0 + $0x98] sm:$0xf] }
  0x41   :  { %863 = vmatmul.bf16.gmra.mxu0 %v1336_v20  ;;  %1153 = vmatpush.bf16.msrb.mxu3 %v1821_v58  ;;  %v1719_v20 = vld [vmem:[%s2431_s0 + $0x14] sm:$0xf]  ;;  %v1736_v58 = vld [vmem:[%s2431_s0 + $0x9c] sm:$0xf]  ;;  %v1360_v3 = vor.u32 %v1740_v57, %v1359_v56 }
  0x42   :  { %906 = vmatmul.bf16.gmra.mxu1 %v1340_v21  ;;  %v1289_v21 = vld [vmem:[%s2431_s0 + $0x30] sm:$0xf0] }
  0x43   :  { %949 = vmatmul.bf16.gmra.mxu2 %v1344_v22  ;;  %v1295_v22 = vld [vmem:[%s2431_s0 + $0x18] sm:$0xf]  ;;  %v1292_v27 = vor.u32 %v1719_v20, %v1289_v21  ;;  %v1744_v20 = vld [vmem:[%s2431_s0 + $0xdc] sm:$0xf] }
  0x44   :  { %992 = vmatmul.bf16.gmra.mxu3 %v1348_v23  ;;  %v1724_v23 = vld [vmem:[%s2431_s0 + $0x34] sm:$0xf0]  ;;  %v1393_v21 = vld [vmem:[%s2431_s0 + $0xf8] sm:$0xf0] }
  0x45   :  { %v1296_v28 = vor.u32 %v1724_v23, %v1295_v22 }
  0x51   :  { %868 = vmatmul.bf16.gmra.mxu0 %v1368_v36  ;;  %v1728_v36 = vld [vmem:[%s2431_s0 + $0x5c] sm:$0xf] }
  0x52   :  { %911 = vmatmul.bf16.gmra.mxu1 %v1372_v37  ;;  %v1329_v37 = vld [vmem:[%s2431_s0 + $0x78] sm:$0xf0] }
  0x53   :  { %954 = vmatmul.bf16.gmra.mxu2 %v1376_v38  ;;  %v1320_v38 = vor.u32 %v1731_v31, %v1319_v30  ;;  %v1332_v43 = vor.u32 %v1728_v36, %v1329_v37  ;;  %v1396_v30 = vor.u32 %v1744_v20, %v1393_v21 }
  0x54   :  { %997 = vmatmul.bf16.gmra.mxu3 %v1380_v39  ;;  %v1324_v39 = vor.u32 %v1727_v32, %v1321_v33 }
  0x61   :  { %873 = vmatmul.bf16.gmra.mxu0 %v1400_v52  ;;  %v1351_v52 = vld [vmem:[%s2431_s0 + $0x90] sm:$0xf] }
  0x62   :  { %916 = vmatmul.bf16.gmra.mxu1 %v1404_v53  ;;  %v1739_v53 = vld [vmem:[%s2431_s0 + $0xac] sm:$0xf0] }
  0x63   :  { %959 = vmatmul.bf16.gmra.mxu2 %v1408_v54  ;;  %v1735_v54 = vld [vmem:[%s2431_s0 + $0x94] sm:$0xf]  ;;  %v1352_v62 = vor.u32 %v1739_v53, %v1351_v52 }
  0x64   :  { %1002 = vmatmul.bf16.gmra.mxu3 %v1412_v55  ;;  %v1353_v55 = vld [vmem:[%s2431_s0 + $0xb0] sm:$0xf0] }
  0x65   :  { %v1356_v63 = vor.u32 %v1735_v54, %v1353_v55 }
  0x71   :  { %878 = vmatmul.bf16.gmra.mxu0 %v1432_v4  ;;  %v1364_v4 = vor.u32 %v1736_v58, %v1361_v59 }
  0x72   :  { %921 = vmatmul.bf16.gmra.mxu1 %v1436_v5 }
  0x73   :  { %964 = vmatmul.bf16.gmra.mxu2 %v1440_v6 }
  0x74   :  { %1007 = vmatmul.bf16.gmra.mxu3 %v1444_v7 }
  0x81   :  { %883 = vmatmul.bf16.gmra.mxu0 %v397_v14  ;;  %v1383_v14 = vld [vmem:[%s2431_s0 + $0xd0] sm:$0xf] }
  0x82   :  { %926 = vmatmul.bf16.gmra.mxu1 %v398_v15  ;;  %v1747_v15 = vld [vmem:[%s2431_s0 + $0xec] sm:$0xf0] }
  0x83   :  { %969 = vmatmul.bf16.gmra.mxu2 %v399_v16  ;;  %v1743_v16 = vld [vmem:[%s2431_s0 + $0xd4] sm:$0xf]  ;;  %v1384_v24 = vor.u32 %v1747_v15, %v1383_v14 }
  0x84   :  { %1012 = vmatmul.bf16.gmra.mxu3 %v400_v17  ;;  %v1385_v17 = vld [vmem:[%s2431_s0 + $0xf0] sm:$0xf0] }
  0x85   :  { %v1388_v25 = vor.u32 %v1743_v16, %v1385_v17 }
  0x91   :  { %1025 = vmatmul.bf16.vlgmr.msrb.gmra.mxu0 %v1288_v26 }
  0x92   :  { %1068 = vmatmul.bf16.vlgmr.msrb.gmra.mxu1 %v1292_v27 }
  0x93   :  { %1111 = vmatmul.bf16.vlgmr.msrb.gmra.mxu2 %v1296_v28 }
  0x94   :  { %1154 = vmatmul.bf16.vlgmr.msrb.gmra.mxu3 %v1300_v29  ;;  %v1392_v29 = vor.u32 %v1748_v19, %v1391_v18 }
  0x9e   :  { %v854_v40 = vpop.f32.mrf.mxu0 }
  0x9f   :  { %v897_v41 = vpop.f32.mrf.mxu1 }
  0xa0   :  { %v898_v44 = vadd.f32 %v897_v41, %v854_v40  ;;  %v1415_v40 = vld [vmem:[%s2431_s0 + $0x110] sm:$0xf] }
  0xa1   :  { %1030 = vmatmul.bf16.gmra.mxu0 %v1320_v38  ;;  %v1755_v41 = vld [vmem:[%s2431_s0 + $0x12c] sm:$0xf0] }
  0xa2   :  { %1073 = vmatmul.bf16.gmra.mxu1 %v1324_v39 }
  0xa3   :  { %1116 = vmatmul.bf16.gmra.mxu2 %v1328_v42  ;;  %v1751_v42 = vld [vmem:[%s2431_s0 + $0x114] sm:$0xf] }
  0xa4   :  { %1159 = vmatmul.bf16.gmra.mxu3 %v1332_v43  ;;  %v1417_v43 = vld [vmem:[%s2431_s0 + $0x130] sm:$0xf0] }
  0xa5   :  { %v1420_v52 = vor.u32 %v1751_v42, %v1417_v43 }
  0xa6   :  { %v940_v45 = vpop.f32.mrf.mxu2  ;;  %v856_v48 = vpop.f32.mrf.mxu0 }
  0xa7   :  { %v983_v46 = vpop.f32.mrf.mxu3  ;;  %v941_v47 = vadd.f32 %v940_v45, %v898_v44  ;;  %v899_v49 = vpop.f32.mrf.mxu1  ;;  %v1423_v44 = vld [vmem:[%s2431_s0 + $0x118] sm:$0xf] }
  0xa8   :  { %v900_v50 = vadd.f32 %v899_v49, %v856_v48  ;;  %v1756_v45 = vld [vmem:[%s2431_s0 + $0x134] sm:$0xf0] }
  0xa9   :  { %v2241_v51 = vadd.f32 %v983_v46, %v941_v47  ;;  %v1752_v46 = vld [vmem:[%s2431_s0 + $0x11c] sm:$0xf]  ;;  %v1424_v56 = vor.u32 %v1756_v45, %v1423_v44 }
  0xaa   :  { %v1425_v47 = vld [vmem:[%s2431_s0 + $0x138] sm:$0xf0] }
  0xab   :  { %v1428_v57 = vor.u32 %v1752_v46, %v1425_v47 }
  0xae   :  { %v942_v60 = vpop.f32.mrf.mxu2  ;;  %v859_v1 = vpop.f32.mrf.mxu0 }
  0xaf   :  { %v985_v61 = vpop.f32.mrf.mxu3  ;;  %v943_v0 = vadd.f32 %v942_v60, %v900_v50  ;;  %v902_v2 = vpop.f32.mrf.mxu1  ;;  %v1416_v50 = vor.u32 %v1755_v41, %v1415_v40 }
  0xb0   :  { %v903_v5 = vadd.f32 %v902_v2, %v859_v1 }
  0xb1   :  { %v2267_v6 = vadd.f32 %v985_v61, %v943_v0  ;;  %1035 = vmatmul.bf16.gmra.mxu0 %v1352_v62 }
  0xb2   :  { %1078 = vmatmul.bf16.gmra.mxu1 %v1356_v63 }
  0xb3   :  { %1121 = vmatmul.bf16.gmra.mxu2 %v1360_v3  ;;  %v1447_v3 = vld [vmem:[%s2431_s0 + $0x150] sm:$0xf] }
  0xb4   :  { %1164 = vmatmul.bf16.gmra.mxu3 %v1364_v4  ;;  %v1763_v4 = vld [vmem:[%s2431_s0 + $0x16c] sm:$0xf0] }
  0xb5   :  { %v1448_v15 = vor.u32 %v1763_v4, %v1447_v3 }
  0xb6   :  { %v945_v7 = vpop.f32.mrf.mxu2  ;;  %v861_v10 = vpop.f32.mrf.mxu0 }
  0xb7   :  { %v988_v8 = vpop.f32.mrf.mxu3  ;;  %v946_v9 = vadd.f32 %v945_v7, %v903_v5  ;;  %v904_v11 = vpop.f32.mrf.mxu1  ;;  %v1759_v5 = vld [vmem:[%s2431_s0 + $0x154] sm:$0xf] }
  0xb8   :  { %v905_v12 = vadd.f32 %v904_v11, %v861_v10  ;;  %v1449_v7 = vld [vmem:[%s2431_s0 + $0x170] sm:$0xf0]  ;;  %v1760_v10 = vld [vmem:[%s2431_s0 + $0x15c] sm:$0xf] }
  0xb9   :  { %v2269_v13 = vadd.f32 %v988_v8, %v946_v9  ;;  %v1455_v8 = vld [vmem:[%s2431_s0 + $0x158] sm:$0xf]  ;;  %v1457_v11 = vld [vmem:[%s2431_s0 + $0x178] sm:$0xf0]  ;;  %v1452_v16 = vor.u32 %v1759_v5, %v1449_v7 }
  0xba   :  { %v1764_v9 = vld [vmem:[%s2431_s0 + $0x174] sm:$0xf0]  ;;  %v1460_v21 = vor.u32 %v1760_v10, %v1457_v11 }
  0xbb   :  { %v1456_v20 = vor.u32 %v1764_v9, %v1455_v8 }
  0xbe   :  { %v947_v22 = vpop.f32.mrf.mxu2  ;;  %v864_v27 = vpop.f32.mrf.mxu0 }
  0xbf   :  { %v990_v23 = vpop.f32.mrf.mxu3  ;;  %v948_v26 = vadd.f32 %v947_v22, %v905_v12  ;;  %v907_v28 = vpop.f32.mrf.mxu1 }
  0xc0   :  { %v908_v31 = vadd.f32 %v907_v28, %v864_v27 }
  0xc1   :  { %v2295_v32 = vadd.f32 %v990_v23, %v948_v26  ;;  %1040 = vmatmul.bf16.gmra.mxu0 %v1384_v24 }
  0xc2   :  { %1083 = vmatmul.bf16.gmra.mxu1 %v1388_v25 }
  0xc3   :  { %1126 = vmatmul.bf16.gmra.mxu2 %v1392_v29  ;;  %v63_v29 = vld [vmem:[%s2431_s0 + $0x190] sm:$0xff] }
  0xc4   :  { %1169 = vmatmul.bf16.gmra.mxu3 %v1396_v30 }
  0xc6   :  { %v950_v33 = vpop.f32.mrf.mxu2  ;;  %v866_v36 = vpop.f32.mrf.mxu0 }
  0xc7   :  { %v993_v34 = vpop.f32.mrf.mxu3  ;;  %v951_v35 = vadd.f32 %v950_v33, %v908_v31  ;;  %v909_v37 = vpop.f32.mrf.mxu1  ;;  %v64_v31 = vld [vmem:[%s2431_s0 + $0x198] sm:$0xff] }
  0xc8   :  { %v910_v38 = vadd.f32 %v909_v37, %v866_v36  ;;  %v347_v36 = vunpack.c.l.b16 %v64_v31  ;;  %v348_v37 = vunpack.c.h.b16 %v64_v31 }
  0xc9   :  { %v2297_v39 = vadd.f32 %v993_v34, %v951_v35  ;;  %v345_v34 = vunpack.c.l.b16 %v63_v29  ;;  %v346_v35 = vunpack.c.h.b16 %v63_v29 }
  0xca   :  { %v403_v46 = vpack.c.b16 %v347_v36, %v347_v36  ;;  %v404_v47 = vpack.c.b16 %v348_v37, %v348_v37 }
  0xcb   :  { %v401_v41 = vpack.c.b16 %v345_v34, %v345_v34  ;;  %v402_v42 = vpack.c.b16 %v346_v35, %v346_v35 }
  0xce   :  { %v952_v48 = vpop.f32.mrf.mxu2  ;;  %v869_v54 = vpop.f32.mrf.mxu0 }
  0xcf   :  { %v995_v49 = vpop.f32.mrf.mxu3  ;;  %v953_v53 = vadd.f32 %v952_v48, %v910_v38  ;;  %v912_v55 = vpop.f32.mrf.mxu1 }
  0xd0   :  { %v913_v58 = vadd.f32 %v912_v55, %v869_v54 }
  0xd1   :  { %v2323_v59 = vadd.f32 %v995_v49, %v953_v53  ;;  %1045 = vmatmul.bf16.gmra.mxu0 %v1416_v50 }
  0xd2   :  { %1088 = vmatmul.bf16.gmra.mxu1 %v1420_v52 }
  0xd3   :  { %1131 = vmatmul.bf16.gmra.mxu2 %v1424_v56 }
  0xd4   :  { %1174 = vmatmul.bf16.gmra.mxu3 %v1428_v57 }
  0xd6   :  { %v955_v60 = vpop.f32.mrf.mxu2  ;;  %v871_v63 = vpop.f32.mrf.mxu0 }
  0xd7   :  { %v998_v61 = vpop.f32.mrf.mxu3  ;;  %v956_v62 = vadd.f32 %v955_v60, %v913_v58  ;;  %v914_v0 = vpop.f32.mrf.mxu1 }
  0xd8   :  { %v915_v1 = vadd.f32 %v914_v0, %v871_v63 }
  0xd9   :  { %v2325_v2 = vadd.f32 %v998_v61, %v956_v62 }
  0xde   :  { %v957_v12 = vpop.f32.mrf.mxu2  ;;  %v874_v18 = vpop.f32.mrf.mxu0 }
  0xdf   :  { %v1000_v14 = vpop.f32.mrf.mxu3  ;;  %v958_v17 = vadd.f32 %v957_v12, %v915_v1  ;;  %v917_v19 = vpop.f32.mrf.mxu1 }
  0xe0   :  { %v918_v22 = vadd.f32 %v917_v19, %v874_v18 }
  0xe1   :  { %v2351_v23 = vadd.f32 %v1000_v14, %v958_v17  ;;  %1050 = vmatmul.bf16.gmra.mxu0 %v1448_v15 }
  0xe2   :  { %1093 = vmatmul.bf16.gmra.mxu1 %v1452_v16 }
  0xe3   :  { %1136 = vmatmul.bf16.gmra.mxu2 %v1456_v20 }
  0xe4   :  { %1179 = vmatmul.bf16.gmra.mxu3 %v1460_v21 }
  0xe6   :  { %v960_v24 = vpop.f32.mrf.mxu2  ;;  %v876_v27 = vpop.f32.mrf.mxu0 }
  0xe7   :  { %v1003_v25 = vpop.f32.mrf.mxu3  ;;  %v961_v26 = vadd.f32 %v960_v24, %v918_v22  ;;  %v919_v28 = vpop.f32.mrf.mxu1 }
  0xe8   :  { %v920_v30 = vadd.f32 %v919_v28, %v876_v27 }
  0xe9   :  { %v2359_v33 = vadd.f32 %v1003_v25, %v961_v26 }
  0xee   :  { %v962_v38 = vpop.f32.mrf.mxu2  ;;  %v879_v44 = vpop.f32.mrf.mxu0 }
  0xef   :  { %v1005_v40 = vpop.f32.mrf.mxu3  ;;  %v963_v43 = vadd.f32 %v962_v38, %v920_v30  ;;  %v922_v45 = vpop.f32.mrf.mxu1 }
  0xf0   :  { %v923_v48 = vadd.f32 %v922_v45, %v879_v44 }
  0xf1   :  { %v2361_v49 = vadd.f32 %v1005_v40, %v963_v43  ;;  %1055 = vmatmul.bf16.gmra.mxu0 %v401_v41 }
  0xf2   :  { %1098 = vmatmul.bf16.gmra.mxu1 %v402_v42 }
  0xf3   :  { %1141 = vmatmul.bf16.gmra.mxu2 %v403_v46 }
  0xf4   :  { %1184 = vmatmul.bf16.gmra.mxu3 %v404_v47 }
  0xf6   :  { %v965_v50 = vpop.f32.mrf.mxu2  ;;  %v881_v54 = vpop.f32.mrf.mxu0 }
  0xf7   :  { %v1008_v52 = vpop.f32.mrf.mxu3  ;;  %v966_v53 = vadd.f32 %v965_v50, %v923_v48  ;;  %v924_v55 = vpop.f32.mrf.mxu1 }
  0xf8   :  { %v925_v56 = vadd.f32 %v924_v55, %v881_v54 }
  0xf9   :  { %v2363_v57 = vadd.f32 %v1008_v52, %v966_v53 }
  0xfe   :  { %v967_v58 = vpop.f32.mrf.mxu2  ;;  %v884_v62 = vpop.f32.mrf.mxu0 }
  0xff   :  { %v1010_v60 = vpop.f32.mrf.mxu3  ;;  %v968_v61 = vadd.f32 %v967_v58, %v925_v56  ;;  %v927_v63 = vpop.f32.mrf.mxu1 }
 0x100   :  { %v928_v0 = vadd.f32 %v927_v63, %v884_v62 }
 0x101   :  { %v2365_v1 = vadd.f32 %v1010_v60, %v968_v61 }
 0x106   :  { %v970_v3 = vpop.f32.mrf.mxu2  ;;  %v886_v7 = vpop.f32.mrf.mxu0 }
 0x107   :  { %v1013_v4 = vpop.f32.mrf.mxu3  ;;  %v971_v5 = vadd.f32 %v970_v3, %v928_v0  ;;  %v929_v8 = vpop.f32.mrf.mxu1 }
 0x109   :  { %v2367_v9 = vadd.f32 %v1013_v4, %v971_v5 }
 0x10e   :  { %v972_v10 = vpop.f32.mrf.mxu2  ;;  %v1026_v12 = vpop.f32.mrf.mxu0 }
 0x10f   :  { %v1015_v11 = vpop.f32.mrf.mxu3  ;;  %v1069_v14 = vpop.f32.mrf.mxu1  ;;  %v1027_v15 = vadd.f32 %v1026_v12, %v2241_v51 }
 0x111   :  { %v1070_v16 = vadd.f32 %v1069_v14, %v1027_v15 }
 0x116   :  { %v1112_v17 = vpop.f32.mrf.mxu2  ;;  %v1028_v20 = vpop.f32.mrf.mxu0 }
 0x117   :  { %v1155_v18 = vpop.f32.mrf.mxu3  ;;  %v1113_v19 = vadd.f32 %v1112_v17, %v1070_v16  ;;  %v1071_v21 = vpop.f32.mrf.mxu1  ;;  %v1029_v24 = vadd.f32 %v1028_v20, %v2267_v6 }
 0x119   :  { %v1156_v22 = vadd.f32 %v1155_v18, %v1113_v19  ;;  %v1072_v25 = vadd.f32 %v1071_v21, %v1029_v24 }
 0x11b   :  { %1189 = vst [vmem:[%s2432_s2] sm:$0xff] %v1156_v22  ;;  %v1225_v34 = vmul.f32 %v1156_v22, %v1156_v22 }
 0x11e   :  { %v1114_v26 = vpop.f32.mrf.mxu2  ;;  %v1031_v29 = vpop.f32.mrf.mxu0 }
 0x11f   :  { %v1157_v27 = vpop.f32.mrf.mxu3  ;;  %v1115_v28 = vadd.f32 %v1114_v26, %v1072_v25  ;;  %v1074_v30 = vpop.f32.mrf.mxu1  ;;  %v1032_v31 = vadd.f32 %v1031_v29, %v2269_v13 }
 0x121   :  { %v1158_v51 = vadd.f32 %v1157_v27, %v1115_v28  ;;  %v1075_v37 = vadd.f32 %v1074_v30, %v1032_v31 }
 0x123   :  { %1190 = vst [vmem:[%s2432_s2 + $0x8] sm:$0xff] %v1158_v51  ;;  %v1207_v35 = vadd.f32 %v1158_v51, %v1156_v22  ;;  %v1226_v6 = vmul.f32 %v1158_v51, %v1158_v51 }
 0x125   :  { %v1238_v36 = vadd.f32 %v1226_v6, %v1225_v34 }
 0x126   :  { %v1117_v38 = vpop.f32.mrf.mxu2  ;;  %v1033_v42 = vpop.f32.mrf.mxu0 }
 0x127   :  { %v1160_v40 = vpop.f32.mrf.mxu3  ;;  %v1118_v41 = vadd.f32 %v1117_v38, %v1075_v37  ;;  %v1076_v43 = vpop.f32.mrf.mxu1  ;;  %v1034_v45 = vadd.f32 %v1033_v42, %v2295_v32 }
 0x129   :  { %v1161_v44 = vadd.f32 %v1160_v40, %v1118_v41  ;;  %v1077_v48 = vadd.f32 %v1076_v43, %v1034_v45 }
 0x12b   :  { %1191 = vst [vmem:[%s2432_s2 + $0x10] sm:$0xff] %v1161_v44  ;;  %v1208_v13 = vadd.f32 %v1207_v35, %v1161_v44  ;;  %v1227_v46 = vmul.f32 %v1161_v44, %v1161_v44 }
 0x12d   :  { %v1239_v47 = vadd.f32 %v1238_v36, %v1227_v46 }
 0x12e   :  { %v1119_v50 = vpop.f32.mrf.mxu2  ;;  %v1036_v54 = vpop.f32.mrf.mxu0 }
 0x12f   :  { %v1162_v52 = vpop.f32.mrf.mxu3  ;;  %v1120_v53 = vadd.f32 %v1119_v50, %v1077_v48  ;;  %v1079_v55 = vpop.f32.mrf.mxu1  ;;  %v1037_v58 = vadd.f32 %v1036_v54, %v2297_v39 }
 0x131   :  { %v1163_v56 = vadd.f32 %v1162_v52, %v1120_v53  ;;  %v1080_v62 = vadd.f32 %v1079_v55, %v1037_v58  ;;  %v1830_v55 = vmov 0.0  }
 0x132   :  { %1206 = vst [vmem:[%s2433_s3] sm:$0x3] %v1830_v55 }
 0x133   :  { %1192 = vst [vmem:[%s2432_s2 + $0x18] sm:$0xff] %v1163_v56  ;;  %v1209_v32 = vadd.f32 %v1208_v13, %v1163_v56  ;;  %v1228_v60 = vmul.f32 %v1163_v56, %v1163_v56 }
 0x135   :  { %v1240_v61 = vadd.f32 %v1239_v47, %v1228_v60 }
 0x136   :  { %v1122_v63 = vpop.f32.mrf.mxu2  ;;  %v1038_v4 = vpop.f32.mrf.mxu0 }
 0x137   :  { %v1165_v0 = vpop.f32.mrf.mxu3  ;;  %v1123_v3 = vadd.f32 %v1122_v63, %v1080_v62  ;;  %v1081_v5 = vpop.f32.mrf.mxu1  ;;  %v1039_v8 = vadd.f32 %v1038_v4, %v2323_v59 }
 0x139   :  { %v1166_v7 = vadd.f32 %v1165_v0, %v1123_v3  ;;  %v1082_v12 = vadd.f32 %v1081_v5, %v1039_v8 }
 0x13b   :  { %1193 = vst [vmem:[%s2432_s2 + $0x20] sm:$0xff] %v1166_v7  ;;  %v1210_v39 = vadd.f32 %v1209_v32, %v1166_v7  ;;  %v1229_v10 = vmul.f32 %v1166_v7, %v1166_v7 }
 0x13d   :  { %v1241_v11 = vadd.f32 %v1240_v61, %v1229_v10 }
 0x13e   :  { %v1124_v14 = vpop.f32.mrf.mxu2  ;;  %v1041_v17 = vpop.f32.mrf.mxu0 }
 0x13f   :  { %v1167_v15 = vpop.f32.mrf.mxu3  ;;  %v1125_v16 = vadd.f32 %v1124_v14, %v1082_v12  ;;  %v1084_v18 = vpop.f32.mrf.mxu1  ;;  %v1042_v20 = vadd.f32 %v1041_v17, %v2325_v2 }
 0x141   :  { %v1168_v19 = vadd.f32 %v1167_v15, %v1125_v16  ;;  %v1085_v24 = vadd.f32 %v1084_v18, %v1042_v20 }
 0x143   :  { %1194 = vst [vmem:[%s2432_s2 + $0x28] sm:$0xff] %v1168_v19  ;;  %v1211_v59 = vadd.f32 %v1210_v39, %v1168_v19  ;;  %v1230_v21 = vmul.f32 %v1168_v19, %v1168_v19 }
 0x145   :  { %v1242_v22 = vadd.f32 %v1241_v11, %v1230_v21 }
 0x146   :  { %v1127_v25 = vpop.f32.mrf.mxu2  ;;  %v1043_v28 = vpop.f32.mrf.mxu0 }
 0x147   :  { %v1170_v26 = vpop.f32.mrf.mxu3  ;;  %v1128_v27 = vadd.f32 %v1127_v25, %v1085_v24  ;;  %v1086_v29 = vpop.f32.mrf.mxu1  ;;  %v1044_v51 = vadd.f32 %v1043_v28, %v2351_v23 }
 0x149   :  { %v1171_v30 = vadd.f32 %v1170_v26, %v1128_v27  ;;  %v1087_v35 = vadd.f32 %v1086_v29, %v1044_v51 }
 0x14b   :  { %1195 = vst [vmem:[%s2432_s2 + $0x30] sm:$0xff] %v1171_v30  ;;  %v1212_v2 = vadd.f32 %v1211_v59, %v1171_v30  ;;  %v1231_v31 = vmul.f32 %v1171_v30, %v1171_v30 }
 0x14d   :  { %v1243_v34 = vadd.f32 %v1242_v22, %v1231_v31 }
 0x14e   :  { %v1129_v6 = vpop.f32.mrf.mxu2  ;;  %v1046_v38 = vpop.f32.mrf.mxu0 }
 0x14f   :  { %v1172_v36 = vpop.f32.mrf.mxu3  ;;  %v1130_v37 = vadd.f32 %v1129_v6, %v1087_v35  ;;  %v1089_v40 = vpop.f32.mrf.mxu1  ;;  %v1047_v42 = vadd.f32 %v1046_v38, %v2359_v33 }
 0x151   :  { %v1173_v41 = vadd.f32 %v1172_v36, %v1130_v37  ;;  %v1090_v45 = vadd.f32 %v1089_v40, %v1047_v42 }
 0x153   :  { %1196 = vst [vmem:[%s2432_s2 + $0x38] sm:$0xff] %v1173_v41  ;;  %v1213_v23 = vadd.f32 %v1212_v2, %v1173_v41  ;;  %v1232_v43 = vmul.f32 %v1173_v41, %v1173_v41 }
 0x155   :  { %v1244_v44 = vadd.f32 %v1243_v34, %v1232_v43 }
 0x156   :  { %v1132_v13 = vpop.f32.mrf.mxu2  ;;  %v1048_v48 = vpop.f32.mrf.mxu0 }
 0x157   :  { %v1175_v46 = vpop.f32.mrf.mxu3  ;;  %v1133_v47 = vadd.f32 %v1132_v13, %v1090_v45  ;;  %v1091_v50 = vpop.f32.mrf.mxu1  ;;  %v1049_v53 = vadd.f32 %v1048_v48, %v2361_v49 }
 0x159   :  { %v1176_v52 = vadd.f32 %v1175_v46, %v1133_v47  ;;  %v1092_v58 = vadd.f32 %v1091_v50, %v1049_v53  ;;  %v1256_v50 = vld [vmem:[%s2433_s3] sm:$0x3] }
 0x15b   :  { %1197 = vst [vmem:[%s2432_s2 + $0x40] sm:$0xff] %v1176_v52  ;;  %v1214_v33 = vadd.f32 %v1213_v23, %v1176_v52  ;;  %v1233_v54 = vmul.f32 %v1176_v52, %v1176_v52 }
 0x15d   :  { %v1245_v56 = vadd.f32 %v1244_v44, %v1233_v54 }
 0x15e   :  { %v1134_v32 = vpop.f32.mrf.mxu2  ;;  %v1051_v62 = vpop.f32.mrf.mxu0 }
 0x15f   :  { %v1177_v60 = vpop.f32.mrf.mxu3  ;;  %v1135_v61 = vadd.f32 %v1134_v32, %v1092_v58  ;;  %v1094_v63 = vpop.f32.mrf.mxu1  ;;  %v1052_v49 = vadd.f32 %v1051_v62, %v2363_v57 }
 0x161   :  { %v1178_v0 = vadd.f32 %v1177_v60, %v1135_v61  ;;  %v1095_v7 = vadd.f32 %v1094_v63, %v1052_v49 }
 0x163   :  { %1198 = vst [vmem:[%s2432_s2 + $0x48] sm:$0xff] %v1178_v0  ;;  %v1215_v3 = vadd.f32 %v1214_v33, %v1178_v0  ;;  %v1234_v4 = vmul.f32 %v1178_v0, %v1178_v0 }
 0x165   :  { %v1246_v5 = vadd.f32 %v1245_v56, %v1234_v4 }
 0x166   :  { %v1137_v8 = vpop.f32.mrf.mxu2  ;;  %v1053_v11 = vpop.f32.mrf.mxu0 }
 0x167   :  { %v1180_v39 = vpop.f32.mrf.mxu3  ;;  %v1138_v10 = vadd.f32 %v1137_v8, %v1095_v7  ;;  %v1096_v12 = vpop.f32.mrf.mxu1  ;;  %v1054_v15 = vadd.f32 %v1053_v11, %v2365_v1 }
 0x169   :  { %v1181_v14 = vadd.f32 %v1180_v39, %v1138_v10  ;;  %v1097_v18 = vadd.f32 %v1096_v12, %v1054_v15 }
 0x16b   :  { %1199 = vst [vmem:[%s2432_s2 + $0x50] sm:$0xff] %v1181_v14  ;;  %v1216_v57 = vadd.f32 %v1215_v3, %v1181_v14  ;;  %v1235_v16 = vmul.f32 %v1181_v14, %v1181_v14 }
 0x16d   :  { %v1247_v17 = vadd.f32 %v1246_v5, %v1235_v16 }
 0x16e   :  { %v1139_v19 = vpop.f32.mrf.mxu2  ;;  %v1056_v21 = vpop.f32.mrf.mxu0 }
 0x16f   :  { %v1182_v20 = vpop.f32.mrf.mxu3  ;;  %v1140_v59 = vadd.f32 %v1139_v19, %v1097_v18  ;;  %v1099_v22 = vpop.f32.mrf.mxu1  ;;  %v1057_v25 = vadd.f32 %v1056_v21, %v2367_v9 }
 0x171   :  { %v1183_v24 = vadd.f32 %v1182_v20, %v1140_v59  ;;  %v1100_v28 = vadd.f32 %v1099_v22, %v1057_v25 }
 0x173   :  { %1200 = vst [vmem:[%s2432_s2 + $0x58] sm:$0xff] %v1183_v24  ;;  %v1217_v1 = vadd.f32 %v1216_v57, %v1183_v24  ;;  %v1236_v26 = vmul.f32 %v1183_v24, %v1183_v24 }
 0x175   :  { %v1248_v27 = vadd.f32 %v1247_v17, %v1236_v26 }
 0x176   :  { %v1142_v29 = vpop.f32.mrf.mxu2  ;;  %v1058_v2 = vpop.f32.mrf.mxu0 }
 0x177   :  { %v1185_v30 = vpop.f32.mrf.mxu3  ;;  %v1143_v51 = vadd.f32 %v1142_v29, %v1100_v28  ;;  %v1101_v31 = vpop.f32.mrf.mxu1 }
 0x179   :  { %v1186_v34 = vadd.f32 %v1185_v30, %v1143_v51 }
 0x17b   :  { %1201 = vst [vmem:[%s2432_s2 + $0x60] sm:$0xff] %v1186_v34  ;;  %v1218_v35 = vadd.f32 %v1217_v1, %v1186_v34  ;;  %v1237_v9 = vmul.f32 %v1186_v34, %v1186_v34 }
 0x17d   :  { %v1219_v6 = vrot.slane %v1218_v35, 4  ;;  %v1249_v36 = vadd.f32 %v1248_v27, %v1237_v9 }
 0x17e   :  { %v1144_v37 = vpop.f32.mrf.mxu2 }
 0x17f   :  { %v1187_v38 = vpop.f32.mrf.mxu3  ;;  %v1220_v40 = vadd.f32 %v1219_v6, %v1218_v35  ;;  %v1250_v41 = vrot.slane %v1249_v36, 4 }
 0x181   :  { %v1221_v42 = vrot.slane %v1220_v40, 2  ;;  %v1251_v23 = vadd.f32 %v1250_v41, %v1249_v36 }
 0x183   :  { %v1222_v43 = vadd.f32 %v1221_v42, %v1220_v40  ;;  %v1252_v44 = vrot.slane %v1251_v23, 2 }
 0x185   :  { %v1223_v45 = vrot.slane %v1222_v43, 1  ;;  %v1253_v13 = vadd.f32 %v1252_v44, %v1251_v23 }
 0x187   :  { %v1254_v46 = vrot.slane %v1253_v13, 1  ;;  %v1224_v47 = vadd.f32 %v1223_v45, %v1222_v43 }
 0x189   :  { %v1255_v48 = vadd.f32 %v1254_v46, %v1253_v13 }
 0x18b   :  { %v1258_v52 = vsel %vm1257_vm0, %v1224_v47, %v1255_v48 }
 0x18c   :  { %v1259_v53 = vadd.f32 %v1258_v52, %v1256_v50 }
 0x18e   :  { %1260 = vst [vmem:[%s2433_s3] sm:$0x3] %v1259_v53 }

// kernel: _lambda_.15
= control target key start
LH: loop header
LB: loop body
LE: loop exit
PB: predicated region body
PF: predicated region fallthrough
CT: control target
= control target key end

     0   :  { %s3926_s1 = inlined_call_operand.vmem [shape: bf16[2048,128], index: 1, kind: input, shape index: {}]   ;;  %s3927_s2 = inlined_call_operand.vmem [shape: f32[1,128], index: 2, kind: input, shape index: {}]   ;;  %s3928_s0 = inlined_call_operand.vmem [shape: bf16[72,2048], index: 0, kind: input, shape index: {}]   ;;  %s3929_s3 = inlined_call_operand.vmem [shape: f32[72,128], index: 3, kind: output, shape index: {}]  }
   0x1   :  { %v2870_v0 = vld [vmem:[%s3926_s1 + $0x38] sm:$0xff]  ;;  %v2869_v4 = vld [vmem:[%s3926_s1 + $0x30] sm:$0xff]  ;;  %v2868_v8 = vld [vmem:[%s3926_s1 + $0x28] sm:$0xff] }
   0x2   :  { %v2878_v1 = vld [vmem:[%s3926_s1 + $0x78] sm:$0xff]  ;;  %1490 = vmatpush.bf16.msra.mxu0 %v2870_v0  ;;  %v2877_v5 = vld [vmem:[%s3926_s1 + $0x70] sm:$0xff]  ;;  %v2876_v9 = vld [vmem:[%s3926_s1 + $0x68] sm:$0xff] }
   0x3   :  { %v2886_v2 = vld [vmem:[%s3926_s1 + $0xb8] sm:$0xff]  ;;  %1523 = vmatpush.bf16.msra.mxu1 %v2878_v1  ;;  %v2885_v6 = vld [vmem:[%s3926_s1 + $0xb0] sm:$0xff]  ;;  %v2884_v10 = vld [vmem:[%s3926_s1 + $0xa8] sm:$0xff] }
   0x4   :  { %v2894_v3 = vld [vmem:[%s3926_s1 + $0xf8] sm:$0xff]  ;;  %1556 = vmatpush.bf16.msra.mxu2 %v2886_v2  ;;  %v2893_v7 = vld [vmem:[%s3926_s1 + $0xf0] sm:$0xff]  ;;  %v2892_v11 = vld [vmem:[%s3926_s1 + $0xe8] sm:$0xff] }
   0x5   :  { %1589 = vmatpush.bf16.msra.mxu3 %v2894_v3  ;;  %v2867_v12 = vld [vmem:[%s3926_s1 + $0x20] sm:$0xff]  ;;  %v2866_v16 = vld [vmem:[%s3926_s1 + $0x18] sm:$0xff]  ;;  %v2865_v20 = vld [vmem:[%s3926_s1 + $0x10] sm:$0xff] }
   0x6   :  { %1491 = vmatpush.bf16.msra.mxu0 %v2869_v4  ;;  %v2875_v13 = vld [vmem:[%s3926_s1 + $0x60] sm:$0xff]  ;;  %v2874_v17 = vld [vmem:[%s3926_s1 + $0x58] sm:$0xff]  ;;  %v2873_v21 = vld [vmem:[%s3926_s1 + $0x50] sm:$0xff] }
   0x7   :  { %1524 = vmatpush.bf16.msra.mxu1 %v2877_v5  ;;  %v2883_v14 = vld [vmem:[%s3926_s1 + $0xa0] sm:$0xff]  ;;  %v2882_v18 = vld [vmem:[%s3926_s1 + $0x98] sm:$0xff]  ;;  %v2881_v22 = vld [vmem:[%s3926_s1 + $0x90] sm:$0xff] }
   0x8   :  { %1557 = vmatpush.bf16.msra.mxu2 %v2885_v6  ;;  %v2891_v15 = vld [vmem:[%s3926_s1 + $0xe0] sm:$0xff]  ;;  %v2890_v19 = vld [vmem:[%s3926_s1 + $0xd8] sm:$0xff]  ;;  %v2889_v23 = vld [vmem:[%s3926_s1 + $0xd0] sm:$0xff] }
   0x9   :  { %1590 = vmatpush.bf16.msra.mxu3 %v2893_v7  ;;  %v2864_v24 = vld [vmem:[%s3926_s1 + $0x8] sm:$0xff]  ;;  %v2863_v28 = vld [vmem:[%s3926_s1] sm:$0xff]  ;;  %v2918_v40 = vld [vmem:[%s3926_s1 + $0x1b8] sm:$0xff] }
   0xa   :  { %1492 = vmatpush.bf16.msra.mxu0 %v2868_v8  ;;  %v2872_v25 = vld [vmem:[%s3926_s1 + $0x48] sm:$0xff]  ;;  %v2871_v29 = vld [vmem:[%s3926_s1 + $0x40] sm:$0xff]  ;;  %v2926_v41 = vld [vmem:[%s3926_s1 + $0x1f8] sm:$0xff] }
   0xb   :  { %1525 = vmatpush.bf16.msra.mxu1 %v2876_v9  ;;  %v2880_v26 = vld [vmem:[%s3926_s1 + $0x88] sm:$0xff]  ;;  %v2879_v30 = vld [vmem:[%s3926_s1 + $0x80] sm:$0xff]  ;;  %v2902_v46 = vld [vmem:[%s3926_s1 + $0x138] sm:$0xff] }
   0xc   :  { %1558 = vmatpush.bf16.msra.mxu2 %v2884_v10  ;;  %v2888_v27 = vld [vmem:[%s3926_s1 + $0xc8] sm:$0xff]  ;;  %v2887_v31 = vld [vmem:[%s3926_s1 + $0xc0] sm:$0xff]  ;;  %v2910_v47 = vld [vmem:[%s3926_s1 + $0x178] sm:$0xff] }
   0xd   :  { %1591 = vmatpush.bf16.msra.mxu3 %v2892_v11  ;;  %v2033_v32 = vld [vmem:[%s3928_s0] sm:$0xf]  ;;  %v2799_v34 = vld [vmem:[%s3928_s0 + $0x4] sm:$0xf]  ;;  %v2041_v36 = vld [vmem:[%s3928_s0 + $0x8] sm:$0xf] }
   0xe   :  { %1493 = vmatpush.bf16.msra.mxu0 %v2867_v12  ;;  %v2807_v33 = vld [vmem:[%s3928_s0 + $0x3c] sm:$0xf0]  ;;  %v2035_v35 = vld [vmem:[%s3928_s0 + $0x40] sm:$0xf0]  ;;  %v2808_v37 = vld [vmem:[%s3928_s0 + $0x44] sm:$0xf0] }
   0xf   :  { %1526 = vmatpush.bf16.msra.mxu1 %v2875_v13  ;;  %v2800_v38 = vld [vmem:[%s3928_s0 + $0xc] sm:$0xf]  ;;  %v2034_v42 = vor.u32 %v2807_v33, %v2033_v32  ;;  %v2038_v43 = vor.u32 %v2799_v34, %v2035_v35  ;;  %v2042_v44 = vor.u32 %v2808_v37, %v2041_v36  ;;  %v2917_v48 = vld [vmem:[%s3926_s1 + $0x1b0] sm:$0xff]  ;;  %v2097_v56 = vld [vmem:[%s3928_s0 + $0x80] sm:$0xf] }
  0x10   :  { %1559 = vmatpush.bf16.msra.mxu2 %v2883_v14  ;;  %v2043_v39 = vld [vmem:[%s3928_s0 + $0x48] sm:$0xf0]  ;;  %v2925_v49 = vld [vmem:[%s3926_s1 + $0x1f0] sm:$0xff]  ;;  %v2915_v57 = vld [vmem:[%s3926_s1 + $0x1a0] sm:$0xff] }
  0x11   :  { %1592 = vmatpush.bf16.msra.mxu3 %v2891_v15  ;;  %v2046_v45 = vor.u32 %v2800_v38, %v2043_v39  ;;  %v2901_v50 = vld [vmem:[%s3926_s1 + $0x130] sm:$0xff]  ;;  %v2916_v52 = vld [vmem:[%s3926_s1 + $0x1a8] sm:$0xff]  ;;  %v2923_v58 = vld [vmem:[%s3926_s1 + $0x1e0] sm:$0xff] }
  0x12   :  { %1494 = vmatpush.bf16.msra.mxu0 %v2866_v16  ;;  %v2909_v51 = vld [vmem:[%s3926_s1 + $0x170] sm:$0xff]  ;;  %v2924_v53 = vld [vmem:[%s3926_s1 + $0x1e8] sm:$0xff]  ;;  %v2823_v59 = vld [vmem:[%s3928_s0 + $0xbc] sm:$0xf0] }
  0x13   :  { %1527 = vmatpush.bf16.msra.mxu1 %v2874_v17  ;;  %v2900_v54 = vld [vmem:[%s3926_s1 + $0x128] sm:$0xff]  ;;  %v2815_v60 = vld [vmem:[%s3928_s0 + $0x84] sm:$0xf]  ;;  %v2914_v4 = vld [vmem:[%s3926_s1 + $0x198] sm:$0xff]  ;;  %v2098_v6 = vor.u32 %v2823_v59, %v2097_v56 }
  0x14   :  { %1560 = vmatpush.bf16.msra.mxu2 %v2882_v18  ;;  %v2908_v55 = vld [vmem:[%s3926_s1 + $0x168] sm:$0xff]  ;;  %v2099_v61 = vld [vmem:[%s3928_s0 + $0xc0] sm:$0xf0]  ;;  %v2922_v5 = vld [vmem:[%s3926_s1 + $0x1d8] sm:$0xff] }
  0x15   :  { %1593 = vmatpush.bf16.msra.mxu3 %v2890_v19  ;;  %v2105_v62 = vld [vmem:[%s3928_s0 + $0x88] sm:$0xf]  ;;  %v2816_v0 = vld [vmem:[%s3928_s0 + $0x8c] sm:$0xf]  ;;  %v2899_v2 = vld [vmem:[%s3926_s1 + $0x120] sm:$0xff]  ;;  %v2102_v7 = vor.u32 %v2815_v60, %v2099_v61 }
  0x16   :  { %1495 = vmatpush.bf16.msra.mxu0 %v2865_v20  ;;  %v2824_v63 = vld [vmem:[%s3928_s0 + $0xc4] sm:$0xf0]  ;;  %v2107_v1 = vld [vmem:[%s3928_s0 + $0xc8] sm:$0xf0]  ;;  %v2907_v3 = vld [vmem:[%s3926_s1 + $0x160] sm:$0xff] }
  0x17   :  { %1528 = vmatpush.bf16.msra.mxu1 %v2873_v21  ;;  %v2106_v8 = vor.u32 %v2824_v63, %v2105_v62  ;;  %v2110_v9 = vor.u32 %v2816_v0, %v2107_v1  ;;  %v2898_v10 = vld [vmem:[%s3926_s1 + $0x118] sm:$0xff]  ;;  %v2913_v12 = vld [vmem:[%s3926_s1 + $0x190] sm:$0xff]  ;;  %v2912_v16 = vld [vmem:[%s3926_s1 + $0x188] sm:$0xff] }
  0x18   :  { %1561 = vmatpush.bf16.msra.mxu2 %v2881_v22  ;;  %v2906_v11 = vld [vmem:[%s3926_s1 + $0x158] sm:$0xff]  ;;  %v2921_v13 = vld [vmem:[%s3926_s1 + $0x1d0] sm:$0xff]  ;;  %v2920_v17 = vld [vmem:[%s3926_s1 + $0x1c8] sm:$0xff] }
  0x19   :  { %1594 = vmatpush.bf16.msra.mxu3 %v2889_v23  ;;  %v2897_v14 = vld [vmem:[%s3926_s1 + $0x110] sm:$0xff]  ;;  %v2161_v18 = vld [vmem:[%s3928_s0 + $0x100] sm:$0xf]  ;;  %v2831_v20 = vld [vmem:[%s3928_s0 + $0x104] sm:$0xf] }
  0x1a   :  { %1496 = vmatpush.bf16.msra.mxu0 %v2864_v24  ;;  %v2905_v15 = vld [vmem:[%s3926_s1 + $0x150] sm:$0xff]  ;;  %v2839_v19 = vld [vmem:[%s3928_s0 + $0x13c] sm:$0xf0]  ;;  %v2163_v21 = vld [vmem:[%s3928_s0 + $0x140] sm:$0xf0] }
  0x1b   :  { %1529 = vmatpush.bf16.msra.mxu1 %v2872_v25  ;;  %v2169_v22 = vld [vmem:[%s3928_s0 + $0x108] sm:$0xf]  ;;  %v2832_v24 = vld [vmem:[%s3928_s0 + $0x10c] sm:$0xf]  ;;  %v2911_v32 = vld [vmem:[%s3926_s1 + $0x180] sm:$0xff] }
  0x1c   :  { %1562 = vmatpush.bf16.msra.mxu2 %v2880_v26  ;;  %v2840_v23 = vld [vmem:[%s3928_s0 + $0x144] sm:$0xf0]  ;;  %v2171_v25 = vld [vmem:[%s3928_s0 + $0x148] sm:$0xf0]  ;;  %v2162_v26 = vor.u32 %v2839_v19, %v2161_v18  ;;  %v2919_v33 = vld [vmem:[%s3926_s1 + $0x1c0] sm:$0xff] }
  0x1d   :  { %1595 = vmatpush.bf16.msra.mxu3 %v2888_v27  ;;  %v2166_v27 = vor.u32 %v2831_v20, %v2163_v21  ;;  %v2895_v34 = vld [vmem:[%s3926_s1 + $0x100] sm:$0xff]  ;;  %v79_v56 = vld [vmem:[%s3928_s0 + $0x208] sm:$0xff]  ;;  %v2941_v1 = vld [vmem:[%s3926_s1 + $0x270] sm:$0xff] }
  0x1e   :  { %1497 = vmatpush.bf16.msra.mxu0 %v2863_v28  ;;  %v2170_v28 = vor.u32 %v2840_v23, %v2169_v22  ;;  %v2903_v35 = vld [vmem:[%s3926_s1 + $0x140] sm:$0xff]  ;;  %v548_v59 = vunpack.c.l.b16 %v79_v56  ;;  %v549_v60 = vunpack.c.h.b16 %v79_v56  ;;  %v2946_v22 = vld [vmem:[%s3926_s1 + $0x298] sm:$0xff]  ;;  %v2928_v56 = vld [vmem:[%s3926_s1 + $0x208] sm:$0xff] }
  0x1f   :  { %1530 = vmatpush.bf16.msra.mxu1 %v2871_v29  ;;  %v2174_v29 = vor.u32 %v2832_v24, %v2171_v25  ;;  %v2225_v36 = vld [vmem:[%s3928_s0 + $0x180] sm:$0xf]  ;;  %v2847_v38 = vld [vmem:[%s3928_s0 + $0x184] sm:$0xf]  ;;  %v2954_v23 = vld [vmem:[%s3926_s1 + $0x2d8] sm:$0xff] }
  0x20   :  { %1563 = vmatpush.bf16.msra.mxu2 %v2879_v30  ;;  %v2896_v30 = vld [vmem:[%s3926_s1 + $0x108] sm:$0xff]  ;;  %v2855_v37 = vld [vmem:[%s3928_s0 + $0x1bc] sm:$0xf0]  ;;  %v2227_v39 = vld [vmem:[%s3928_s0 + $0x1c0] sm:$0xf0]  ;;  %v628_v63 = vpack.c.b16 %v548_v59, %v548_v59  ;;  %v629_v0 = vpack.c.b16 %v549_v60, %v549_v60 }
  0x21   :  { %1596 = vmatpush.bf16.msra.mxu3 %v2887_v31  ;;  %1498 = vmatmul.bf16.vlgmr.msra.gmra.mxu0 %v2034_v42  ;;  %v2904_v31 = vld [vmem:[%s3926_s1 + $0x148] sm:$0xff]  ;;  %v2931_v20 = vld [vmem:[%s3926_s1 + $0x220] sm:$0xff]  ;;  %v2113_v24 = vld [vmem:[%s3928_s0 + $0x90] sm:$0xf] }
  0x22   :  { %1531 = vmatmul.bf16.vlgmr.msra.gmra.mxu1 %v2038_v43  ;;  %1622 = vmatpush.bf16.msrb.mxu0 %v2902_v46  ;;  %v2848_v42 = vld [vmem:[%s3928_s0 + $0x18c] sm:$0xf]  ;;  %v2939_v21 = vld [vmem:[%s3926_s1 + $0x260] sm:$0xff]  ;;  %v2825_v25 = vld [vmem:[%s3928_s0 + $0xcc] sm:$0xf0] }
  0x23   :  { %1564 = vmatmul.bf16.vlgmr.msra.gmra.mxu2 %v2042_v44  ;;  %1655 = vmatpush.bf16.msrb.mxu1 %v2910_v47  ;;  %v2235_v43 = vld [vmem:[%s3928_s0 + $0x1c8] sm:$0xf0]  ;;  %v2226_v44 = vor.u32 %v2855_v37, %v2225_v36  ;;  %v2930_v36 = vld [vmem:[%s3926_s1 + $0x218] sm:$0xff]  ;;  %v3468_v59 = vld [vmem:[%s3927_s2] ss:$0 sm:$0xff] }
  0x24   :  { %1688 = vmatpush.bf16.msrb.mxu2 %v2918_v40  ;;  %1597 = vmatmul.bf16.vlgmr.msra.gmra.mxu3 %v2046_v45  ;;  %v2233_v40 = vld [vmem:[%s3928_s0 + $0x188] sm:$0xf]  ;;  %v2230_v45 = vor.u32 %v2847_v38, %v2227_v39  ;;  %v2238_v47 = vor.u32 %v2848_v42, %v2235_v43  ;;  %v2938_v37 = vld [vmem:[%s3926_s1 + $0x258] sm:$0xff]  ;;  %v2945_v38 = vld [vmem:[%s3926_s1 + $0x290] sm:$0xff] }
  0x25   :  { %1721 = vmatpush.bf16.msrb.mxu3 %v2926_v41  ;;  %v2856_v41 = vld [vmem:[%s3928_s0 + $0x1c4] sm:$0xf0]  ;;  %v2953_v39 = vld [vmem:[%s3926_s1 + $0x2d0] sm:$0xff] }
  0x26   :  { %1623 = vmatpush.bf16.msrb.mxu0 %v2901_v50  ;;  %v2234_v46 = vor.u32 %v2856_v41, %v2233_v40  ;;  %v2934_v50 = vld [vmem:[%s3926_s1 + $0x238] sm:$0xff]  ;;  %v2177_v40 = vld [vmem:[%s3928_s0 + $0x110] sm:$0xf] }
  0x27   :  { %1656 = vmatpush.bf16.msrb.mxu1 %v2909_v51  ;;  %v2942_v51 = vld [vmem:[%s3926_s1 + $0x278] sm:$0xff]  ;;  %v2841_v41 = vld [vmem:[%s3928_s0 + $0x14c] sm:$0xf0] }
  0x28   :  { %1689 = vmatpush.bf16.msrb.mxu2 %v2917_v48  ;;  %v2950_v48 = vld [vmem:[%s3926_s1 + $0x2b8] sm:$0xff]  ;;  %v2929_v42 = vld [vmem:[%s3926_s1 + $0x210] sm:$0xff] }
  0x29   :  { %1722 = vmatpush.bf16.msrb.mxu3 %v2925_v49  ;;  %v2958_v49 = vld [vmem:[%s3926_s1 + $0x2f8] sm:$0xff]  ;;  %v2937_v43 = vld [vmem:[%s3926_s1 + $0x250] sm:$0xff] }
  0x2a   :  { %1624 = vmatpush.bf16.msrb.mxu0 %v2900_v54  ;;  %v2933_v54 = vld [vmem:[%s3926_s1 + $0x230] sm:$0xff] }
  0x2b   :  { %1657 = vmatpush.bf16.msrb.mxu1 %v2908_v55  ;;  %v78_v55 = vld [vmem:[%s3928_s0 + $0x200] sm:$0xff]  ;;  %v2857_v60 = vld [vmem:[%s3928_s0 + $0x1cc] sm:$0xf0] }
  0x2c   :  { %1690 = vmatpush.bf16.msrb.mxu2 %v2916_v52  ;;  %v2949_v52 = vld [vmem:[%s3926_s1 + $0x2b0] sm:$0xff] }
  0x2d   :  { %1723 = vmatpush.bf16.msrb.mxu3 %v2924_v53  ;;  %v2957_v53 = vld [vmem:[%s3926_s1 + $0x2f0] sm:$0xff] }
  0x2e   :  { %1625 = vmatpush.bf16.msrb.mxu0 %v2899_v2  ;;  %v2948_v2 = vld [vmem:[%s3926_s1 + $0x2a8] sm:$0xff] }
  0x2f   :  { %1658 = vmatpush.bf16.msrb.mxu1 %v2907_v3  ;;  %v2956_v3 = vld [vmem:[%s3926_s1 + $0x2e8] sm:$0xff] }
  0x30   :  { %1691 = vmatpush.bf16.msrb.mxu2 %v2915_v57  ;;  %v546_v57 = vunpack.c.l.b16 %v78_v55 }
  0x31   :  { %1724 = vmatpush.bf16.msrb.mxu3 %v2923_v58  ;;  %1503 = vmatmul.bf16.gmra.mxu0 %v2098_v6  ;;  %v547_v58 = vunpack.c.h.b16 %v78_v55  ;;  %v2947_v6 = vld [vmem:[%s3926_s1 + $0x2a0] sm:$0xff]  ;;  %v2952_v55 = vld [vmem:[%s3926_s1 + $0x2c8] sm:$0xff] }
  0x32   :  { %1536 = vmatmul.bf16.gmra.mxu1 %v2102_v7  ;;  %1626 = vmatpush.bf16.msrb.mxu0 %v2898_v10  ;;  %v626_v61 = vpack.c.b16 %v546_v57, %v546_v57  ;;  %v2955_v7 = vld [vmem:[%s3926_s1 + $0x2e0] sm:$0xff]  ;;  %v2801_v10 = vld [vmem:[%s3928_s0 + $0x14] sm:$0xf]  ;;  %v2936_v57 = vld [vmem:[%s3926_s1 + $0x248] sm:$0xff] }
  0x33   :  { %1569 = vmatmul.bf16.gmra.mxu2 %v2106_v8  ;;  %1659 = vmatpush.bf16.msrb.mxu1 %v2906_v11  ;;  %v627_v62 = vpack.c.b16 %v547_v58, %v547_v58  ;;  %v2049_v8 = vld [vmem:[%s3928_s0 + $0x10] sm:$0xf]  ;;  %v2051_v11 = vld [vmem:[%s3928_s0 + $0x50] sm:$0xf0] }
  0x34   :  { %1692 = vmatpush.bf16.msrb.mxu2 %v2914_v4  ;;  %1602 = vmatmul.bf16.gmra.mxu3 %v2110_v9  ;;  %v2932_v4 = vld [vmem:[%s3926_s1 + $0x228] sm:$0xff]  ;;  %v2809_v9 = vld [vmem:[%s3928_s0 + $0x4c] sm:$0xf0] }
  0x35   :  { %1725 = vmatpush.bf16.msrb.mxu3 %v2922_v5  ;;  %v2940_v5 = vld [vmem:[%s3926_s1 + $0x268] sm:$0xff]  ;;  %v2241_v58 = vld [vmem:[%s3928_s0 + $0x190] sm:$0xf] }
  0x36   :  { %1627 = vmatpush.bf16.msrb.mxu0 %v2897_v14  ;;  %v2802_v14 = vld [vmem:[%s3928_s0 + $0x1c] sm:$0xf] }
  0x37   :  { %1660 = vmatpush.bf16.msrb.mxu1 %v2905_v15  ;;  %v2059_v15 = vld [vmem:[%s3928_s0 + $0x58] sm:$0xf0] }
  0x38   :  { %1693 = vmatpush.bf16.msrb.mxu2 %v2913_v12  ;;  %v2057_v12 = vld [vmem:[%s3928_s0 + $0x18] sm:$0xf]  ;;  %v2062_v19 = vor.u32 %v2802_v14, %v2059_v15 }
  0x39   :  { %1726 = vmatpush.bf16.msrb.mxu3 %v2921_v13  ;;  %v2810_v13 = vld [vmem:[%s3928_s0 + $0x54] sm:$0xf0] }
  0x3a   :  { %1628 = vmatpush.bf16.msrb.mxu0 %v2896_v30  ;;  %v2058_v18 = vor.u32 %v2810_v13, %v2057_v12  ;;  %v2818_v30 = vld [vmem:[%s3928_s0 + $0x9c] sm:$0xf] }
  0x3b   :  { %1661 = vmatpush.bf16.msrb.mxu1 %v2904_v31  ;;  %v2123_v31 = vld [vmem:[%s3928_s0 + $0xd8] sm:$0xf0] }
  0x3c   :  { %1694 = vmatpush.bf16.msrb.mxu2 %v2912_v16  ;;  %v2050_v16 = vor.u32 %v2809_v9, %v2049_v8  ;;  %v2935_v8 = vld [vmem:[%s3926_s1 + $0x240] sm:$0xff]  ;;  %v2982_v15 = vld [vmem:[%s3926_s1 + $0x3b8] sm:$0xff] }
  0x3d   :  { %1727 = vmatpush.bf16.msrb.mxu3 %v2920_v17  ;;  %v2054_v17 = vor.u32 %v2801_v10, %v2051_v11 }
  0x3e   :  { %1629 = vmatpush.bf16.msrb.mxu0 %v2895_v34 }
  0x3f   :  { %1662 = vmatpush.bf16.msrb.mxu1 %v2903_v35  ;;  %v2126_v35 = vor.u32 %v2818_v30, %v2123_v31  ;;  %v2974_v30 = vld [vmem:[%s3926_s1 + $0x378] sm:$0xff]  ;;  %v2981_v31 = vld [vmem:[%s3926_s1 + $0x3b0] sm:$0xff] }
  0x40   :  { %1695 = vmatpush.bf16.msrb.mxu2 %v2911_v32  ;;  %v2114_v32 = vor.u32 %v2825_v25, %v2113_v24  ;;  %v81_v24 = vld [vmem:[%s3928_s0 + $0x218] sm:$0xff] }
  0x41   :  { %1508 = vmatmul.bf16.gmra.mxu0 %v2162_v26  ;;  %1728 = vmatpush.bf16.msrb.mxu3 %v2919_v33  ;;  %v2817_v26 = vld [vmem:[%s3928_s0 + $0x94] sm:$0xf] }
  0x42   :  { %1541 = vmatmul.bf16.gmra.mxu1 %v2166_v27  ;;  %1754 = vmatpush.bf16.msra.mxu0 %v2934_v50  ;;  %v2115_v27 = vld [vmem:[%s3928_s0 + $0xd0] sm:$0xf0]  ;;  %v2178_v50 = vor.u32 %v2841_v41, %v2177_v40 }
  0x43   :  { %1574 = vmatmul.bf16.gmra.mxu2 %v2170_v28  ;;  %1787 = vmatpush.bf16.msra.mxu1 %v2942_v51  ;;  %v2121_v28 = vld [vmem:[%s3928_s0 + $0x98] sm:$0xf]  ;;  %v2118_v33 = vor.u32 %v2817_v26, %v2115_v27 }
  0x44   :  { %1607 = vmatmul.bf16.gmra.mxu3 %v2174_v29  ;;  %1820 = vmatpush.bf16.msra.mxu2 %v2950_v48  ;;  %v2826_v29 = vld [vmem:[%s3928_s0 + $0xd4] sm:$0xf0]  ;;  %v2834_v48 = vld [vmem:[%s3928_s0 + $0x11c] sm:$0xf] }
  0x45   :  { %1853 = vmatpush.bf16.msra.mxu3 %v2958_v49  ;;  %v2122_v34 = vor.u32 %v2826_v29, %v2121_v28  ;;  %v2187_v49 = vld [vmem:[%s3928_s0 + $0x158] sm:$0xf0] }
  0x46   :  { %1755 = vmatpush.bf16.msra.mxu0 %v2933_v54  ;;  %v2944_v54 = vld [vmem:[%s3926_s1 + $0x288] sm:$0xff]  ;;  %v2966_v29 = vld [vmem:[%s3926_s1 + $0x338] sm:$0xff] }
  0x47   :  { %1788 = vmatpush.bf16.msra.mxu1 %v2941_v1  ;;  %v2249_v1 = vld [vmem:[%s3928_s0 + $0x198] sm:$0xf] }
  0x48   :  { %1821 = vmatpush.bf16.msra.mxu2 %v2949_v52 }
  0x49   :  { %1854 = vmatpush.bf16.msra.mxu3 %v2957_v53  ;;  %v2190_v53 = vor.u32 %v2834_v48, %v2187_v49  ;;  %v2973_v48 = vld [vmem:[%s3926_s1 + $0x370] sm:$0xff] }
  0x4a   :  { %1756 = vmatpush.bf16.msra.mxu0 %v2932_v4  ;;  %v2251_v4 = vld [vmem:[%s3928_s0 + $0x1d8] sm:$0xf0] }
  0x4b   :  { %1789 = vmatpush.bf16.msra.mxu1 %v2940_v5  ;;  %v2242_v5 = vor.u32 %v2857_v60, %v2241_v58  ;;  %v2988_v58 = vld [vmem:[%s3926_s1 + $0x3e8] sm:$0xff] }
  0x4c   :  { %1822 = vmatpush.bf16.msra.mxu2 %v2948_v2  ;;  %v2858_v2 = vld [vmem:[%s3928_s0 + $0x1d4] sm:$0xf0] }
  0x4d   :  { %1855 = vmatpush.bf16.msra.mxu3 %v2956_v3  ;;  %v2850_v3 = vld [vmem:[%s3928_s0 + $0x19c] sm:$0xf]  ;;  %v2250_v11 = vor.u32 %v2858_v2, %v2249_v1  ;;  %v2067_v1 = vld [vmem:[%s3928_s0 + $0x60] sm:$0xf0]  ;;  %v2073_v2 = vld [vmem:[%s3928_s0 + $0x28] sm:$0xf] }
  0x4e   :  { %1757 = vmatpush.bf16.msra.mxu0 %v2931_v20  ;;  %v2254_v12 = vor.u32 %v2850_v3, %v2251_v4  ;;  %v2812_v3 = vld [vmem:[%s3928_s0 + $0x64] sm:$0xf0]  ;;  %v2804_v4 = vld [vmem:[%s3928_s0 + $0x2c] sm:$0xf] }
  0x4f   :  { %1790 = vmatpush.bf16.msra.mxu1 %v2939_v21 }
  0x50   :  { %1823 = vmatpush.bf16.msra.mxu2 %v2947_v6 }
  0x51   :  { %1513 = vmatmul.bf16.gmra.mxu0 %v2226_v44  ;;  %1856 = vmatpush.bf16.msra.mxu3 %v2955_v7  ;;  %v2833_v44 = vld [vmem:[%s3928_s0 + $0x114] sm:$0xf]  ;;  %v2927_v7 = vld [vmem:[%s3926_s1 + $0x200] sm:$0xff] }
  0x52   :  { %1546 = vmatmul.bf16.gmra.mxu1 %v2230_v45  ;;  %1758 = vmatpush.bf16.msra.mxu0 %v2930_v36  ;;  %v2179_v45 = vld [vmem:[%s3928_s0 + $0x150] sm:$0xf0] }
  0x53   :  { %1579 = vmatmul.bf16.gmra.mxu2 %v2234_v46  ;;  %1791 = vmatpush.bf16.msra.mxu1 %v2938_v37  ;;  %v2185_v46 = vld [vmem:[%s3928_s0 + $0x118] sm:$0xf]  ;;  %v2182_v51 = vor.u32 %v2833_v44, %v2179_v45 }
  0x54   :  { %1612 = vmatmul.bf16.gmra.mxu3 %v2238_v47  ;;  %1824 = vmatpush.bf16.msra.mxu2 %v2946_v22  ;;  %v2842_v47 = vld [vmem:[%s3928_s0 + $0x154] sm:$0xf0]  ;;  %v80_v22 = vld [vmem:[%s3928_s0 + $0x210] sm:$0xff] }
  0x55   :  { %1857 = vmatpush.bf16.msra.mxu3 %v2954_v23  ;;  %v2186_v52 = vor.u32 %v2842_v47, %v2185_v46  ;;  %v550_v27 = vunpack.c.l.b16 %v80_v22  ;;  %v551_v28 = vunpack.c.h.b16 %v80_v22  ;;  %v2965_v47 = vld [vmem:[%s3926_s1 + $0x330] sm:$0xff] }
  0x56   :  { %1759 = vmatpush.bf16.msra.mxu0 %v2929_v42 }
  0x57   :  { %1792 = vmatpush.bf16.msra.mxu1 %v2937_v43  ;;  %v630_v37 = vpack.c.b16 %v550_v27, %v550_v27 }
  0x58   :  { %1825 = vmatpush.bf16.msra.mxu2 %v2945_v38  ;;  %v631_v38 = vpack.c.b16 %v551_v28, %v551_v28  ;;  %v2963_v28 = vld [vmem:[%s3926_s1 + $0x320] sm:$0xff] }
  0x59   :  { %1858 = vmatpush.bf16.msra.mxu3 %v2953_v39 }
  0x5a   :  { %1760 = vmatpush.bf16.msra.mxu0 %v2928_v56  ;;  %v2065_v56 = vld [vmem:[%s3928_s0 + $0x20] sm:$0xf] }
  0x5b   :  { %1793 = vmatpush.bf16.msra.mxu1 %v2936_v57  ;;  %v2980_v57 = vld [vmem:[%s3926_s1 + $0x3a8] sm:$0xff] }
  0x5c   :  { %1826 = vmatpush.bf16.msra.mxu2 %v2944_v54 }
  0x5d   :  { %1859 = vmatpush.bf16.msra.mxu3 %v2952_v55 }
  0x5e   :  { %1761 = vmatpush.bf16.msra.mxu0 %v2927_v7 }
  0x5f   :  { %1794 = vmatpush.bf16.msra.mxu1 %v2935_v8 }
  0x61   :  { %1518 = vmatmul.bf16.gmra.mxu0 %v626_v61  ;;  %v2943_v61 = vld [vmem:[%s3926_s1 + $0x280] sm:$0xff] }
  0x62   :  { %1551 = vmatmul.bf16.gmra.mxu1 %v627_v62  ;;  %v2951_v62 = vld [vmem:[%s3926_s1 + $0x2c0] sm:$0xff]  ;;  %1827 = vmatpush.bf16.msra.mxu2 %v2943_v61 }
  0x63   :  { %1584 = vmatmul.bf16.gmra.mxu2 %v628_v63  ;;  %v2849_v63 = vld [vmem:[%s3928_s0 + $0x194] sm:$0xf]  ;;  %1860 = vmatpush.bf16.msra.mxu3 %v2951_v62  ;;  %v2811_v61 = vld [vmem:[%s3928_s0 + $0x5c] sm:$0xf0]  ;;  %v2964_v62 = vld [vmem:[%s3926_s1 + $0x328] sm:$0xff] }
  0x64   :  { %1617 = vmatmul.bf16.gmra.mxu3 %v629_v0  ;;  %v2243_v0 = vld [vmem:[%s3928_s0 + $0x1d0] sm:$0xf0]  ;;  %v2066_v8 = vor.u32 %v2811_v61, %v2065_v56  ;;  %v2970_v56 = vld [vmem:[%s3926_s1 + $0x358] sm:$0xff] }
  0x65   :  { %v2246_v6 = vor.u32 %v2849_v63, %v2243_v0  ;;  %v2972_v63 = vld [vmem:[%s3926_s1 + $0x368] sm:$0xff]  ;;  %v2803_v0 = vld [vmem:[%s3928_s0 + $0x24] sm:$0xf] }
  0x71   :  { %1630 = vmatmul.bf16.vlgmr.msrb.gmra.mxu0 %v2050_v16  ;;  %v2990_v16 = vld [vmem:[%s3926_s1 + $0x3f8] sm:$0xff] }
  0x72   :  { %1663 = vmatmul.bf16.vlgmr.msrb.gmra.mxu1 %v2054_v17  ;;  %1886 = vmatpush.bf16.msrb.mxu0 %v2966_v29  ;;  %v2971_v29 = vld [vmem:[%s3926_s1 + $0x360] sm:$0xff] }
  0x73   :  { %1696 = vmatmul.bf16.vlgmr.msrb.gmra.mxu2 %v2058_v18  ;;  %1919 = vmatpush.bf16.msrb.mxu1 %v2974_v30  ;;  %v2978_v30 = vld [vmem:[%s3926_s1 + $0x398] sm:$0xff] }
  0x74   :  { %1729 = vmatmul.bf16.vlgmr.msrb.gmra.mxu3 %v2062_v19  ;;  %1952 = vmatpush.bf16.msrb.mxu2 %v2982_v15 }
  0x75   :  { %1985 = vmatpush.bf16.msrb.mxu3 %v2990_v16 }
  0x76   :  { %1887 = vmatpush.bf16.msrb.mxu0 %v2965_v47 }
  0x77   :  { %1920 = vmatpush.bf16.msrb.mxu1 %v2973_v48 }
  0x78   :  { %1953 = vmatpush.bf16.msrb.mxu2 %v2981_v31 }
  0x7a   :  { %1888 = vmatpush.bf16.msrb.mxu0 %v2964_v62 }
  0x7b   :  { %1921 = vmatpush.bf16.msrb.mxu1 %v2972_v63 }
  0x7c   :  { %1954 = vmatpush.bf16.msrb.mxu2 %v2980_v57  ;;  %v2977_v57 = vld [vmem:[%s3926_s1 + $0x390] sm:$0xff] }
  0x7e   :  { %1889 = vmatpush.bf16.msrb.mxu0 %v2963_v28  ;;  %v2976_v28 = vld [vmem:[%s3926_s1 + $0x388] sm:$0xff] }
  0x7f   :  { %1922 = vmatpush.bf16.msrb.mxu1 %v2971_v29  ;;  %v2984_v29 = vld [vmem:[%s3926_s1 + $0x3c8] sm:$0xff] }
  0x81   :  { %1635 = vmatmul.bf16.gmra.mxu0 %v2114_v32  ;;  %v552_v32 = vunpack.c.l.b16 %v81_v24 }
  0x82   :  { %1668 = vmatmul.bf16.gmra.mxu1 %v2118_v33  ;;  %v553_v33 = vunpack.c.h.b16 %v81_v24 }
  0x83   :  { %1701 = vmatmul.bf16.gmra.mxu2 %v2122_v34  ;;  %v2989_v34 = vld [vmem:[%s3926_s1 + $0x3f0] sm:$0xff]  ;;  %v632_v42 = vpack.c.b16 %v552_v32, %v552_v32  ;;  %v2129_v32 = vld [vmem:[%s3928_s0 + $0xa0] sm:$0xf]  ;;  %1923 = vmatpush.bf16.msrb.mxu1 %v2970_v56 }
  0x84   :  { %1734 = vmatmul.bf16.gmra.mxu3 %v2126_v35  ;;  %v633_v43 = vpack.c.b16 %v553_v33, %v553_v33  ;;  %v2827_v33 = vld [vmem:[%s3928_s0 + $0xdc] sm:$0xf0] }
  0x85   :  { %1986 = vmatpush.bf16.msrb.mxu3 %v2989_v34  ;;  %v2986_v34 = vld [vmem:[%s3926_s1 + $0x3d8] sm:$0xff]  ;;  %v2967_v56 = vld [vmem:[%s3926_s1 + $0x340] sm:$0xff] }
  0x89   :  { %1987 = vmatpush.bf16.msrb.mxu3 %v2988_v58  ;;  %v2985_v58 = vld [vmem:[%s3926_s1 + $0x3d0] sm:$0xff] }
  0x91   :  { %1640 = vmatmul.bf16.gmra.mxu0 %v2178_v50 }
  0x92   :  { %1673 = vmatmul.bf16.gmra.mxu1 %v2182_v51 }
  0x93   :  { %1706 = vmatmul.bf16.gmra.mxu2 %v2186_v52 }
  0x94   :  { %1739 = vmatmul.bf16.gmra.mxu3 %v2190_v53 }
  0x9e   :  { %v1499_v9 = vpop.f32.mrf.mxu0 }
  0x9f   :  { %v1532_v10 = vpop.f32.mrf.mxu1  ;;  %v1500_v13 = vadd.f32 %v3468_v59, %v1499_v9  ;;  %v2070_v9 = vor.u32 %v2803_v0, %v2067_v1 }
  0xa1   :  { %v1533_v14 = vadd.f32 %v1532_v10, %v1500_v13  ;;  %1645 = vmatmul.bf16.gmra.mxu0 %v2242_v5  ;;  %v2075_v5 = vld [vmem:[%s3928_s0 + $0x68] sm:$0xf0]  ;;  %v2074_v13 = vor.u32 %v2812_v3, %v2073_v2  ;;  %v2193_v3 = vld [vmem:[%s3928_s0 + $0x120] sm:$0xf] }
  0xa2   :  { %1678 = vmatmul.bf16.gmra.mxu1 %v2246_v6 }
  0xa3   :  { %1711 = vmatmul.bf16.gmra.mxu2 %v2250_v11 }
  0xa4   :  { %1744 = vmatmul.bf16.gmra.mxu3 %v2254_v12 }
  0xa6   :  { %v1565_v17 = vpop.f32.mrf.mxu2  ;;  %v1501_v20 = vpop.f32.mrf.mxu0 }
  0xa7   :  { %v1598_v18 = vpop.f32.mrf.mxu3  ;;  %v1566_v19 = vadd.f32 %v1565_v17, %v1533_v14  ;;  %v1534_v21 = vpop.f32.mrf.mxu1  ;;  %v1502_v23 = vadd.f32 %v3468_v59, %v1501_v20  ;;  %v2078_v14 = vor.u32 %v2804_v4, %v2075_v5  ;;  %v2843_v5 = vld [vmem:[%s3928_s0 + $0x15c] sm:$0xf0] }
  0xa9   :  { %v3517_v25 = vadd.f32 %v1598_v18, %v1566_v19  ;;  %v1535_v26 = vadd.f32 %v1534_v21, %v1502_v23  ;;  %v2979_v18 = vld [vmem:[%s3926_s1 + $0x3a0] sm:$0xff] }
  0xaa   :  { %v2987_v19 = vld [vmem:[%s3926_s1 + $0x3e0] sm:$0xff]  ;;  %1955 = vmatpush.bf16.msrb.mxu2 %v2979_v18 }
  0xab   :  { %1988 = vmatpush.bf16.msrb.mxu3 %v2987_v19 }
  0xae   :  { %v1567_v35 = vpop.f32.mrf.mxu2  ;;  %v1504_v40 = vpop.f32.mrf.mxu0  ;;  %1956 = vmatpush.bf16.msrb.mxu2 %v2978_v30 }
  0xaf   :  { %v1600_v36 = vpop.f32.mrf.mxu3  ;;  %v1568_v39 = vadd.f32 %v1567_v35, %v1535_v26  ;;  %v1537_v41 = vpop.f32.mrf.mxu1  ;;  %v1505_v44 = vadd.f32 %v3468_v59, %v1504_v40  ;;  %v2819_v35 = vld [vmem:[%s3928_s0 + $0xa4] sm:$0xf]  ;;  %v2139_v40 = vld [vmem:[%s3928_s0 + $0xe8] sm:$0xf0]  ;;  %1989 = vmatpush.bf16.msrb.mxu3 %v2986_v34 }
  0xb1   :  { %v3532_v45 = vadd.f32 %v1600_v36, %v1568_v39  ;;  %v1538_v46 = vadd.f32 %v1537_v41, %v1505_v44  ;;  %1650 = vmatmul.bf16.gmra.mxu0 %v630_v37  ;;  %v2131_v36 = vld [vmem:[%s3928_s0 + $0xe0] sm:$0xf0]  ;;  %v2137_v37 = vld [vmem:[%s3928_s0 + $0xa8] sm:$0xf]  ;;  %v2820_v39 = vld [vmem:[%s3928_s0 + $0xac] sm:$0xf] }
  0xb2   :  { %1683 = vmatmul.bf16.gmra.mxu1 %v631_v38  ;;  %v2828_v38 = vld [vmem:[%s3928_s0 + $0xe4] sm:$0xf0]  ;;  %v2134_v44 = vor.u32 %v2819_v35, %v2131_v36  ;;  %1957 = vmatpush.bf16.msrb.mxu2 %v2977_v57 }
  0xb3   :  { %1716 = vmatmul.bf16.gmra.mxu2 %v632_v42  ;;  %1990 = vmatpush.bf16.msrb.mxu3 %v2985_v58 }
  0xb4   :  { %1749 = vmatmul.bf16.gmra.mxu3 %v633_v43  ;;  %v2130_v43 = vor.u32 %v2827_v33, %v2129_v32 }
  0xb6   :  { %v1570_v49 = vpop.f32.mrf.mxu2  ;;  %v1506_v52 = vpop.f32.mrf.mxu0  ;;  %1958 = vmatpush.bf16.msrb.mxu2 %v2976_v28 }
  0xb7   :  { %v1603_v50 = vpop.f32.mrf.mxu3  ;;  %v1571_v51 = vadd.f32 %v1570_v49, %v1538_v46  ;;  %v1539_v53 = vpop.f32.mrf.mxu1  ;;  %v1507_v54 = vadd.f32 %v3468_v59, %v1506_v52  ;;  %v2138_v49 = vor.u32 %v2828_v38, %v2137_v37  ;;  %1991 = vmatpush.bf16.msrb.mxu3 %v2984_v29  ;;  %v2257_v38 = vld [vmem:[%s3928_s0 + $0x1a0] sm:$0xf] }
  0xb9   :  { %v3541_v55 = vadd.f32 %v1603_v50, %v1571_v51  ;;  %v1540_v60 = vadd.f32 %v1539_v53, %v1507_v54  ;;  %v2142_v50 = vor.u32 %v2820_v39, %v2139_v40  ;;  %v2962_v54 = vld [vmem:[%s3926_s1 + $0x318] sm:$0xff]  ;;  %v2859_v39 = vld [vmem:[%s3928_s0 + $0x1dc] sm:$0xf0] }
  0xba   :  { %1890 = vmatpush.bf16.msrb.mxu0 %v2962_v54  ;;  %v2975_v40 = vld [vmem:[%s3926_s1 + $0x380] sm:$0xff] }
  0xbb   :  { %1959 = vmatpush.bf16.msrb.mxu2 %v2975_v40  ;;  %v2959_v54 = vld [vmem:[%s3926_s1 + $0x300] sm:$0xff]  ;;  %v2814_v40 = vld [vmem:[%s3928_s0 + $0x74] sm:$0xf0] }
  0xbe   :  { %v1572_v6 = vpop.f32.mrf.mxu2  ;;  %v1509_v11 = vpop.f32.mrf.mxu0 }
  0xbf   :  { %v1605_v7 = vpop.f32.mrf.mxu3  ;;  %v1573_v10 = vadd.f32 %v1572_v6, %v1540_v60  ;;  %v1542_v12 = vpop.f32.mrf.mxu1  ;;  %v1510_v15 = vadd.f32 %v3468_v59, %v1509_v11  ;;  %v2961_v6 = vld [vmem:[%s3926_s1 + $0x310] sm:$0xff]  ;;  %v2844_v11 = vld [vmem:[%s3928_s0 + $0x164] sm:$0xf0] }
  0xc0   :  { %1891 = vmatpush.bf16.msrb.mxu0 %v2961_v6  ;;  %v82_v6 = vld [vmem:[%s3928_s0 + $0x220] sm:$0xff] }
  0xc1   :  { %v3580_v16 = vadd.f32 %v1605_v7, %v1573_v10  ;;  %v1543_v17 = vadd.f32 %v1542_v12, %v1510_v15  ;;  %1762 = vmatmul.bf16.vlgmr.msra.gmra.mxu0 %v2066_v8  ;;  %v2969_v7 = vld [vmem:[%s3926_s1 + $0x350] sm:$0xff]  ;;  %v2835_v8 = vld [vmem:[%s3928_s0 + $0x124] sm:$0xf]  ;;  %v2201_v10 = vld [vmem:[%s3928_s0 + $0x128] sm:$0xf] }
  0xc2   :  { %1795 = vmatmul.bf16.vlgmr.msra.gmra.mxu1 %v2070_v9  ;;  %v2195_v9 = vld [vmem:[%s3928_s0 + $0x160] sm:$0xf0]  ;;  %v2836_v12 = vld [vmem:[%s3928_s0 + $0x12c] sm:$0xf] }
  0xc3   :  { %1828 = vmatmul.bf16.vlgmr.msra.gmra.mxu2 %v2074_v13  ;;  %v2203_v13 = vld [vmem:[%s3928_s0 + $0x168] sm:$0xf0]  ;;  %1924 = vmatpush.bf16.msrb.mxu1 %v2969_v7  ;;  %v2198_v18 = vor.u32 %v2835_v8, %v2195_v9 }
  0xc4   :  { %1861 = vmatmul.bf16.vlgmr.msra.gmra.mxu3 %v2078_v14 }
  0xc6   :  { %v1575_v20 = vpop.f32.mrf.mxu2  ;;  %v1511_v23 = vpop.f32.mrf.mxu0 }
  0xc7   :  { %v1608_v21 = vpop.f32.mrf.mxu3  ;;  %v1576_v22 = vadd.f32 %v1575_v20, %v1543_v17  ;;  %v1544_v24 = vpop.f32.mrf.mxu1  ;;  %v1512_v26 = vadd.f32 %v3468_v59, %v1511_v23  ;;  %v2194_v17 = vor.u32 %v2843_v5, %v2193_v3  ;;  %v2206_v23 = vor.u32 %v2836_v12, %v2203_v13 }
  0xc9   :  { %v3589_v27 = vadd.f32 %v1608_v21, %v1576_v22  ;;  %v1545_v31 = vadd.f32 %v1544_v24, %v1512_v26  ;;  %v2202_v22 = vor.u32 %v2844_v11, %v2201_v10  ;;  %v554_v10 = vunpack.c.l.b16 %v82_v6 }
  0xca   :  { %v555_v11 = vunpack.c.h.b16 %v82_v6  ;;  %v2147_v6 = vld [vmem:[%s3928_s0 + $0xf0] sm:$0xf0] }
  0xce   :  { %v1577_v41 = vpop.f32.mrf.mxu2  ;;  %v1514_v47 = vpop.f32.mrf.mxu0 }
  0xcf   :  { %v1610_v42 = vpop.f32.mrf.mxu3  ;;  %v1578_v46 = vadd.f32 %v1577_v41, %v1545_v31  ;;  %v1547_v48 = vpop.f32.mrf.mxu1  ;;  %v1515_v51 = vadd.f32 %v3468_v59, %v1514_v47  ;;  %v2960_v31 = vld [vmem:[%s3926_s1 + $0x308] sm:$0xff]  ;;  %v2983_v41 = vld [vmem:[%s3926_s1 + $0x3c0] sm:$0xff] }
  0xd0   :  { %1892 = vmatpush.bf16.msrb.mxu0 %v2960_v31  ;;  %v2852_v47 = vld [vmem:[%s3928_s0 + $0x1ac] sm:$0xf]  ;;  %1992 = vmatpush.bf16.msrb.mxu3 %v2983_v41  ;;  %v2806_v41 = vld [vmem:[%s3928_s0 + $0x3c] sm:$0xf] }
  0xd1   :  { %v3628_v52 = vadd.f32 %v1610_v42, %v1578_v46  ;;  %v1548_v53 = vadd.f32 %v1547_v48, %v1515_v51  ;;  %1767 = vmatmul.bf16.gmra.mxu0 %v2130_v43  ;;  %v2851_v42 = vld [vmem:[%s3928_s0 + $0x1a4] sm:$0xf]  ;;  %v2860_v46 = vld [vmem:[%s3928_s0 + $0x1e4] sm:$0xf0]  ;;  %v2267_v48 = vld [vmem:[%s3928_s0 + $0x1e8] sm:$0xf0]  ;;  %v2258_v51 = vor.u32 %v2859_v39, %v2257_v38 }
  0xd2   :  { %1800 = vmatmul.bf16.gmra.mxu1 %v2134_v44  ;;  %v2259_v43 = vld [vmem:[%s3928_s0 + $0x1e0] sm:$0xf0]  ;;  %v2265_v44 = vld [vmem:[%s3928_s0 + $0x1a8] sm:$0xf]  ;;  %v2805_v38 = vld [vmem:[%s3928_s0 + $0x34] sm:$0xf] }
  0xd3   :  { %1833 = vmatmul.bf16.gmra.mxu2 %v2138_v49  ;;  %v2083_v39 = vld [vmem:[%s3928_s0 + $0x70] sm:$0xf0] }
  0xd4   :  { %1866 = vmatmul.bf16.gmra.mxu3 %v2142_v50  ;;  %1893 = vmatpush.bf16.msrb.mxu0 %v2959_v54 }
  0xd6   :  { %v1580_v60 = vpop.f32.mrf.mxu2  ;;  %v1516_v63 = vpop.f32.mrf.mxu0 }
  0xd7   :  { %v1613_v61 = vpop.f32.mrf.mxu3  ;;  %v1581_v62 = vadd.f32 %v1580_v60, %v1548_v53  ;;  %v1549_v0 = vpop.f32.mrf.mxu1  ;;  %v1517_v1 = vadd.f32 %v3468_v59, %v1516_v63  ;;  %v2262_v53 = vor.u32 %v2851_v42, %v2259_v43  ;;  %v2266_v60 = vor.u32 %v2860_v46, %v2265_v44  ;;  %v2091_v42 = vld [vmem:[%s3928_s0 + $0x78] sm:$0xf0] }
  0xd9   :  { %v3643_v2 = vadd.f32 %v1613_v61, %v1581_v62  ;;  %v1550_v4 = vadd.f32 %v1549_v0, %v1517_v1  ;;  %v2270_v61 = vor.u32 %v2852_v47, %v2267_v48  ;;  %v2086_v47 = vor.u32 %v2805_v38, %v2083_v39  ;;  %v2838_v38 = vld [vmem:[%s3928_s0 + $0x13c] sm:$0xf] }
  0xda   :  { %v2219_v39 = vld [vmem:[%s3928_s0 + $0x178] sm:$0xf0] }
  0xde   :  { %v1582_v14 = vpop.f32.mrf.mxu2  ;;  %v1519_v20 = vpop.f32.mrf.mxu0 }
  0xdf   :  { %v1615_v15 = vpop.f32.mrf.mxu3  ;;  %v1583_v19 = vadd.f32 %v1582_v14, %v1550_v4  ;;  %v1552_v21 = vpop.f32.mrf.mxu1  ;;  %v1520_v24 = vadd.f32 %v3468_v59, %v1519_v20  ;;  %v2968_v59 = vld [vmem:[%s3926_s1 + $0x348] sm:$0xff] }
  0xe0   :  { %1925 = vmatpush.bf16.msrb.mxu1 %v2968_v59 }
  0xe1   :  { %v3676_v26 = vadd.f32 %v1615_v15, %v1583_v19  ;;  %v1553_v30 = vadd.f32 %v1552_v21, %v1520_v24  ;;  %1772 = vmatmul.bf16.gmra.mxu0 %v2194_v17  ;;  %v634_v17 = vpack.c.b16 %v554_v10, %v554_v10 }
  0xe2   :  { %1805 = vmatmul.bf16.gmra.mxu1 %v2198_v18  ;;  %v635_v18 = vpack.c.b16 %v555_v11, %v555_v11 }
  0xe3   :  { %1838 = vmatmul.bf16.gmra.mxu2 %v2202_v22 }
  0xe4   :  { %1871 = vmatmul.bf16.gmra.mxu3 %v2206_v23  ;;  %1926 = vmatpush.bf16.msrb.mxu1 %v2967_v56 }
  0xe6   :  { %v1585_v32 = vpop.f32.mrf.mxu2  ;;  %v1521_v35 = vpop.f32.mrf.mxu0 }
  0xe7   :  { %v1618_v33 = vpop.f32.mrf.mxu3  ;;  %v1586_v34 = vadd.f32 %v1585_v32, %v1553_v30  ;;  %v1554_v36 = vpop.f32.mrf.mxu1 }
  0xe8   :  { %v2813_v36 = vld [vmem:[%s3928_s0 + $0x6c] sm:$0xf0] }
  0xe9   :  { %v3690_v37 = vadd.f32 %v1618_v33, %v1586_v34 }
  0xee   :  { %v1587_v49 = vpop.f32.mrf.mxu2  ;;  %v1631_v57 = vpop.f32.mrf.mxu0 }
  0xef   :  { %v1620_v50 = vpop.f32.mrf.mxu3  ;;  %v1664_v58 = vpop.f32.mrf.mxu1  ;;  %v1632_v62 = vadd.f32 %v1631_v57, %v3517_v25  ;;  %v83_v25 = vld [vmem:[%s3928_s0 + $0x228] sm:$0xff] }
  0xf0   :  { %v556_v12 = vunpack.c.l.b16 %v83_v25  ;;  %v557_v13 = vunpack.c.h.b16 %v83_v25  ;;  %v2822_v25 = vld [vmem:[%s3928_s0 + $0xbc] sm:$0xf] }
  0xf1   :  { %v1665_v63 = vadd.f32 %v1664_v58, %v1632_v62  ;;  %1777 = vmatmul.bf16.gmra.mxu0 %v2258_v51 }
  0xf2   :  { %1810 = vmatmul.bf16.gmra.mxu1 %v2262_v53  ;;  %v636_v22 = vpack.c.b16 %v556_v12, %v556_v12  ;;  %v2094_v53 = vor.u32 %v2806_v41, %v2091_v42 }
  0xf3   :  { %1843 = vmatmul.bf16.gmra.mxu2 %v2266_v60 }
  0xf4   :  { %1876 = vmatmul.bf16.gmra.mxu3 %v2270_v61 }
  0xf6   :  { %v1697_v0 = vpop.f32.mrf.mxu2  ;;  %v1633_v4 = vpop.f32.mrf.mxu0 }
  0xf7   :  { %v1730_v1 = vpop.f32.mrf.mxu3  ;;  %v1698_v3 = vadd.f32 %v1697_v0, %v1665_v63  ;;  %v1666_v5 = vpop.f32.mrf.mxu1  ;;  %v1634_v7 = vadd.f32 %v1633_v4, %v3532_v45  ;;  %v637_v45 = vpack.c.b16 %v557_v13, %v557_v13  ;;  %v2829_v4 = vld [vmem:[%s3928_s0 + $0xec] sm:$0xf0] }
  0xf9   :  { %v3736_v8 = vadd.f32 %v1730_v1, %v1698_v3  ;;  %v1667_v9 = vadd.f32 %v1666_v5, %v1634_v7  ;;  %v2821_v5 = vld [vmem:[%s3928_s0 + $0xb4] sm:$0xf]  ;;  %v2830_v7 = vld [vmem:[%s3928_s0 + $0xf4] sm:$0xf0] }
  0xfa   :  { %v2150_v13 = vor.u32 %v2821_v5, %v2147_v6  ;;  %v2283_v5 = vld [vmem:[%s3928_s0 + $0x1f8] sm:$0xf0] }
  0xfe   :  { %v1699_v14 = vpop.f32.mrf.mxu2  ;;  %v1636_v20 = vpop.f32.mrf.mxu0 }
  0xff   :  { %v1732_v15 = vpop.f32.mrf.mxu3  ;;  %v1700_v19 = vadd.f32 %v1699_v14, %v1667_v9  ;;  %v1669_v21 = vpop.f32.mrf.mxu1  ;;  %v1637_v23 = vadd.f32 %v1636_v20, %v3541_v55  ;;  %v2081_v55 = vld [vmem:[%s3928_s0 + $0x30] sm:$0xf]  ;;  %v2155_v9 = vld [vmem:[%s3928_s0 + $0xf8] sm:$0xf0] }
 0x100   :  { %v2082_v46 = vor.u32 %v2813_v36, %v2081_v55  ;;  %v2211_v55 = vld [vmem:[%s3928_s0 + $0x170] sm:$0xf0]  ;;  %v2846_v36 = vld [vmem:[%s3928_s0 + $0x174] sm:$0xf0] }
 0x101   :  { %v3739_v24 = vadd.f32 %v1732_v15, %v1700_v19  ;;  %v1670_v28 = vadd.f32 %v1669_v21, %v1637_v23  ;;  %1782 = vmatmul.bf16.gmra.mxu0 %v634_v17  ;;  %v2158_v19 = vor.u32 %v2822_v25, %v2155_v9 }
 0x102   :  { %1815 = vmatmul.bf16.gmra.mxu1 %v635_v18 }
 0x103   :  { %1848 = vmatmul.bf16.gmra.mxu2 %v636_v22 }
 0x104   :  { %1881 = vmatmul.bf16.gmra.mxu3 %v637_v45 }
 0x106   :  { %v1702_v29 = vpop.f32.mrf.mxu2  ;;  %v1638_v59 = vpop.f32.mrf.mxu0 }
 0x107   :  { %v1735_v30 = vpop.f32.mrf.mxu3  ;;  %v1703_v31 = vadd.f32 %v1702_v29, %v1670_v28  ;;  %v1671_v32 = vpop.f32.mrf.mxu1  ;;  %v1639_v33 = vadd.f32 %v1638_v59, %v3580_v16  ;;  %v2089_v16 = vld [vmem:[%s3928_s0 + $0x38] sm:$0xf] }
 0x108   :  { %v2090_v51 = vor.u32 %v2814_v40, %v2089_v16 }
 0x109   :  { %v3742_v34 = vadd.f32 %v1735_v30, %v1703_v31  ;;  %v1672_v35 = vadd.f32 %v1671_v32, %v1639_v33  ;;  %v2845_v33 = vld [vmem:[%s3928_s0 + $0x16c] sm:$0xf0] }
 0x10e   :  { %v1704_v43 = vpop.f32.mrf.mxu2  ;;  %v1641_v49 = vpop.f32.mrf.mxu0 }
 0x10f   :  { %v1737_v44 = vpop.f32.mrf.mxu3  ;;  %v1705_v48 = vadd.f32 %v1704_v43, %v1672_v35  ;;  %v1674_v50 = vpop.f32.mrf.mxu1  ;;  %v1642_v54 = vadd.f32 %v1641_v49, %v3589_v27  ;;  %v2145_v27 = vld [vmem:[%s3928_s0 + $0xb0] sm:$0xf]  ;;  %v2837_v35 = vld [vmem:[%s3928_s0 + $0x134] sm:$0xf] }
 0x110   :  { %v2146_v12 = vor.u32 %v2829_v4, %v2145_v27  ;;  %v2214_v42 = vor.u32 %v2837_v35, %v2211_v55  ;;  %v2862_v27 = vld [vmem:[%s3928_s0 + $0x1f4] sm:$0xf0]  ;;  %v2854_v4 = vld [vmem:[%s3928_s0 + $0x1bc] sm:$0xf] }
 0x111   :  { %v3769_v56 = vadd.f32 %v1737_v44, %v1705_v48  ;;  %v1675_v57 = vadd.f32 %v1674_v50, %v1642_v54  ;;  %1894 = vmatmul.bf16.vlgmr.msrb.gmra.mxu0 %v2082_v46  ;;  %v2222_v48 = vor.u32 %v2838_v38, %v2219_v39 }
 0x112   :  { %1927 = vmatmul.bf16.vlgmr.msrb.gmra.mxu1 %v2086_v47 }
 0x113   :  { %1960 = vmatmul.bf16.vlgmr.msrb.gmra.mxu2 %v2090_v51 }
 0x114   :  { %1993 = vmatmul.bf16.vlgmr.msrb.gmra.mxu3 %v2094_v53 }
 0x116   :  { %v1707_v58 = vpop.f32.mrf.mxu2  ;;  %v1643_v62 = vpop.f32.mrf.mxu0 }
 0x117   :  { %v1740_v60 = vpop.f32.mrf.mxu3  ;;  %v1708_v61 = vadd.f32 %v1707_v58, %v1675_v57  ;;  %v1676_v63 = vpop.f32.mrf.mxu1  ;;  %v1644_v0 = vadd.f32 %v1643_v62, %v3628_v52  ;;  %v2153_v52 = vld [vmem:[%s3928_s0 + $0xb8] sm:$0xf]  ;;  %v2273_v62 = vld [vmem:[%s3928_s0 + $0x1b0] sm:$0xf] }
 0x118   :  { %v2154_v18 = vor.u32 %v2830_v7, %v2153_v52 }
 0x119   :  { %v3772_v1 = vadd.f32 %v1740_v60, %v1708_v61  ;;  %v1677_v3 = vadd.f32 %v1676_v63, %v1644_v0  ;;  %v2853_v63 = vld [vmem:[%s3928_s0 + $0x1b4] sm:$0xf] }
 0x11a   :  { %v2275_v0 = vld [vmem:[%s3928_s0 + $0x1f0] sm:$0xf0] }
 0x11b   :  { %v2278_v25 = vor.u32 %v2853_v63, %v2275_v0 }
 0x11e   :  { %v1709_v10 = vpop.f32.mrf.mxu2  ;;  %v1646_v15 = vpop.f32.mrf.mxu0 }
 0x11f   :  { %v1742_v11 = vpop.f32.mrf.mxu3  ;;  %v1710_v14 = vadd.f32 %v1709_v10, %v1677_v3  ;;  %v1679_v17 = vpop.f32.mrf.mxu1  ;;  %v1647_v20 = vadd.f32 %v1646_v15, %v3643_v2  ;;  %v2209_v2 = vld [vmem:[%s3928_s0 + $0x130] sm:$0xf]  ;;  %v2281_v3 = vld [vmem:[%s3928_s0 + $0x1b8] sm:$0xf] }
 0x120   :  { %v2210_v41 = vor.u32 %v2845_v33, %v2209_v2 }
 0x121   :  { %v3799_v21 = vadd.f32 %v1742_v11, %v1710_v14  ;;  %v1680_v22 = vadd.f32 %v1679_v17, %v1647_v20  ;;  %1899 = vmatmul.bf16.gmra.mxu0 %v2146_v12  ;;  %v2282_v11 = vor.u32 %v2862_v27, %v2281_v3  ;;  %v2286_v12 = vor.u32 %v2854_v4, %v2283_v5 }
 0x122   :  { %1932 = vmatmul.bf16.gmra.mxu1 %v2150_v13 }
 0x123   :  { %1965 = vmatmul.bf16.gmra.mxu2 %v2154_v18 }
 0x124   :  { %1998 = vmatmul.bf16.gmra.mxu3 %v2158_v19 }
 0x126   :  { %v1712_v45 = vpop.f32.mrf.mxu2  ;;  %v1648_v29 = vpop.f32.mrf.mxu0 }
 0x127   :  { %v1745_v23 = vpop.f32.mrf.mxu3  ;;  %v1713_v28 = vadd.f32 %v1712_v45, %v1680_v22  ;;  %v1681_v30 = vpop.f32.mrf.mxu1  ;;  %v1649_v31 = vadd.f32 %v1648_v29, %v3676_v26  ;;  %v2217_v26 = vld [vmem:[%s3928_s0 + $0x138] sm:$0xf]  ;;  %v84_v22 = vld [vmem:[%s3928_s0 + $0x230] sm:$0xff] }
 0x128   :  { %v2218_v47 = vor.u32 %v2846_v36, %v2217_v26  ;;  %v558_v29 = vunpack.c.l.b16 %v84_v22 }
 0x129   :  { %v3802_v59 = vadd.f32 %v1745_v23, %v1713_v28  ;;  %v1682_v32 = vadd.f32 %v1681_v30, %v1649_v31  ;;  %v559_v30 = vunpack.c.h.b16 %v84_v22 }
 0x12a   :  { %v638_v35 = vpack.c.b16 %v558_v29, %v558_v29 }
 0x12b   :  { %v639_v55 = vpack.c.b16 %v559_v30, %v559_v30 }
 0x12e   :  { %v1714_v16 = vpop.f32.mrf.mxu2  ;;  %v1651_v44 = vpop.f32.mrf.mxu0 }
 0x12f   :  { %v1747_v40 = vpop.f32.mrf.mxu3  ;;  %v1715_v43 = vadd.f32 %v1714_v16, %v1682_v32  ;;  %v1684_v46 = vpop.f32.mrf.mxu1  ;;  %v1652_v49 = vadd.f32 %v1651_v44, %v3690_v37  ;;  %v2861_v37 = vld [vmem:[%s3928_s0 + $0x1ec] sm:$0xf0] }
 0x130   :  { %v2274_v7 = vor.u32 %v2861_v37, %v2273_v62 }
 0x131   :  { %v3829_v50 = vadd.f32 %v1747_v40, %v1715_v43  ;;  %v1685_v51 = vadd.f32 %v1684_v46, %v1652_v49  ;;  %1904 = vmatmul.bf16.gmra.mxu0 %v2210_v41 }
 0x132   :  { %1937 = vmatmul.bf16.gmra.mxu1 %v2214_v42 }
 0x133   :  { %1970 = vmatmul.bf16.gmra.mxu2 %v2218_v47 }
 0x134   :  { %2003 = vmatmul.bf16.gmra.mxu3 %v2222_v48 }
 0x136   :  { %v1717_v53 = vpop.f32.mrf.mxu2  ;;  %v1653_v58 = vpop.f32.mrf.mxu0 }
 0x137   :  { %v1750_v54 = vpop.f32.mrf.mxu3  ;;  %v1718_v57 = vadd.f32 %v1717_v53, %v1685_v51  ;;  %v1686_v60 = vpop.f32.mrf.mxu1 }
 0x139   :  { %v3831_v61 = vadd.f32 %v1750_v54, %v1718_v57 }
 0x13e   :  { %v1719_v6 = vpop.f32.mrf.mxu2  ;;  %v1763_v9 = vpop.f32.mrf.mxu0 }
 0x13f   :  { %v1752_v52 = vpop.f32.mrf.mxu3  ;;  %v1796_v10 = vpop.f32.mrf.mxu1  ;;  %v1764_v13 = vadd.f32 %v1763_v9, %v3736_v8  ;;  %v85_v8 = vld [vmem:[%s3928_s0 + $0x238] sm:$0xff] }
 0x140   :  { %v560_v31 = vunpack.c.l.b16 %v85_v8  ;;  %v561_v32 = vunpack.c.h.b16 %v85_v8 }
 0x141   :  { %v1797_v14 = vadd.f32 %v1796_v10, %v1764_v13  ;;  %1909 = vmatmul.bf16.gmra.mxu0 %v2274_v7 }
 0x142   :  { %1942 = vmatmul.bf16.gmra.mxu1 %v2278_v25  ;;  %v640_v39 = vpack.c.b16 %v560_v31, %v560_v31 }
 0x143   :  { %1975 = vmatmul.bf16.gmra.mxu2 %v2282_v11 }
 0x144   :  { %2008 = vmatmul.bf16.gmra.mxu3 %v2286_v12 }
 0x146   :  { %v1829_v15 = vpop.f32.mrf.mxu2  ;;  %v1765_v19 = vpop.f32.mrf.mxu0 }
 0x147   :  { %v1862_v17 = vpop.f32.mrf.mxu3  ;;  %v1830_v18 = vadd.f32 %v1829_v15, %v1797_v14  ;;  %v1798_v20 = vpop.f32.mrf.mxu1  ;;  %v1766_v45 = vadd.f32 %v1765_v19, %v3739_v24  ;;  %v641_v24 = vpack.c.b16 %v561_v32, %v561_v32 }
 0x149   :  { %v3865_v23 = vadd.f32 %v1862_v17, %v1830_v18  ;;  %v1799_v28 = vadd.f32 %v1798_v20, %v1766_v45 }
 0x14e   :  { %v1831_v2 = vpop.f32.mrf.mxu2  ;;  %v1768_v36 = vpop.f32.mrf.mxu0 }
 0x14f   :  { %v1864_v33 = vpop.f32.mrf.mxu3  ;;  %v1832_v26 = vadd.f32 %v1831_v2, %v1799_v28  ;;  %v1801_v38 = vpop.f32.mrf.mxu1  ;;  %v1769_v16 = vadd.f32 %v1768_v36, %v3742_v34 }
 0x151   :  { %v3868_v40 = vadd.f32 %v1864_v33, %v1832_v26  ;;  %v1802_v41 = vadd.f32 %v1801_v38, %v1769_v16  ;;  %1914 = vmatmul.bf16.gmra.mxu0 %v638_v35 }
 0x152   :  { %1947 = vmatmul.bf16.gmra.mxu1 %v639_v55 }
 0x153   :  { %1980 = vmatmul.bf16.gmra.mxu2 %v640_v39 }
 0x154   :  { %2013 = vmatmul.bf16.gmra.mxu3 %v641_v24 }
 0x156   :  { %v1834_v42 = vpop.f32.mrf.mxu2  ;;  %v1770_v46 = vpop.f32.mrf.mxu0 }
 0x157   :  { %v1867_v43 = vpop.f32.mrf.mxu3  ;;  %v1835_v44 = vadd.f32 %v1834_v42, %v1802_v41  ;;  %v1803_v47 = vpop.f32.mrf.mxu1  ;;  %v1771_v48 = vadd.f32 %v1770_v46, %v3769_v56 }
 0x159   :  { %v3871_v49 = vadd.f32 %v1867_v43, %v1835_v44  ;;  %v1804_v51 = vadd.f32 %v1803_v47, %v1771_v48 }
 0x15e   :  { %v1836_v53 = vpop.f32.mrf.mxu2  ;;  %v1773_v57 = vpop.f32.mrf.mxu0 }
 0x15f   :  { %v1869_v54 = vpop.f32.mrf.mxu3  ;;  %v1837_v34 = vadd.f32 %v1836_v53, %v1804_v51  ;;  %v1806_v58 = vpop.f32.mrf.mxu1  ;;  %v1774_v60 = vadd.f32 %v1773_v57, %v3772_v1 }
 0x161   :  { %v3874_v62 = vadd.f32 %v1869_v54, %v1837_v34  ;;  %v1807_v37 = vadd.f32 %v1806_v58, %v1774_v60 }
 0x166   :  { %v1839_v63 = vpop.f32.mrf.mxu2  ;;  %v1775_v27 = vpop.f32.mrf.mxu0 }
 0x167   :  { %v1872_v0 = vpop.f32.mrf.mxu3  ;;  %v1840_v3 = vadd.f32 %v1839_v63, %v1807_v37  ;;  %v1808_v4 = vpop.f32.mrf.mxu1  ;;  %v1776_v56 = vadd.f32 %v1775_v27, %v3799_v21 }
 0x169   :  { %v3877_v5 = vadd.f32 %v1872_v0, %v1840_v3  ;;  %v1809_v6 = vadd.f32 %v1808_v4, %v1776_v56 }
 0x16e   :  { %v1841_v52 = vpop.f32.mrf.mxu2  ;;  %v1778_v9 = vpop.f32.mrf.mxu0 }
 0x16f   :  { %v1874_v7 = vpop.f32.mrf.mxu3  ;;  %v1842_v25 = vadd.f32 %v1841_v52, %v1809_v6  ;;  %v1811_v10 = vpop.f32.mrf.mxu1  ;;  %v1779_v1 = vadd.f32 %v1778_v9, %v3802_v59 }
 0x171   :  { %v3880_v11 = vadd.f32 %v1874_v7, %v1842_v25  ;;  %v1812_v12 = vadd.f32 %v1811_v10, %v1779_v1 }
 0x176   :  { %v1844_v13 = vpop.f32.mrf.mxu2  ;;  %v1780_v17 = vpop.f32.mrf.mxu0 }
 0x177   :  { %v1877_v14 = vpop.f32.mrf.mxu3  ;;  %v1845_v15 = vadd.f32 %v1844_v13, %v1812_v12  ;;  %v1813_v18 = vpop.f32.mrf.mxu1  ;;  %v1781_v21 = vadd.f32 %v1780_v17, %v3829_v50 }
 0x179   :  { %v3883_v19 = vadd.f32 %v1877_v14, %v1845_v15  ;;  %v1814_v20 = vadd.f32 %v1813_v18, %v1781_v21 }
 0x17e   :  { %v1846_v22 = vpop.f32.mrf.mxu2  ;;  %v1783_v28 = vpop.f32.mrf.mxu0 }
 0x17f   :  { %v1879_v45 = vpop.f32.mrf.mxu3  ;;  %v1847_v8 = vadd.f32 %v1846_v22, %v1814_v20  ;;  %v1816_v29 = vpop.f32.mrf.mxu1  ;;  %v1784_v59 = vadd.f32 %v1783_v28, %v3831_v61 }
 0x181   :  { %v3886_v30 = vadd.f32 %v1879_v45, %v1847_v8  ;;  %v1817_v31 = vadd.f32 %v1816_v29, %v1784_v59 }
 0x186   :  { %v1849_v32 = vpop.f32.mrf.mxu2  ;;  %v1785_v35 = vpop.f32.mrf.mxu0 }
 0x187   :  { %v1882_v2 = vpop.f32.mrf.mxu3  ;;  %v1850_v33 = vadd.f32 %v1849_v32, %v1817_v31  ;;  %v1818_v55 = vpop.f32.mrf.mxu1 }
 0x189   :  { %v3888_v26 = vadd.f32 %v1882_v2, %v1850_v33 }
 0x18e   :  { %v1851_v50 = vpop.f32.mrf.mxu2  ;;  %v1895_v38 = vpop.f32.mrf.mxu0 }
 0x18f   :  { %v1884_v36 = vpop.f32.mrf.mxu3  ;;  %v1928_v39 = vpop.f32.mrf.mxu1  ;;  %v1896_v24 = vadd.f32 %v1895_v38, %v3865_v23 }
 0x191   :  { %v1929_v16 = vadd.f32 %v1928_v39, %v1896_v24 }
 0x196   :  { %v1961_v41 = vpop.f32.mrf.mxu2  ;;  %v1897_v43 = vpop.f32.mrf.mxu0 }
 0x197   :  { %v1994_v42 = vpop.f32.mrf.mxu3  ;;  %v1962_v61 = vadd.f32 %v1961_v41, %v1929_v16  ;;  %v1930_v44 = vpop.f32.mrf.mxu1  ;;  %v1898_v47 = vadd.f32 %v1897_v43, %v3868_v40 }
 0x199   :  { %v1995_v46 = vadd.f32 %v1994_v42, %v1962_v61  ;;  %v1931_v48 = vadd.f32 %v1930_v44, %v1898_v47 }
 0x19b   :  { %2018 = vst [vmem:[%s3929_s3] sm:$0xff] %v1995_v46 }
 0x19e   :  { %v1963_v51 = vpop.f32.mrf.mxu2  ;;  %v1900_v34 = vpop.f32.mrf.mxu0 }
 0x19f   :  { %v1996_v53 = vpop.f32.mrf.mxu3  ;;  %v1964_v54 = vadd.f32 %v1963_v51, %v1931_v48  ;;  %v1933_v57 = vpop.f32.mrf.mxu1  ;;  %v1901_v58 = vadd.f32 %v1900_v34, %v3871_v49 }
 0x1a1   :  { %v1997_v23 = vadd.f32 %v1996_v53, %v1964_v54  ;;  %v1934_v60 = vadd.f32 %v1933_v57, %v1901_v58 }
 0x1a3   :  { %2019 = vst [vmem:[%s3929_s3 + $0x8] sm:$0xff] %v1997_v23 }
 0x1a6   :  { %v1966_v37 = vpop.f32.mrf.mxu2  ;;  %v1902_v0 = vpop.f32.mrf.mxu0 }
 0x1a7   :  { %v1999_v40 = vpop.f32.mrf.mxu3  ;;  %v1967_v63 = vadd.f32 %v1966_v37, %v1934_v60  ;;  %v1935_v3 = vpop.f32.mrf.mxu1  ;;  %v1903_v4 = vadd.f32 %v1902_v0, %v3874_v62 }
 0x1a9   :  { %v2000_v27 = vadd.f32 %v1999_v40, %v1967_v63  ;;  %v1936_v56 = vadd.f32 %v1935_v3, %v1903_v4 }
 0x1ab   :  { %2020 = vst [vmem:[%s3929_s3 + $0x10] sm:$0xff] %v2000_v27 }
 0x1ae   :  { %v1968_v6 = vpop.f32.mrf.mxu2  ;;  %v1905_v7 = vpop.f32.mrf.mxu0 }
 0x1af   :  { %v2001_v49 = vpop.f32.mrf.mxu3  ;;  %v1969_v52 = vadd.f32 %v1968_v6, %v1936_v56  ;;  %v1938_v25 = vpop.f32.mrf.mxu1  ;;  %v1906_v10 = vadd.f32 %v1905_v7, %v3877_v5 }
 0x1b1   :  { %v2002_v9 = vadd.f32 %v2001_v49, %v1969_v52  ;;  %v1939_v1 = vadd.f32 %v1938_v25, %v1906_v10 }
 0x1b3   :  { %2021 = vst [vmem:[%s3929_s3 + $0x18] sm:$0xff] %v2002_v9 }
 0x1b6   :  { %v1971_v12 = vpop.f32.mrf.mxu2  ;;  %v1907_v14 = vpop.f32.mrf.mxu0 }
 0x1b7   :  { %v2004_v62 = vpop.f32.mrf.mxu3  ;;  %v1972_v13 = vadd.f32 %v1971_v12, %v1939_v1  ;;  %v1940_v15 = vpop.f32.mrf.mxu1  ;;  %v1908_v18 = vadd.f32 %v1907_v14, %v3880_v11 }
 0x1b9   :  { %v2005_v17 = vadd.f32 %v2004_v62, %v1972_v13  ;;  %v1941_v21 = vadd.f32 %v1940_v15, %v1908_v18 }
 0x1bb   :  { %2022 = vst [vmem:[%s3929_s3 + $0x20] sm:$0xff] %v2005_v17 }
 0x1be   :  { %v1973_v20 = vpop.f32.mrf.mxu2  ;;  %v1910_v45 = vpop.f32.mrf.mxu0 }
 0x1bf   :  { %v2006_v5 = vpop.f32.mrf.mxu3  ;;  %v1974_v22 = vadd.f32 %v1973_v20, %v1941_v21  ;;  %v1943_v8 = vpop.f32.mrf.mxu1  ;;  %v1911_v29 = vadd.f32 %v1910_v45, %v3883_v19 }
 0x1c1   :  { %v2007_v28 = vadd.f32 %v2006_v5, %v1974_v22  ;;  %v1944_v59 = vadd.f32 %v1943_v8, %v1911_v29 }
 0x1c3   :  { %2023 = vst [vmem:[%s3929_s3 + $0x28] sm:$0xff] %v2007_v28 }
 0x1c6   :  { %v1976_v31 = vpop.f32.mrf.mxu2  ;;  %v1912_v2 = vpop.f32.mrf.mxu0 }
 0x1c7   :  { %v2009_v11 = vpop.f32.mrf.mxu3  ;;  %v1977_v32 = vadd.f32 %v1976_v31, %v1944_v59  ;;  %v1945_v33 = vpop.f32.mrf.mxu1  ;;  %v1913_v55 = vadd.f32 %v1912_v2, %v3886_v30 }
 0x1c9   :  { %v2010_v35 = vadd.f32 %v2009_v11, %v1977_v32  ;;  %v1946_v50 = vadd.f32 %v1945_v33, %v1913_v55 }
 0x1cb   :  { %2024 = vst [vmem:[%s3929_s3 + $0x30] sm:$0xff] %v2010_v35 }
 0x1ce   :  { %v1978_v36 = vpop.f32.mrf.mxu2  ;;  %v1915_v39 = vpop.f32.mrf.mxu0 }
 0x1cf   :  { %v2011_v19 = vpop.f32.mrf.mxu3  ;;  %v1979_v38 = vadd.f32 %v1978_v36, %v1946_v50  ;;  %v1948_v24 = vpop.f32.mrf.mxu1  ;;  %v1916_v41 = vadd.f32 %v1915_v39, %v3888_v26 }
 0x1d1   :  { %v2012_v16 = vadd.f32 %v2011_v19, %v1979_v38  ;;  %v1949_v42 = vadd.f32 %v1948_v24, %v1916_v41 }
 0x1d3   :  { %2025 = vst [vmem:[%s3929_s3 + $0x38] sm:$0xff] %v2012_v16 }
 0x1d6   :  { %v1981_v61 = vpop.f32.mrf.mxu2  ;;  %v1917_v44 = vpop.f32.mrf.mxu0 }
 0x1d7   :  { %v2014_v30 = vpop.f32.mrf.mxu3  ;;  %v1982_v43 = vadd.f32 %v1981_v61, %v1949_v42  ;;  %v1950_v46 = vpop.f32.mrf.mxu1 }
 0x1d9   :  { %v2015_v47 = vadd.f32 %v2014_v30, %v1982_v43 }
 0x1db   :  { %2026 = vst [vmem:[%s3929_s3 + $0x40] sm:$0xff] %v2015_v47 }
 0x1de   :  { %v1983_v48 = vpop.f32.mrf.mxu2 }
 0x1df   :  { %v2016_v51 = vpop.f32.mrf.mxu3 }

</bundles_post_ra>
